<compile_context>
chip_gen: v7x
topology: tpu7x:2x2x1
jax: 0.10.0
libtpu: 0.0.40
codegen_flags: <defaults>
</compile_context>

<pallas_src>
import jax
import jax.numpy as jnp
from jax import lax
from jax.experimental import pallas as pl
from jax.experimental.pallas import tpu as pltpu

LN_EPS = 1e-5   # PyTorch nn.LayerNorm default


def _layer_norm_relu(z, gamma, beta):
    mu = jnp.mean(z, axis=-1, keepdims=True)
    var = jnp.mean((z - mu) * (z - mu), axis=-1, keepdims=True)
    zn = (z - mu) * lax.rsqrt(var + LN_EPS) * gamma + beta
    return jnp.maximum(zn, 0.0)   # ReLU (dropout = identity in eval mode)


# ----------------------------------------------------------------------------
# Kernel 1: edge update.
#   grid = (edge row tiles [parallel], vertex reduction tiles [arbitrary])
#   per step:  xv_aug = X_blk @ Wv_aug + bv_aug          (fused theta_vertex;
#                                                          last column == 1)
#              acc   += H_blk^T @ xv_aug                 (trans-A MXU matmul;
#                                                          acc[:, -1] = deg_e)
#   finalize:  Me = acc[:, :C]/deg ; Y1 = edge_merge([Y0, Me]);
#              Y2_aug = Y1 @ We_aug + be_aug (last col == 1, for stage-2 deg);
#              Yo = relu(LN_e(Y2))  (skipped statically when fix_edge=True)
# ----------------------------------------------------------------------------
def _make_edge_kernel(with_yout: bool):
    def kernel(*refs):
        if with_yout:
            (y0_ref, x_ref, h_ref, wv_ref, bv_ref, wemy_ref, wemm_ref, bem_ref,
             we_ref, be_ref, ge_ref, bte_ref, y2aug_ref, yout_ref, acc_ref) = refs
        else:
            (y0_ref, x_ref, h_ref, wv_ref, bv_ref, wemy_ref, wemm_ref, bem_ref,
             we_ref, be_ref, y2aug_ref, acc_ref) = refs
            ge_ref = bte_ref = yout_ref = None

        k = pl.program_id(1)

        @pl.when(k == 0)
        def _():
            acc_ref[...] = jnp.zeros_like(acc_ref)

        # Fused theta_vertex (+ constant-1 degree column baked into weights).
        xv_aug = (jnp.dot(x_ref[...], wv_ref[...],
                          preferred_element_type=jnp.float32)
                  + bv_ref[...]).astype(jnp.bfloat16)

        # v->e sum aggregation + degree in one trans-A MXU matmul over H.
        acc_ref[...] += lax.dot_general(
            h_ref[...], xv_aug,
            dimension_numbers=(((0,), (0,)), ((), ())),
            preferred_element_type=jnp.float32)

        @pl.when(k == pl.num_programs(1) - 1)
        def _():
            acc = acc_ref[...]
            c_e = acc.shape[-1] - 1
            deg = jnp.maximum(acc[:, c_e:], 1.0)          # mean aggregation
            m_e = (acc[:, :c_e] / deg).astype(jnp.bfloat16)
            y1 = (jnp.dot(y0_ref[...], wemy_ref[...],
                          preferred_element_type=jnp.float32)
                  + jnp.dot(m_e, wemm_ref[...],
                            preferred_element_type=jnp.float32)
                  + bem_ref[...])                          # edge_merge(cat)
            y2_aug = (jnp.dot(y1.astype(jnp.bfloat16), we_ref[...],
                              preferred_element_type=jnp.float32)
                      + be_ref[...])                       # theta_edge (+ones col)
            y2aug_ref[...] = y2_aug.astype(y2aug_ref.dtype)
            if with_yout:
                c_v = y2_aug.shape[-1] - 1
                yout_ref[...] = _layer_norm_relu(
                    y2_aug[:, :c_v], ge_ref[...], bte_ref[...]
                ).astype(yout_ref.dtype)
    return kernel


# ----------------------------------------------------------------------------
# Kernel 2: vertex update.
#   grid = (vertex row tiles [parallel], edge reduction tiles [arbitrary])
#   per step:  acc += H_blk @ Y2_aug_blk   (acc[:, -1] = deg_v via ones column)
#   finalize:  Mv = acc[:, :C]/deg ; X2 = vertex_merge([X0, Mv]);
#              Xo = relu(LN_v(X2))
# ----------------------------------------------------------------------------
def _vertex_kernel(x0_ref, h_ref, y2aug_ref, wvmx_ref, wvmm_ref, bvm_ref,
                   gv_ref, btv_ref, xout_ref, acc_ref):
    k = pl.program_id(1)

    @pl.when(k == 0)
    def _():
        acc_ref[...] = jnp.zeros_like(acc_ref)

    acc_ref[...] += jnp.dot(h_ref[...], y2aug_ref[...],
                            preferred_element_type=jnp.float32)

    @pl.when(k == pl.num_programs(1) - 1)
    def _():
        acc = acc_ref[...]
        c_v = acc.shape[-1] - 1
        deg = jnp.maximum(acc[:, c_v:], 1.0)
        m_v = (acc[:, :c_v] / deg).astype(jnp.bfloat16)
        x2 = (jnp.dot(x0_ref[...], wvmx_ref[...],
                      preferred_element_type=jnp.float32)
              + jnp.dot(m_v, wvmm_ref[...],
                        preferred_element_type=jnp.float32)
              + bvm_ref[...])                              # vertex_merge(cat)
        xout_ref[...] = _layer_norm_relu(
            x2, gv_ref[...], btv_ref[...]).astype(xout_ref.dtype)


# ----------------------------------------------------------------------------
# Wrapper
# ----------------------------------------------------------------------------
def uniegnn_conv_forward(X, Y, H, params, *, fix_edge=False,
                         tile_v=256, tile_e=256, tile_kv=2048, tile_ke=2048):
    """X:(Nv,Cv) vertex feats, Y:(Ne,Ce) edge feats, H:(Nv,Ne) incidence."""
    n_v, c_v = X.shape
    n_e, c_e = Y.shape
    assert H.shape == (n_v, n_e)
    assert c_v == c_e, "module's LayerNorm shapes require in_channels == out_channels"

    tile_v = min(tile_v, n_v)
    tile_e = min(tile_e, n_e)
    tile_kv = min(tile_kv, n_v)
    tile_ke = min(tile_ke, n_e)
    assert n_v % tile_v == 0 and n_v % tile_kv == 0
    assert n_e % tile_e == 0 and n_e % tile_ke == 0

    bf16, f32 = jnp.bfloat16, jnp.float32
    y_in = Y                       # returned untouched when fix_edge=True
    xb = X.astype(bf16)
    yb = Y.astype(bf16)
    hb = H.astype(bf16)            # H is exactly {0,1}: bf16 is lossless

    # Weights as bf16 MXU operands; biases / LN params stay f32.
    # theta_vertex / theta_edge get one extra all-zero weight column whose bias
    # is 1.0, so the MXU aggregation accumulates the degree in its last lane.
    zc_v = jnp.zeros((c_v, 1), f32)
    zc_e = jnp.zeros((c_e, 1), f32)
    one = jnp.ones((1, 1), f32)
    wv_aug = jnp.concatenate([params["w_v"], zc_v], axis=1).astype(bf16)   # (Cv, Ce+1)
    bv_aug = jnp.concatenate([params["b_v"], one], axis=1).astype(f32)
    we_aug = jnp.concatenate([params["w_e"], zc_e], axis=1).astype(bf16)   # (Ce, Cv+1)
    be_aug = jnp.concatenate([params["b_e"], one], axis=1).astype(f32)
    wem_y = params["w_em"][:c_e].astype(bf16)
    wem_m = params["w_em"][c_e:].astype(bf16)
    bem = params["b_em"].astype(f32)
    wvm_x = params["w_vm"][:c_v].astype(bf16)
    wvm_m = params["w_vm"][c_v:].astype(bf16)
    bvm = params["b_vm"].astype(f32)
    g_e, bt_e = params["g_e"].astype(f32), params["bt_e"].astype(f32)
    g_v, bt_v = params["g_v"].astype(f32), params["bt_v"].astype(f32)

    c_agg_e = c_e + 1   # aggregated width (features + degree lane), v->e
    c_agg_v = c_v + 1   # aggregated width (features + degree lane), e->v

    cparams = pltpu.CompilerParams(
        dimension_semantics=("parallel", "arbitrary"),
        vmem_limit_bytes=32 * 1024 * 1024)

    # ---- stage 1: edge update (fused theta_vertex + v->e mean + edge_merge +
    #               theta_edge + optional LN/ReLU) ----------------------------
    with_yout = not fix_edge
    edge_out_shape = [jax.ShapeDtypeStruct((n_e, c_agg_v), bf16)]   # Y2 (+ones col)
    edge_out_specs = [pl.BlockSpec((tile_e, c_agg_v), lambda i, k: (i, 0))]
    if with_yout:
        edge_out_shape.append(jax.ShapeDtypeStruct((n_e, c_e), f32))
        edge_out_specs.append(pl.BlockSpec((tile_e, c_e), lambda i, k: (i, 0)))

    edge_in_specs = [
        pl.BlockSpec((tile_e, c_e), lambda i, k: (i, 0)),        # Y0 (resident)
        pl.BlockSpec((tile_kv, c_v), lambda i, k: (k, 0)),       # X  (streamed)
        pl.BlockSpec((tile_kv, tile_e), lambda i, k: (k, i)),    # H  (no HBM transpose)
        pl.BlockSpec((c_v, c_agg_e), lambda i, k: (0, 0)),       # W_v (augmented)
        pl.BlockSpec((1, c_agg_e), lambda i, k: (0, 0)),         # b_v (augmented)
        pl.BlockSpec((c_e, c_e), lambda i, k: (0, 0)),           # W_em (Y0 half)
        pl.BlockSpec((c_e, c_e), lambda i, k: (0, 0)),           # W_em (Me half)
        pl.BlockSpec((1, c_e), lambda i, k: (0, 0)),             # b_em
        pl.BlockSpec((c_e, c_agg_v), lambda i, k: (0, 0)),       # W_e (augmented)
        pl.BlockSpec((1, c_agg_v), lambda i, k: (0, 0)),         # b_e (augmented)
    ]
    edge_args = [yb, xb, hb, wv_aug, bv_aug, wem_y, wem_m, bem, we_aug, be_aug]
    if with_yout:
        edge_in_specs += [pl.BlockSpec((1, c_e), lambda i, k: (0, 0)),   # LN_e gamma
                          pl.BlockSpec((1, c_e), lambda i, k: (0, 0))]   # LN_e beta
        edge_args += [g_e, bt_e]

    edge_results = pl.pallas_call(
        _make_edge_kernel(with_yout),
        out_shape=tuple(edge_out_shape),
        grid_spec=pltpu.PrefetchScalarGridSpec(
            num_scalar_prefetch=0,
            grid=(n_e // tile_e, n_v // tile_kv),
            in_specs=edge_in_specs,
            out_specs=tuple(edge_out_specs),
            scratch_shapes=[pltpu.VMEM((tile_e, c_agg_e), f32)]),
        compiler_params=cparams,
    )(*edge_args)
    y2_aug = edge_results[0]
    y_out = edge_results[1] if with_yout else None

    # ---- stage 2: vertex update (e->v mean + vertex_merge + LN/ReLU) --------
    x_out = pl.pallas_call(
        _vertex_kernel,
        out_shape=jax.ShapeDtypeStruct((n_v, c_v), f32),
        grid_spec=pltpu.PrefetchScalarGridSpec(
            num_scalar_prefetch=0,
            grid=(n_v // tile_v, n_e // tile_ke),
            in_specs=[
                pl.BlockSpec((tile_v, c_v), lambda i, k: (i, 0)),      # X0 (resident)
                pl.BlockSpec((tile_v, tile_ke), lambda i, k: (i, k)),  # H  (streamed)
                pl.BlockSpec((tile_ke, c_agg_v), lambda i, k: (k, 0)), # Y2 (+ones col)
                pl.BlockSpec((c_v, c_v), lambda i, k: (0, 0)),         # W_vm (X0 half)
                pl.BlockSpec((c_v, c_v), lambda i, k: (0, 0)),         # W_vm (Mv half)
                pl.BlockSpec((1, c_v), lambda i, k: (0, 0)),           # b_vm
                pl.BlockSpec((1, c_v), lambda i, k: (0, 0)),           # LN_v gamma
                pl.BlockSpec((1, c_v), lambda i, k: (0, 0)),           # LN_v beta
            ],
            out_specs=pl.BlockSpec((tile_v, c_v), lambda i, k: (i, 0)),
            scratch_shapes=[pltpu.VMEM((tile_v, c_agg_v), f32)]),
        compiler_params=cparams,
    )(xb, hb, y2_aug, wvm_x, wvm_m, bvm, g_v, bt_v)

    if fix_edge:
        return x_out, y_in          # fix_edge=True path returns (X, Y_0)
    return x_out, y_out


# ----------------------------------------------------------------------------
# Parameter init + pure-JAX reference
# ----------------------------------------------------------------------------
def init_params(key, c_v, c_e):
    ks = jax.random.split(key, 12)
    s_v = 1.0 / jnp.sqrt(jnp.float32(c_v))
    s_e = 1.0 / jnp.sqrt(jnp.float32(c_e))
    s_2e = 1.0 / jnp.sqrt(jnp.float32(2 * c_e))
    s_2v = 1.0 / jnp.sqrt(jnp.float32(2 * c_v))
    f32 = jnp.float32
    return {
        "w_v":  jax.random.normal(ks[0], (c_v, c_e), f32) * s_v,
        "b_v":  jax.random.normal(ks[1], (1, c_e), f32) * s_v,
        "w_em": jax.random.normal(ks[2], (2 * c_e, c_e), f32) * s_2e,
        "b_em": jax.random.normal(ks[3], (1, c_e), f32) * s_e,
        "w_e":  jax.random.normal(ks[4], (c_e, c_v), f32) * s_e,
        "b_e":  jax.random.normal(ks[5], (1, c_v), f32) * s_e,
        "w_vm": jax.random.normal(ks[6], (2 * c_v, c_v), f32) * s_2v,
        "b_vm": jax.random.normal(ks[7], (1, c_v), f32) * s_v,
        "g_e":  1.0 + 0.1 * jax.random.normal(ks[8], (1, c_e), f32),
        "bt_e": 0.1 * jax.random.normal(ks[9], (1, c_e), f32),
        "g_v":  1.0 + 0.1 * jax.random.normal(ks[10], (1, c_v), f32),
        "bt_v": 0.1 * jax.random.normal(ks[11], (1, c_v), f32),
    }


def _reference_forward(X, Y, H, params):
    def ln(z, g, b):
        mu = jnp.mean(z, axis=-1, keepdims=True)
        var = jnp.mean((z - mu) ** 2, axis=-1, keepdims=True)
        return (z - mu) * lax.rsqrt(var + LN_EPS) * g + b

    xv = X @ params["w_v"] + params["b_v"]
    deg_e = jnp.maximum(jnp.sum(H, axis=0)[:, None], 1.0)
    m_e = (H.T @ xv) / deg_e
    y1 = jnp.concatenate([Y, m_e], axis=-1) @ params["w_em"] + params["b_em"]
    y2 = y1 @ params["w_e"] + params["b_e"]
    deg_v = jnp.maximum(jnp.sum(H, axis=1)[:, None], 1.0)
    m_v = (H @ y2) / deg_v
    x2 = jnp.concatenate([X, m_v], axis=-1) @ params["w_vm"] + params["b_vm"]
    x_out = jax.nn.relu(ln(x2, params["g_v"], params["bt_v"]))
    y_out = jax.nn.relu(ln(y2, params["g_e"], params["bt_e"]))
    return x_out, y_out


if __name__ == "__main__":
    # TODO(synk): nn.Dropout training-mode masking is omitted (forward is eval mode).
    key = jax.random.PRNGKey(0)
    k_x, k_y, k_h, k_p = jax.random.split(key, 4)

    N_V, N_E, C = 512, 512, 32     # in_channels == out_channels == 32

    X = jax.random.normal(k_x, (N_V, C), dtype=jnp.float32)
    Y = jax.random.normal(k_y, (N_E, C), dtype=jnp.float32)
    # Random sparse-ish incidence matrix; guarantee every vertex/edge has >= 1 link.
    H = (jax.random.uniform(k_h, (N_V, N_E)) < 0.05).astype(jnp.float32)
    H = H.at[jnp.arange(N_V), jnp.arange(N_V) % N_E].set(1.0)

    params = init_params(k_p, C, C)

    x_out, y_out = uniegnn_conv_forward(X, Y, H, params)
    jax.block_until_ready((x_out, y_out))

    x_ref, y_ref = _reference_forward(X, Y, H, params)
    # Kernel uses bf16 MXU operands with f32 accumulation (H is exact in bf16);
    # worst-element deviation from the f32 reference is ~1e-2 on O(1) LN outputs.
    assert jnp.allclose(x_out, x_ref, atol=3e-2, rtol=3e-2), \
        float(jnp.max(jnp.abs(x_out - x_ref)))
    assert jnp.allclose(y_out, y_ref, atol=3e-2, rtol=3e-2), \
        float(jnp.max(jnp.abs(y_out - y_ref)))
    print("KERNEL_OK")
</pallas_src>

<mosaic_0001>
module attributes {stable_mosaic.version = 11 : i64} {
  func.func @kernel(%arg0: i32, %arg1: i32, %arg2: memref<256x32xbf16, #tpu.memory_space<vmem>>, %arg3: memref<512x32xbf16, #tpu.memory_space<vmem>>, %arg4: memref<512x256xbf16, #tpu.memory_space<vmem>>, %arg5: memref<32x33xbf16, #tpu.memory_space<vmem>>, %arg6: memref<1x33xf32, #tpu.memory_space<vmem>>, %arg7: memref<32x32xbf16, #tpu.memory_space<vmem>>, %arg8: memref<32x32xbf16, #tpu.memory_space<vmem>>, %arg9: memref<1x32xf32, #tpu.memory_space<vmem>>, %arg10: memref<32x33xbf16, #tpu.memory_space<vmem>>, %arg11: memref<1x33xf32, #tpu.memory_space<vmem>>, %arg12: memref<1x32xf32, #tpu.memory_space<vmem>>, %arg13: memref<1x32xf32, #tpu.memory_space<vmem>>, %arg14: memref<256x33xbf16, #tpu.memory_space<vmem>>, %arg15: memref<256x32xf32, #tpu.memory_space<vmem>>, %arg16: memref<256x33xf32, #tpu.memory_space<vmem>>) attributes {dimension_semantics = [#tpu.dimension_semantics<parallel>, #tpu.dimension_semantics<arbitrary>], iteration_bounds = array<i64: 2, 1>, scalar_prefetch = 0 : i64, scratch_operands = 1 : i64, tpu.core_type = #tpu.core_type<tc>, window_params = [{transform_indices = @transform_0, window_bounds = array<i64: 256, 32>}, {transform_indices = @transform_1, window_bounds = array<i64: 512, 32>}, {transform_indices = @transform_2, window_bounds = array<i64: 512, 256>}, {pipeline_mode = #tpu.pipeline_mode<synchronous>, transform_indices = @transform_3, window_bounds = array<i64: 32, 33>}, {pipeline_mode = #tpu.pipeline_mode<synchronous>, transform_indices = @transform_4, window_bounds = array<i64: 1, 33>}, {pipeline_mode = #tpu.pipeline_mode<synchronous>, transform_indices = @transform_5, window_bounds = array<i64: 32, 32>}, {pipeline_mode = #tpu.pipeline_mode<synchronous>, transform_indices = @transform_6, window_bounds = array<i64: 32, 32>}, {pipeline_mode = #tpu.pipeline_mode<synchronous>, transform_indices = @transform_7, window_bounds = array<i64: 1, 32>}, {pipeline_mode = #tpu.pipeline_mode<synchronous>, transform_indices = @transform_8, window_bounds = array<i64: 32, 33>}, {pipeline_mode = #tpu.pipeline_mode<synchronous>, transform_indices = @transform_9, window_bounds = array<i64: 1, 33>}, {pipeline_mode = #tpu.pipeline_mode<synchronous>, transform_indices = @transform_10, window_bounds = array<i64: 1, 32>}, {pipeline_mode = #tpu.pipeline_mode<synchronous>, transform_indices = @transform_11, window_bounds = array<i64: 1, 32>}, {transform_indices = @transform_12, window_bounds = array<i64: 256, 33>}, {transform_indices = @transform_13, window_bounds = array<i64: 256, 32>}]} {
    %c0_i32 = arith.constant 0 : i32
    %0 = arith.cmpi eq, %arg1, %c0_i32 : i32
    %1 = arith.extui %0 : i1 to i32
    %c0_i32_0 = arith.constant 0 : i32
    %2 = arith.cmpi ne, %1, %c0_i32_0 : i32
    scf.if %2 {
      %cst_15 = arith.constant 0.000000e+00 : f32
      %18 = vector.broadcast %cst_15 : f32 to vector<256x33xf32>
      %c0_16 = arith.constant 0 : index
      %c0_17 = arith.constant 0 : index
      %19 = vector.load %arg16[%c0_16, %c0_17] : memref<256x33xf32, #tpu.memory_space<vmem>>, vector<256x33xf32>
      tpu.vector_store %arg16[%c0_16, %c0_17], %18 {strides = array<i32>} : memref<256x33xf32, #tpu.memory_space<vmem>>, vector<256x33xf32>,
    } else {
    }
    %c0 = arith.constant 0 : index
    %c0_1 = arith.constant 0 : index
    %3 = vector.load %arg3[%c0, %c0_1] : memref<512x32xbf16, #tpu.memory_space<vmem>>, vector<512x32xbf16>
    %c0_2 = arith.constant 0 : index
    %c0_3 = arith.constant 0 : index
    %4 = vector.load %arg5[%c0_2, %c0_3] : memref<32x33xbf16, #tpu.memory_space<vmem>>, vector<32x33xbf16>
    %cst = arith.constant dense<0.000000e+00> : vector<512x33xf32>
    %5 = tpu.matmul %3, %4, %cst {dimension_numbers = #tpu.dot_dimension_numbers<[1], [0], [0], [1], [0, 0, 1, 1], [], []>} : vector<512x32xbf16>, vector<32x33xbf16>, vector<512x33xf32> -> vector<512x33xf32>
    %c0_4 = arith.constant 0 : index
    %c0_5 = arith.constant 0 : index
    %6 = vector.load %arg6[%c0_4, %c0_5] : memref<1x33xf32, #tpu.memory_space<vmem>>, vector<1x33xf32>
    %7 = vector.broadcast %6 : vector<1x33xf32> to vector<512x33xf32>
    %8 = arith.addf %5, %7 : vector<512x33xf32>
    %9 = arith.truncf %8 : vector<512x33xf32> to vector<512x33xbf16>
    %c0_6 = arith.constant 0 : index
    %c0_7 = arith.constant 0 : index
    %10 = vector.load %arg16[%c0_6, %c0_7] : memref<256x33xf32, #tpu.memory_space<vmem>>, vector<256x33xf32>
    %c0_8 = arith.constant 0 : index
    %c0_9 = arith.constant 0 : index
    %11 = vector.load %arg4[%c0_8, %c0_9] : memref<512x256xbf16, #tpu.memory_space<vmem>>, vector<512x256xbf16>
    %cst_10 = arith.constant dense<0.000000e+00> : vector<256x33xf32>
    %12 = tpu.matmul %11, %9, %cst_10 {dimension_numbers = #tpu.dot_dimension_numbers<[0], [0], [1], [1], [0, 1, 1, 1], [], []>} : vector<512x256xbf16>, vector<512x33xbf16>, vector<256x33xf32> -> vector<256x33xf32>
    %13 = arith.addf %10, %12 : vector<256x33xf32>
    %c0_11 = arith.constant 0 : index
    %c0_12 = arith.constant 0 : index
    %14 = vector.load %arg16[%c0_11, %c0_12] : memref<256x33xf32, #tpu.memory_space<vmem>>, vector<256x33xf32>
    tpu.vector_store %arg16[%c0_11, %c0_12], %13 {strides = array<i32>} : memref<256x33xf32, #tpu.memory_space<vmem>>, vector<256x33xf32>,
    %c0_i32_13 = arith.constant 0 : i32
    %15 = arith.cmpi eq, %arg1, %c0_i32_13 : i32
    %16 = arith.extui %15 : i1 to i32
    %c0_i32_14 = arith.constant 0 : i32
    %17 = arith.cmpi ne, %16, %c0_i32_14 : i32
    scf.if %17 {
      %c0_15 = arith.constant 0 : index
      %c0_16 = arith.constant 0 : index
      %18 = vector.load %arg16[%c0_15, %c0_16] : memref<256x33xf32, #tpu.memory_space<vmem>>, vector<256x33xf32>
      %19 = vector.extract_strided_slice %18 {offsets = [0, 32], sizes = [256, 1], strides = [1, 1]} : vector<256x33xf32> to vector<256x1xf32>
      %cst_17 = arith.constant 1.000000e+00 : f32
      %20 = vector.broadcast %cst_17 : f32 to vector<256x1xf32>
      %21 = arith.maximumf %19, %20 : vector<256x1xf32>
      %22 = vector.extract_strided_slice %18 {offsets = [0, 0], sizes = [256, 32], strides = [1, 1]} : vector<256x33xf32> to vector<256x32xf32>
      %23 = vector.broadcast %21 : vector<256x1xf32> to vector<256x32xf32>
      %24 = arith.divf %22, %23 : vector<256x32xf32>
      %25 = arith.truncf %24 : vector<256x32xf32> to vector<256x32xbf16>
      %c0_18 = arith.constant 0 : index
      %c0_19 = arith.constant 0 : index
      %26 = vector.load %arg2[%c0_18, %c0_19] : memref<256x32xbf16, #tpu.memory_space<vmem>>, vector<256x32xbf16>
      %c0_20 = arith.constant 0 : index
      %c0_21 = arith.constant 0 : index
      %27 = vector.load %arg7[%c0_20, %c0_21] : memref<32x32xbf16, #tpu.memory_space<vmem>>, vector<32x32xbf16>
      %cst_22 = arith.constant dense<0.000000e+00> : vector<256x32xf32>
      %28 = tpu.matmul %26, %27, %cst_22 {dimension_numbers = #tpu.dot_dimension_numbers<[1], [0], [0], [1], [0, 0, 1, 1], [], []>} : vector<256x32xbf16>, vector<32x32xbf16>, vector<256x32xf32> -> vector<256x32xf32>
      %c0_23 = arith.constant 0 : index
      %c0_24 = arith.constant 0 : index
      %29 = vector.load %arg8[%c0_23, %c0_24] : memref<32x32xbf16, #tpu.memory_space<vmem>>, vector<32x32xbf16>
      %cst_25 = arith.constant dense<0.000000e+00> : vector<256x32xf32>
      %30 = tpu.matmul %25, %29, %cst_25 {dimension_numbers = #tpu.dot_dimension_numbers<[1], [0], [0], [1], [0, 0, 1, 1], [], []>} : vector<256x32xbf16>, vector<32x32xbf16>, vector<256x32xf32> -> vector<256x32xf32>
      %31 = arith.addf %28, %30 : vector<256x32xf32>
      %c0_26 = arith.constant 0 : index
      %c0_27 = arith.constant 0 : index
      %32 = vector.load %arg9[%c0_26, %c0_27] : memref<1x32xf32, #tpu.memory_space<vmem>>, vector<1x32xf32>
      %33 = vector.broadcast %32 : vector<1x32xf32> to vector<256x32xf32>
      %34 = arith.addf %31, %33 : vector<256x32xf32>
      %35 = arith.truncf %34 : vector<256x32xf32> to vector<256x32xbf16>
      %c0_28 = arith.constant 0 : index
      %c0_29 = arith.constant 0 : index
      %36 = vector.load %arg10[%c0_28, %c0_29] : memref<32x33xbf16, #tpu.memory_space<vmem>>, vector<32x33xbf16>
      %cst_30 = arith.constant dense<0.000000e+00> : vector<256x33xf32>
      %37 = tpu.matmul %35, %36, %cst_30 {dimension_numbers = #tpu.dot_dimension_numbers<[1], [0], [0], [1], [0, 0, 1, 1], [], []>} : vector<256x32xbf16>, vector<32x33xbf16>, vector<256x33xf32> -> vector<256x33xf32>
      %c0_31 = arith.constant 0 : index
      %c0_32 = arith.constant 0 : index
      %38 = vector.load %arg11[%c0_31, %c0_32] : memref<1x33xf32, #tpu.memory_space<vmem>>, vector<1x33xf32>
      %39 = vector.broadcast %38 : vector<1x33xf32> to vector<256x33xf32>
      %40 = arith.addf %37, %39 : vector<256x33xf32>
      %41 = arith.truncf %40 : vector<256x33xf32> to vector<256x33xbf16>
      %c0_33 = arith.constant 0 : index
      %c0_34 = arith.constant 0 : index
      %42 = vector.load %arg14[%c0_33, %c0_34] : memref<256x33xbf16, #tpu.memory_space<vmem>>, vector<256x33xbf16>
      tpu.vector_store %arg14[%c0_33, %c0_34], %41 {strides = array<i32>} : memref<256x33xbf16, #tpu.memory_space<vmem>>, vector<256x33xbf16>,
      %43 = vector.extract_strided_slice %40 {offsets = [0, 0], sizes = [256, 32], strides = [1, 1]} : vector<256x33xf32> to vector<256x32xf32>
      %c0_35 = arith.constant 0 : index
      %c0_36 = arith.constant 0 : index
      %44 = vector.load %arg12[%c0_35, %c0_36] : memref<1x32xf32, #tpu.memory_space<vmem>>, vector<1x32xf32>
      %c0_37 = arith.constant 0 : index
      %c0_38 = arith.constant 0 : index
      %45 = vector.load %arg13[%c0_37, %c0_38] : memref<1x32xf32, #tpu.memory_space<vmem>>, vector<1x32xf32>
      %cst_39 = arith.constant dense<0.000000e+00> : vector<256xf32>
      %46 = vector.multi_reduction <add>, %43, %cst_39 [1] : vector<256x32xf32> to vector<256xf32>
      %47 = vector.shape_cast %46 : vector<256xf32> to vector<256x1xf32>
      %cst_40 = arith.constant 3.200000e+01 : f32
      %48 = vector.broadcast %cst_40 : f32 to vector<256x1xf32>
      %49 = arith.divf %47, %48 : vector<256x1xf32>
      %50 = vector.broadcast %49 : vector<256x1xf32> to vector<256x32xf32>
      %51 = arith.subf %43, %50 : vector<256x32xf32>
      %52 = vector.broadcast %49 : vector<256x1xf32> to vector<256x32xf32>
      %53 = arith.subf %43, %52 : vector<256x32xf32>
      %54 = arith.mulf %51, %53 : vector<256x32xf32>
      %cst_41 = arith.constant dense<0.000000e+00> : vector<256xf32>
      %55 = vector.multi_reduction <add>, %54, %cst_41 [1] : vector<256x32xf32> to vector<256xf32>
      %56 = vector.shape_cast %55 : vector<256xf32> to vector<256x1xf32>
      %cst_42 = arith.constant 3.200000e+01 : f32
      %57 = vector.broadcast %cst_42 : f32 to vector<256x1xf32>
      %58 = arith.divf %56, %57 : vector<256x1xf32>
      %59 = vector.broadcast %49 : vector<256x1xf32> to vector<256x32xf32>
      %60 = arith.subf %43, %59 : vector<256x32xf32>
      %cst_43 = arith.constant 9.99999974E-6 : f32
      %61 = vector.broadcast %cst_43 : f32 to vector<256x1xf32>
      %62 = arith.addf %58, %61 : vector<256x1xf32>
      %63 = math.rsqrt %62 : vector<256x1xf32>
      %64 = vector.broadcast %63 : vector<256x1xf32> to vector<256x32xf32>
      %65 = arith.mulf %60, %64 : vector<256x32xf32>
      %66 = vector.broadcast %44 : vector<1x32xf32> to vector<256x32xf32>
      %67 = arith.mulf %65, %66 : vector<256x32xf32>
      %68 = vector.broadcast %45 : vector<1x32xf32> to vector<256x32xf32>
      %69 = arith.addf %67, %68 : vector<256x32xf32>
      %cst_44 = arith.constant 0.000000e+00 : f32
      %70 = vector.broadcast %cst_44 : f32 to vector<256x32xf32>
      %71 = arith.maximumf %69, %70 : vector<256x32xf32>
      %c0_45 = arith.constant 0 : index
      %c0_46 = arith.constant 0 : index
      %72 = vector.load %arg15[%c0_45, %c0_46] : memref<256x32xf32, #tpu.memory_space<vmem>>, vector<256x32xf32>
      tpu.vector_store %arg15[%c0_45, %c0_46], %71 {strides = array<i32>} : memref<256x32xf32, #tpu.memory_space<vmem>>, vector<256x32xf32>,
    } else {
    }
    return
  }
  func.func @transform_0(%arg0: i32, %arg1: i32) -> (i32, i32) {
    %c0_i32 = arith.constant 0 : i32
    %c0_i32_0 = arith.constant 0 : i32
    return %arg0, %c0_i32 : i32, i32
  }
  func.func @transform_1(%arg0: i32, %arg1: i32) -> (i32, i32) {
    %c0_i32 = arith.constant 0 : i32
    %c0_i32_0 = arith.constant 0 : i32
    return %arg1, %c0_i32 : i32, i32
  }
  func.func @transform_2(%arg0: i32, %arg1: i32) -> (i32, i32) {
    %c0_i32 = arith.constant 0 : i32
    return %arg1, %arg0 : i32, i32
  }
  func.func @transform_3(%arg0: i32, %arg1: i32) -> (i32, i32) {
    %c0_i32 = arith.constant 0 : i32
    %c0_i32_0 = arith.constant 0 : i32
    %c0_i32_1 = arith.constant 0 : i32
    return %c0_i32, %c0_i32_0 : i32, i32
  }
  func.func @transform_4(%arg0: i32, %arg1: i32) -> (i32, i32) {
    %c0_i32 = arith.constant 0 : i32
    %c0_i32_0 = arith.constant 0 : i32
    %c0_i32_1 = arith.constant 0 : i32
    return %c0_i32, %c0_i32_0 : i32, i32
  }
  func.func @transform_5(%arg0: i32, %arg1: i32) -> (i32, i32) {
    %c0_i32 = arith.constant 0 : i32
    %c0_i32_0 = arith.constant 0 : i32
    %c0_i32_1 = arith.constant 0 : i32
    return %c0_i32, %c0_i32_0 : i32, i32
  }
  func.func @transform_6(%arg0: i32, %arg1: i32) -> (i32, i32) {
    %c0_i32 = arith.constant 0 : i32
    %c0_i32_0 = arith.constant 0 : i32
    %c0_i32_1 = arith.constant 0 : i32
    return %c0_i32, %c0_i32_0 : i32, i32
  }
  func.func @transform_7(%arg0: i32, %arg1: i32) -> (i32, i32) {
    %c0_i32 = arith.constant 0 : i32
    %c0_i32_0 = arith.constant 0 : i32
    %c0_i32_1 = arith.constant 0 : i32
    return %c0_i32, %c0_i32_0 : i32, i32
  }
  func.func @transform_8(%arg0: i32, %arg1: i32) -> (i32, i32) {
    %c0_i32 = arith.constant 0 : i32
    %c0_i32_0 = arith.constant 0 : i32
    %c0_i32_1 = arith.constant 0 : i32
    return %c0_i32, %c0_i32_0 : i32, i32
  }
  func.func @transform_9(%arg0: i32, %arg1: i32) -> (i32, i32) {
    %c0_i32 = arith.constant 0 : i32
    %c0_i32_0 = arith.constant 0 : i32
    %c0_i32_1 = arith.constant 0 : i32
    return %c0_i32, %c0_i32_0 : i32, i32
  }
  func.func @transform_10(%arg0: i32, %arg1: i32) -> (i32, i32) {
    %c0_i32 = arith.constant 0 : i32
    %c0_i32_0 = arith.constant 0 : i32
    %c0_i32_1 = arith.constant 0 : i32
    return %c0_i32, %c0_i32_0 : i32, i32
  }
  func.func @transform_11(%arg0: i32, %arg1: i32) -> (i32, i32) {
    %c0_i32 = arith.constant 0 : i32
    %c0_i32_0 = arith.constant 0 : i32
    %c0_i32_1 = arith.constant 0 : i32
    return %c0_i32, %c0_i32_0 : i32, i32
  }
  func.func @transform_12(%arg0: i32, %arg1: i32) -> (i32, i32) {
    %c0_i32 = arith.constant 0 : i32
    %c0_i32_0 = arith.constant 0 : i32
    return %arg0, %c0_i32 : i32, i32
  }
  func.func @transform_13(%arg0: i32, %arg1: i32) -> (i32, i32) {
    %c0_i32 = arith.constant 0 : i32
    %c0_i32_0 = arith.constant 0 : i32
    return %arg0, %c0_i32 : i32, i32
  }
}

</mosaic_0001>

<bundles_post_ra>
// kernel: tpu_custom_call.1
= control target key start
LH: loop header
LB: loop body
LE: loop exit
PB: predicated region body
PF: predicated region fallthrough
CT: control target
= control target key end

     0   :  { %s7184_s0 = inlined_call_operand.vmem [shape: bf16[512,32], index: 0, kind: input, shape index: {}]   ;;  %s7185_s1 = inlined_call_operand.vmem [shape: bf16[512,32], index: 1, kind: input, shape index: {}]   ;;  %s7186_s2 = inlined_call_operand.hbm [shape: bf16[512,512], index: 2, kind: input, shape index: {}]   ;;  %s7187_s3 = inlined_call_operand.vmem [shape: bf16[32,33], index: 3, kind: input, shape index: {}]   ;;  %s7188_s4 = inlined_call_operand.vmem [shape: f32[1,33], index: 4, kind: input, shape index: {}]   ;;  %s7189_s5 = inlined_call_operand.vmem [shape: bf16[32,32], index: 5, kind: input, shape index: {}]   ;;  %s7190_s6 = inlined_call_operand.vmem [shape: bf16[32,32], index: 6, kind: input, shape index: {}]   ;;  %s7191_s7 = inlined_call_operand.vmem [shape: f32[1,32], index: 7, kind: input, shape index: {}]   ;;  %s7192_s8 = inlined_call_operand.vmem [shape: bf16[32,33], index: 8, kind: input, shape index: {}]   ;;  %s7193_s9 = inlined_call_operand.vmem [shape: f32[1,33], index: 9, kind: input, shape index: {}]   ;;  %s7194_s10 = inlined_call_operand.vmem [shape: f32[1,32], index: 10, kind: input, shape index: {}]   ;;  %s7195_s11 = inlined_call_operand.vmem [shape: f32[1,32], index: 11, kind: input, shape index: {}]   ;;  %s7196_s12 = inlined_call_operand.vmem [shape: bf16[512,33], index: 12, kind: output, shape index: {0}]   ;;  %s7197_s13 = inlined_call_operand.vmem [shape: f32[512,32], index: 13, kind: output, shape index: {1}]  }
   0x1   :  { %7199 = sst [smem:[#allocation7_spill]] %s7186_s2 }
   0x2   :  { %7200 = sst [smem:[#allocation8_spill]] %s7195_s11 }
   0x3   :  { %7201 = sst [smem:[#allocation9_spill]] %s7197_s13 }
   0x4   :  { %19 = vsyncpa [#allocation4], 0 }
   0x5   :  { %21 = vsyncpa [#allocation4 + $0x1], 0  ;;  %s5501_s25 = smov 0   ;;  %s5503_s26 = smov 0  }
   0x6   :  { %s5505_s27 = smov 0   ;;  %s5507_s28 = smov 0  }
   0x7   :  { %s5509_s29 = smov 0   ;;  %s5511_s30 = smov 0  }
   0x8 LB: > { %s4189_s14 = sadd.s32 4294967295, %s5423_s30   ;;  %s39_s15 = sadd.s32 1, %s5419_s29  ;;  %s5423_s30 = sphi %s5511_s30, %s27_s30   ;;  %s5419_s29 = sphi %s5509_s29, %s7219_s29   ;;  %s5415_s28 = sphi %s5507_s28, %s7218_s28   ;;  %s5411_s27 = sphi %s5505_s27, %s7217_s27   ;;  %s5407_s26 = sphi %s5503_s26, %s7216_s26   ;;  %s5403_s25 = sphi %s5501_s25, %s7215_s25  }
   0x9   : > { %p41_p0 = scmp.ge.s32.totalorder %s39_s15, 2  ;;  %s100_s16 = sadd.s32 1, %s5411_s27 }
   0xa   : > { %p107_p1 = scmp.ne.s32.totalorder %s5411_s27, %s5407_s26  ;;  %p108_p2 = scmp.eq.s32.totalorder %s5423_s30, 0 }
   0xb   : > { %s7221_s15 = smov (%p41_p0, %s39_s15), 0  ;;  %p113_p4 = scmp.ne.s32.totalorder %s5407_s26, %s5403_s25 }
   0xc   : > { %7202 = sst [smem:[#allocation6_spill]] %s7221_s15  ;;  %p5537_p3 = por %p108_p2, %p107_p1 }
   0xd   : > { %s96_s18 = ssub.s32 %s5419_s29, %s7221_s15  ;;  %p114_p5 = scmp.eq.s32.totalorder %s4189_s14, 0 }
   0xe   : > { %p98_p6 = scmp.eq.s32.totalorder %s96_s18, 0  ;;  %p5007_p8 = scmp.lt.s32.totalorder %s5423_s30, 2 }
   0xf   : > { %p5544_p7 = por %p114_p5, %p113_p4  ;;  %s423_s21 = sand.u32 1, %s5411_s27  }
  0x10   : > { %s5550_s20 = scalar_select %p98_p6, %s5411_s27, %s100_s16  }
  0x11   : > { %s4444_s22 = sshll.u32 %s5419_s29, 7  ;;  %s4194_s23 = sshll.u32 %s423_s21, 9 }
  0x12   : > { %s7205_s2 = sld [smem:[#allocation7_spill]]  ;;  %s427_s25 = scalar_lea.vmem [#allocation3], %s4194_s23 }
  0x13   : > { %s437_s14 = sshll.u32 %s427_s25, 4  ;;  %p5561_p9 = pnand %p5007_p8, %p5537_p3  ;;  %s5565_s14 = int_to_ptr.vmem [resolvable:$true] %s437_s14 }
  0x14   : > { %s5568_s16 = scalar_lea.sflag [#allocation4], %s423_s21 }
  0x15   : > { %p5345_p12 = pneg %p5561_p9 }
  0x18   : > { %s5557_s11 = scalar_lea.hbm %s7205_s2, %s4444_s22  ;;  %s5348_s23 = scalar_lea.hbm %s7205_s2, 16384 }
  0x19   : > { %s5343_s13 = scalar_lea.hbm %s5557_s11, 8192  ;;  %p5349_p1 = scmp.lt.u32.totalorder %s5557_s11, %s7205_s2 }
  0x1a   : > { %p5344_p11 = scmp.ne.s32.totalorder %s5557_s11, %s5343_s13  ;;  %p5350_p2 = scmp.lt.u32.totalorder %s5348_s23, %s5343_s13 }
  0x1b   : > { %p5352_p4 = scmp.lt.u32.totalorder %s5343_s13, %s5557_s11 }
  0x1c   : > { %p5346_p13 = pnand %p5345_p12, %p5344_p11  ;;  %p5351_p3 = por %p5350_p2, %p5349_p1 }
  0x1e   : > { %p5347_p0 = pneg %p5346_p13  ;;  %p5353_p5 = por %p5352_p4, %p5351_p3 }
  0x20   : > { %p5354_p6 = pnand %p5353_p5, %p5347_p0 }
  0x22   : > { %5357 = shalt.err (!%p5354_p6)
}
  0x23   : > { %s5358_s21 = scalar_lea.vmem %s5565_s14, 8192  ;;  %s5425_s17 = smov [#allocation3]  }
  0x24   : > { %p5359_p8 = scmp.ne.s32.totalorder %s5565_s14, %s5358_s21  ;;  %s5363_s22 = sshll.u32 %s5425_s17, 4  ;;  %s5364_s22 = int_to_ptr.vmem [resolvable:$false] %s5363_s22 }
  0x25   : > { %s5365_s24 = scalar_lea.vmem %s5364_s22, 16384  ;;  %p5366_p10 = scmp.lt.s32.totalorder %s5565_s14, %s5364_s22 }
  0x26   : > { %p5361_p11 = pnand %p5359_p8, %p5345_p12  ;;  %p5367_p1 = scmp.lt.s32.totalorder %s5365_s24, %s5358_s21 }
  0x28   : > { %p5362_p13 = pneg %p5361_p11  ;;  %p5368_p2 = por %p5367_p1, %p5366_p10 }
  0x2a   : > { %p5369_p3 = pnand %p5368_p2, %p5362_p13 }
  0x2c   : > { %5372 = shalt.err (!%p5369_p3)
}
  0x2d   : > { %s5426_s13 = smov 256   ;;  %s5427_s23 = smov 128  }
  0x2e   : > { %s5428_s25 = smov 8   ;;  %p445_p12 = scmp.lt.s32.totalorder %s5423_s30, 3 }
  0x2f   : > { %5006 = dma.hbm_to_vmem [thread:$0]  (!%p5561_p9), %s5557_s11, 8192, %s5565_s14, %s5568_s16, %s5426_s13, %s5427_s23, %s5428_s25  }
  0x30   : > { %p7207_p0 = scmp.ge.s32.totalorder %s5423_s30, 1 }
  0x32   : > { %p446_p4 = pnand %p7207_p0, %p445_p12 }
  0x33   : > { %s451_s21 = sand.u32 (!%p446_p4), 1, %s5407_s26  }
  0x34   : > { %449 = sbr.rel (%p446_p4) target bundleno = 1703 (0x6a7), region = 68  ;;  %s4198_s17 = sshll.u32 (!%p446_p4), %s451_s21, 9 }
  0x35   : > { %s452_s22 = scalar_lea.sflag (!%p446_p4), [#allocation4], %s451_s21  ;;  %s5600_s24 = scalar_lea.vmem (!%p446_p4), [#allocation3], %s4198_s17 }
  0x3b   : > { %5398 = dma.done.wait (%p5544_p7), %s452_s22, 8192  }
  0x3c   : > { %5400 = vsyncadd (%p5544_p7), %s452_s22, 4294959104  ;;  %v5063_v0 = vld [vmem:[%s7187_s3] sm:$0xff]   ;;  %v5064_v1 = vld [vmem:[%s7187_s3 + $0x8] sm:$0xff]   ;;  %vm824_vm0 = vcmask 261120   ;;  %vm544_vm1 = vcmask 269312   ;;  %s4199_s23 = sshll.u32 %s5415_s28, 5 }
  0x3d   : > { %4789 = vmatprep.subr.bf16.mxu0 %v5063_v0  ;;  %v5065_v2 = vld [vmem:[%s7185_s1] sm:$0xff]   ;;  %4965 = vmatprep.subr.bf16.mxu1 %v5063_v0  ;;  %v5066_v3 = vld [vmem:[%s7185_s1 + $0x8] sm:$0xff]   ;;  %v5067_v4 = vld [vmem:[%s7185_s1 + $0x10] sm:$0xff]   ;;  %p514_p7 = scmp.lt.s32.totalorder %s4199_s23, 63  ;;  %vm3457_vm2 = vcmask 265216   ;;  %s7212_s18 = sld [smem:[#allocation8_spill]] }
  0x3e   : > { %4790 = vmatpush3.bf16.msra.mxu0 %v5063_v0  ;;  %4967 = vmatpush3.bf16.msra.mxu1 %v5063_v0  ;;  %v5068_v5 = vld [vmem:[%s7185_s1 + $0x18] sm:$0xff]   ;;  %v5069_v6 = vld [vmem:[%s7185_s1 + $0x20] sm:$0xff]   ;;  %v5082_v8 = vld [vmem:[%s7185_s1 + $0xc8] sm:$0xff]   ;;  %s7213_s2 = sld [smem:[#allocation9_spill]] }
  0x3f   : > { %4791 = vmatprep.subr.bf16.mxu0 %v5064_v1  ;;  %4793 = vmatprep.mubr.msk.bf16.mxu0 %vm824_vm0, %v5065_v2  ;;  %v5081_v7 = vld [vmem:[%s7185_s1 + $0xc0] sm:$0xff]   ;;  %v5070_v9 = vld [vmem:[%s7185_s1 + $0x28] sm:$0xff]   ;;  %v5085_v10 = vld [vmem:[%s7185_s1 + $0xd0] sm:$0xff]   ;;  %s7223_s23 = smov (!%p514_p7, %s4199_s23), 63 }
  0x40   : > { %4966 = vmatprep.subr.bf16.mxu1 %v5064_v1  ;;  %4841 = vmatprep.mubr.msk.bf16.mxu1 %vm824_vm0, %v5081_v7  ;;  %v5071_v11 = vld [vmem:[%s7185_s1 + $0x30] sm:$0xff]   ;;  %v5087_v12 = vld [vmem:[%s7185_s1 + $0xd8] sm:$0xff]   ;;  %v5089_v13 = vld [vmem:[%s7185_s1 + $0xe0] sm:$0xff]   ;;  %s4200_s25 = sshll.u32 %s7223_s23, 2 }
  0x41   : > { %v5072_v14 = vld [vmem:[%s7185_s1 + $0x38] sm:$0xff]   ;;  %v5073_v15 = vld [vmem:[%s7185_s1 + $0x40] sm:$0xff]   ;;  %v5091_v16 = vld [vmem:[%s7185_s1 + $0xe8] sm:$0xff]   ;;  %s6356_s28 = scalar_lea.vmem %s7184_s0, %s4200_s25 }
  0x42   : > { %4792 = vmatpush3.bf16.msra.mxu0 %v5064_v1  ;;  %4968 = vmatpush3.bf16.msra.mxu1 %v5064_v1  ;;  %v5093_v17 = vld [vmem:[%s7185_s1 + $0xf0] sm:$0xff]   ;;  %v5097_v18 = vld [vmem:[%s5600_s24 + $0x180] ss:$8 sps:$4 sm:$0xff]   ;;  %v5095_v24 = vld [vmem:[%s7185_s1 + $0xf8] sm:$0xff]  }
  0x43   : > { %v5099_v19 = vld [vmem:[%s5600_s24 + $0x80] ss:$8 sps:$4 sm:$0xff]   ;;  %1754 = vxpose.xlu1.c.b16.start [1/8] %v5097_v18, 128  ;;  %v5101_v20 = vld [vmem:[%s5600_s24 + $0x190] ss:$8 sps:$4 sm:$0xff]   ;;  %v5176_v60 = vld [vmem:[%s5600_s24 + $0x84] ss:$8 sps:$4 sm:$0xff]  }
  0x44   : > { %1690 = vxpose.xlu0.c.b16.start [1/8] %v5099_v19, 128  ;;  %v5074_v21 = vld [vmem:[%s7185_s1 + $0x48] sm:$0xff]   ;;  %v5104_v22 = vld [vmem:[%s5600_s24 + $0x90] ss:$8 sps:$4 sm:$0xff]   ;;  %v5077_v30 = vld [vmem:[%s7185_s1 + $0x60] sm:$0xff]  }
  0x45   : > { %4794 = vmatmul.mubr.msk.bf16.vlgmr.msra.gmra.mrb[0].mxu0 %vm824_vm0, %v5066_v3  ;;  %4842 = vmatmul.mubr.msk.bf16.vlgmr.msra.gmra.mrb[0].mxu1 %vm824_vm0, %v5082_v8  ;;  %v5075_v23 = vld [vmem:[%s7185_s1 + $0x50] sm:$0xff]   ;;  %v5107_v25 = vld [vmem:[%s5600_s24 + $0x1a0] ss:$8 sps:$4 sm:$0xff]   ;;  %v5076_v29 = vld [vmem:[%s7185_s1 + $0x58] sm:$0xff]  }
  0x46   : > { %4797 = vmatprep.mubr.msk.bf16.mxu0 %vm824_vm0, %v5067_v4  ;;  %4845 = vmatprep.mubr.msk.bf16.mxu1 %vm824_vm0, %v5085_v10  ;;  %v5110_v26 = vld [vmem:[%s5600_s24 + $0xa0] ss:$8 sps:$4 sm:$0xff]   ;;  %v5113_v27 = vld [vmem:[%s5600_s24 + $0x1b0] ss:$8 sps:$4 sm:$0xff]   ;;  %v5106_v62 = vld [vmem:[%s5600_s24 + $0x94] ss:$8 sps:$4 sm:$0xff]  }
  0x47   : > { %1755 = vxpose.xlu1.c.b16.cont [2/8] %v5101_v20, 128  ;;  %v5116_v28 = vld [vmem:[%s5600_s24 + $0xb0] ss:$8 sps:$4 sm:$0xff]   ;;  %v5119_v31 = vld [vmem:[%s5600_s24 + $0x1c0] ss:$8 sps:$4 sm:$0xff]   ;;  %v5112_v0 = vld [vmem:[%s5600_s24 + $0xa4] ss:$8 sps:$4 sm:$0xff]  }
  0x48   : > { %1691 = vxpose.xlu0.c.b16.cont [2/8] %v5104_v22, 128  ;;  %v5122_v32 = vld [vmem:[%s5600_s24 + $0xc0] ss:$8 sps:$4 sm:$0xff]   ;;  %v5125_v33 = vld [vmem:[%s5600_s24 + $0x1d0] ss:$8 sps:$4 sm:$0xff]   ;;  %v5118_v2 = vld [vmem:[%s5600_s24 + $0xb4] ss:$8 sps:$4 sm:$0xff]  }
  0x49   : > { %v5128_v34 = vld [vmem:[%s5600_s24 + $0xd0] ss:$8 sps:$4 sm:$0xff]   ;;  %v5078_v35 = vld [vmem:[%s7185_s1 + $0x68] sm:$0xff]   ;;  %v5083_v42 = vld [vmem:[%s7185_s1 + $0x80] sm:$0xff]  }
  0x4a   : > { %v5079_v36 = vld [vmem:[%s7185_s1 + $0x70] sm:$0xff]   ;;  %v5131_v37 = vld [vmem:[%s5600_s24 + $0x1e0] ss:$8 sps:$4 sm:$0xff]   ;;  %v5080_v41 = vld [vmem:[%s7185_s1 + $0x78] sm:$0xff]  }
  0x4b   : > { %1756 = vxpose.xlu1.c.b16.cont [3/8] %v5107_v25, 128  ;;  %v5134_v38 = vld [vmem:[%s5600_s24 + $0xe0] ss:$8 sps:$4 sm:$0xff]   ;;  %v5137_v39 = vld [vmem:[%s5600_s24 + $0x1f0] ss:$8 sps:$4 sm:$0xff]   ;;  %v5124_v4 = vld [vmem:[%s5600_s24 + $0xc4] ss:$8 sps:$4 sm:$0xff]  }
  0x4c   : > { %1692 = vxpose.xlu0.c.b16.cont [3/8] %v5110_v26, 128  ;;  %v5140_v40 = vld [vmem:[%s5600_s24 + $0xf0] ss:$8 sps:$4 sm:$0xff]   ;;  %v5143_v43 = vld [vmem:[%s5600_s24 + $0x100] ss:$8 sps:$4 sm:$0xff]   ;;  %v5136_v8 = vld [vmem:[%s5600_s24 + $0xe4] ss:$8 sps:$4 sm:$0xff]  }
  0x4d   : > { %4798 = vmatmul.mubr.msk.bf16.gmra.mrb[4].mxu0 %vm824_vm0, %v5068_v5  ;;  %4846 = vmatmul.mubr.msk.bf16.gmra.mrb[4].mxu1 %vm824_vm0, %v5087_v12  ;;  %v5145_v44 = vld [vmem:[%s5600_s24] ss:$8 sps:$4 sm:$0xff]   ;;  %v5149_v45 = vld [vmem:[%s5600_s24 + $0x10] ss:$8 sps:$4 sm:$0xff]   ;;  %v5103_v10 = vld [vmem:[%s5600_s24 + $0x194] ss:$8 sps:$4 sm:$0xff]  }
  0x4e   : > { %4801 = vmatprep.mubr.msk.bf16.mxu0 %vm824_vm0, %v5069_v6  ;;  %4849 = vmatprep.mubr.msk.bf16.mxu1 %vm824_vm0, %v5089_v13  ;;  %v5084_v46 = vld [vmem:[%s7185_s1 + $0x88] sm:$0xff]   ;;  %v5086_v47 = vld [vmem:[%s7185_s1 + $0x90] sm:$0xff]   ;;  %v5088_v50 = vld [vmem:[%s7185_s1 + $0x98] sm:$0xff]  }
  0x4f   : > { %1757 = vxpose.xlu1.c.b16.cont [4/8] %v5113_v27, 128  ;;  %v5153_v48 = vld [vmem:[%s5600_s24 + $0x20] ss:$8 sps:$4 sm:$0xff]   ;;  %v5157_v49 = vld [vmem:[%s5600_s24 + $0x30] ss:$8 sps:$4 sm:$0xff]   ;;  %v5130_v6 = vld [vmem:[%s5600_s24 + $0xd4] ss:$8 sps:$4 sm:$0xff]  }
  0x50   : > { %1693 = vxpose.xlu0.c.b16.cont [4/8] %v5116_v28, 128  ;;  %v5090_v51 = vld [vmem:[%s7185_s1 + $0xa0] sm:$0xff]   ;;  %v5165_v53 = vld [vmem:[%s5600_s24 + $0x50] ss:$8 sps:$4 sm:$0xff]   ;;  %v5092_v54 = vld [vmem:[%s7185_s1 + $0xa8] sm:$0xff]  }
  0x51   : > { %v5161_v52 = vld [vmem:[%s5600_s24 + $0x40] ss:$8 sps:$4 sm:$0xff]   ;;  %v5094_v55 = vld [vmem:[%s7185_s1 + $0xb0] sm:$0xff]   ;;  %v5096_v58 = vld [vmem:[%s7185_s1 + $0xb8] sm:$0xff]  }
  0x52   : > { %v5169_v56 = vld [vmem:[%s5600_s24 + $0x60] ss:$8 sps:$4 sm:$0xff]   ;;  %v5173_v57 = vld [vmem:[%s5600_s24 + $0x70] ss:$8 sps:$4 sm:$0xff]   ;;  %v5109_v12 = vld [vmem:[%s5600_s24 + $0x1a4] ss:$8 sps:$4 sm:$0xff]  }
  0x53   : > { %1758 = vxpose.xlu1.c.b16.cont [5/8] %v5119_v31, 128  ;;  %v5147_v59 = vld [vmem:[%s5600_s24 + $0x110] ss:$8 sps:$4 sm:$0xff]   ;;  %v5151_v61 = vld [vmem:[%s5600_s24 + $0x120] ss:$8 sps:$4 sm:$0xff]   ;;  %v5178_v13 = vld [vmem:[%s5600_s24 + $0x4] ss:$8 sps:$4 sm:$0xff]  }
  0x54   : > { %1694 = vxpose.xlu0.c.b16.cont [5/8] %v5122_v32, 128  ;;  %v5155_v63 = vld [vmem:[%s5600_s24 + $0x130] ss:$8 sps:$4 sm:$0xff]   ;;  %v5159_v1 = vld [vmem:[%s5600_s24 + $0x140] ss:$8 sps:$4 sm:$0xff]   ;;  %v5127_v19 = vld [vmem:[%s5600_s24 + $0x1d4] ss:$8 sps:$4 sm:$0xff]  }
  0x55   : > { %4802 = vmatmul.mubr.msk.bf16.gmra.mrb[8].mxu0 %vm824_vm0, %v5070_v9  ;;  %4850 = vmatmul.mubr.msk.bf16.gmra.mrb[8].mxu1 %vm824_vm0, %v5091_v16  ;;  %v5163_v3 = vld [vmem:[%s5600_s24 + $0x150] ss:$8 sps:$4 sm:$0xff]   ;;  %v5167_v5 = vld [vmem:[%s5600_s24 + $0x160] ss:$8 sps:$4 sm:$0xff]   ;;  %v5175_v9 = vld [vmem:[%s5600_s24 + $0x184] ss:$8 sps:$4 sm:$0xff]  }
  0x56   : > { %4805 = vmatprep.mubr.msk.bf16.mxu0 %vm824_vm0, %v5071_v11  ;;  %4853 = vmatprep.mubr.msk.bf16.mxu1 %vm824_vm0, %v5093_v17  ;;  %v5171_v7 = vld [vmem:[%s5600_s24 + $0x170] ss:$8 sps:$4 sm:$0xff]   ;;  %v5142_v11 = vld [vmem:[%s5600_s24 + $0xf4] ss:$8 sps:$4 sm:$0xff]   ;;  %v5121_v16 = vld [vmem:[%s5600_s24 + $0x1c4] ss:$8 sps:$4 sm:$0xff]  }
  0x57   : > { %1759 = vxpose.xlu1.c.b16.cont [6/8] %v5125_v33, 128  ;;  %v5182_v17 = vld [vmem:[%s5600_s24 + $0x24] ss:$8 sps:$4 sm:$0xff]   ;;  %v5184_v20 = vld [vmem:[%s5600_s24 + $0x34] ss:$8 sps:$4 sm:$0xff]  }
  0x58   : > { %1695 = vxpose.xlu0.c.b16.cont [6/8] %v5128_v34, 128  ;;  %v5186_v22 = vld [vmem:[%s5600_s24 + $0x44] ss:$8 sps:$4 sm:$0xff]   ;;  %v5192_v27 = vld [vmem:[%s5600_s24 + $0x74] ss:$8 sps:$4 sm:$0xff]  }
  0x59   : > { %v5190_v25 = vld [vmem:[%s5600_s24 + $0x64] ss:$8 sps:$4 sm:$0xff]   ;;  %v5179_v28 = vld [vmem:[%s5600_s24 + $0x114] ss:$8 sps:$4 sm:$0xff]  }
  0x5a   : > { %v5177_v26 = vld [vmem:[%s5600_s24 + $0x104] ss:$8 sps:$4 sm:$0xff]   ;;  %v5183_v31 = vld [vmem:[%s5600_s24 + $0x134] ss:$8 sps:$4 sm:$0xff]  }
  0x5b   : > { %1760 = vxpose.xlu1.c.b16.cont [7/8] %v5131_v37, 128  ;;  %v5185_v32 = vld [vmem:[%s5600_s24 + $0x144] ss:$8 sps:$4 sm:$0xff]   ;;  %v5187_v33 = vld [vmem:[%s5600_s24 + $0x154] ss:$8 sps:$4 sm:$0xff]  }
  0x5c   : > { %1696 = vxpose.xlu0.c.b16.cont [7/8] %v5134_v38, 128  ;;  %v5189_v34 = vld [vmem:[%s5600_s24 + $0x164] ss:$8 sps:$4 sm:$0xff]   ;;  %v5809_v38 = vld [vmem:[%s7188_s4] ss:$0 sm:$0xff] }
  0x5d   : > { %4806 = vmatmul.mubr.msk.bf16.gmra.mrb[12].mxu0 %vm824_vm0, %v5072_v14  ;;  %4854 = vmatmul.mubr.msk.bf16.gmra.mrb[12].mxu1 %vm824_vm0, %v5095_v24  ;;  %v5115_v14 = vld [vmem:[%s5600_s24 + $0x1b4] ss:$8 sps:$4 sm:$0xff]  }
  0x5e   : > { %4809 = vmatprep.mubr.msk.bf16.mxu0 %vm824_vm0, %v5073_v15  ;;  %v5180_v15 = vld [vmem:[%s5600_s24 + $0x14] ss:$8 sps:$4 sm:$0xff]  }
  0x5f   : > { %1761 = vxpose.xlu1.c.b16.end [8/8] %v5137_v39, 128  ;;  %v5188_v24 = vld [vmem:[%s5600_s24 + $0x54] ss:$8 sps:$4 sm:$0xff]  }
  0x60   : > { %1697 = vxpose.xlu0.c.b16.end [8/8] %v5140_v40, 128 }
  0x63   : > { %1722 = vxpose.xlu1.c.b16.start [1/8] %v5143_v43, 128 }
  0x64   : > { %1658 = vxpose.xlu0.c.b16.start [1/8] %v5145_v44, 128 }
  0x65   : > { %4810 = vmatmul.mubr.msk.bf16.gmra.mrb[16].mxu0 %vm824_vm0, %v5074_v21  ;;  %v5133_v21 = vld [vmem:[%s5600_s24 + $0x1e4] ss:$8 sps:$4 sm:$0xff]  }
  0x66   : > { %4813 = vmatprep.mubr.msk.bf16.mxu0 %vm824_vm0, %v5075_v23  ;;  %v5139_v23 = vld [vmem:[%s5600_s24 + $0x1f4] ss:$8 sps:$4 sm:$0xff]  }
  0x67   : > { %1723 = vxpose.xlu1.c.b16.cont [2/8] %v5147_v59, 128 }
  0x68   : > { %1659 = vxpose.xlu0.c.b16.cont [2/8] %v5149_v45, 128 }
  0x6b   : > { %1724 = vxpose.xlu1.c.b16.cont [3/8] %v5151_v61, 128 }
  0x6c   : > { %1660 = vxpose.xlu0.c.b16.cont [3/8] %v5153_v48, 128 }
  0x6d   : > { %4814 = vmatmul.mubr.msk.bf16.gmra.mrb[20].mxu0 %vm824_vm0, %v5076_v29 }
  0x6e   : > { %4817 = vmatprep.mubr.msk.bf16.mxu0 %vm824_vm0, %v5077_v30  ;;  %v5181_v30 = vld [vmem:[%s5600_s24 + $0x124] ss:$8 sps:$4 sm:$0xff]  }
  0x6f   : > { %1725 = vxpose.xlu1.c.b16.cont [4/8] %v5155_v63, 128 }
  0x70   : > { %1661 = vxpose.xlu0.c.b16.cont [4/8] %v5157_v49, 128 }
  0x73   : > { %1726 = vxpose.xlu1.c.b16.cont [5/8] %v5159_v1, 128 }
  0x74   : > { %1662 = vxpose.xlu0.c.b16.cont [5/8] %v5161_v52, 128 }
  0x75   : > { %4818 = vmatmul.mubr.msk.bf16.gmra.mrb[24].mxu0 %vm824_vm0, %v5078_v35  ;;  %v5191_v35 = vld [vmem:[%s5600_s24 + $0x174] ss:$8 sps:$4 sm:$0xff]   ;;  %s4204_s24 = sshll.u32 %s7223_s23, 3 }
  0x76   : > { %4821 = vmatprep.mubr.msk.bf16.mxu0 %vm824_vm0, %v5079_v36  ;;  %s7008_s15 = scalar_lea.vmem %s7213_s2, %s4204_s24 }
  0x77   : > { %1727 = vxpose.xlu1.c.b16.cont [6/8] %v5163_v3, 128 }
  0x78   : > { %1663 = vxpose.xlu0.c.b16.cont [6/8] %v5165_v53, 128 }
  0x7b   : > { %1728 = vxpose.xlu1.c.b16.cont [7/8] %v5167_v5, 128 }
  0x7c   : > { %1664 = vxpose.xlu0.c.b16.cont [7/8] %v5169_v56, 128 }
  0x7d   : > { %4822 = vmatmul.mubr.msk.bf16.gmra.mrb[28].mxu0 %vm824_vm0, %v5080_v41 }
  0x7e   : > { %4825 = vmatprep.mubr.msk.bf16.mxu0 %vm824_vm0, %v5083_v42 }
  0x7f   : > { %1729 = vxpose.xlu1.c.b16.end [8/8] %v5171_v7, 128 }
  0x80   : > { %1665 = vxpose.xlu0.c.b16.end [8/8] %v5173_v57, 128 }
  0x83   : > { %1770 = vxpose.xlu1.c.b16.start [1/8] %v5175_v9, 128 }
  0x84   : > { %1706 = vxpose.xlu0.c.b16.start [1/8] %v5176_v60, 128 }
  0x85   : > { %4826 = vmatmul.mubr.msk.bf16.gmra.mrb[32].mxu0 %vm824_vm0, %v5084_v46 }
  0x86   : > { %4829 = vmatprep.mubr.msk.bf16.mxu0 %vm824_vm0, %v5086_v47 }
  0x87   : > { %1771 = vxpose.xlu1.c.b16.cont [2/8] %v5103_v10, 128 }
  0x88   : > { %1707 = vxpose.xlu0.c.b16.cont [2/8] %v5106_v62, 128 }
  0x8b   : > { %1772 = vxpose.xlu1.c.b16.cont [3/8] %v5109_v12, 128 }
  0x8c   : > { %1708 = vxpose.xlu0.c.b16.cont [3/8] %v5112_v0, 128 }
  0x8d   : > { %4830 = vmatmul.mubr.msk.bf16.gmra.mrb[36].mxu0 %vm824_vm0, %v5088_v50 }
  0x8e   : > { %4833 = vmatprep.mubr.msk.bf16.mxu0 %vm824_vm0, %v5090_v51 }
  0x8f   : > { %1773 = vxpose.xlu1.c.b16.cont [4/8] %v5115_v14, 128 }
  0x90   : > { %1709 = vxpose.xlu0.c.b16.cont [4/8] %v5118_v2, 128 }
  0x93   : > { %1774 = vxpose.xlu1.c.b16.cont [5/8] %v5121_v16, 128 }
  0x94   : > { %1710 = vxpose.xlu0.c.b16.cont [5/8] %v5124_v4, 128 }
  0x95   : > { %4834 = vmatmul.mubr.msk.bf16.gmra.mrb[40].mxu0 %vm824_vm0, %v5092_v54 }
  0x96   : > { %4837 = vmatprep.mubr.msk.bf16.mxu0 %vm824_vm0, %v5094_v55 }
  0x97   : > { %1775 = vxpose.xlu1.c.b16.cont [6/8] %v5127_v19, 128 }
  0x98   : > { %1711 = vxpose.xlu0.c.b16.cont [6/8] %v5130_v6, 128 }
  0x9b   : > { %1776 = vxpose.xlu1.c.b16.cont [7/8] %v5133_v21, 128 }
  0x9c   : > { %1712 = vxpose.xlu0.c.b16.cont [7/8] %v5136_v8, 128 }
  0x9d   : > { %4838 = vmatmul.mubr.msk.bf16.gmra.mrb[44].mxu0 %vm824_vm0, %v5096_v58 }
  0x9f   : > { %1777 = vxpose.xlu1.c.b16.end [8/8] %v5139_v23, 128 }
  0xa0   : > { %1713 = vxpose.xlu0.c.b16.end [8/8] %v5142_v11, 128 }
  0xa3   : > { %1738 = vxpose.xlu1.c.b16.start [1/8] %v5177_v26, 128 }
  0xa4   : > { %1674 = vxpose.xlu0.c.b16.start [1/8] %v5178_v13, 128 }
  0xa7   : > { %1739 = vxpose.xlu1.c.b16.cont [2/8] %v5179_v28, 128 }
  0xa8   : > { %1675 = vxpose.xlu0.c.b16.cont [2/8] %v5180_v15, 128 }
  0xa9   : > { %v1762_v29 = vpop.trf.xlu1 }
  0xaa   : > { %v1698_v18 = vpop.trf.xlu0  ;;  %1979 = vmatprep.mubr.bf16.mxu0 %v1762_v29 }
  0xab   : > { %1818 = vmatprep.mubr.bf16.mxu1 %v1698_v18  ;;  %1740 = vxpose.xlu1.c.b16.cont [3/8] %v5181_v30, 128 }
  0xac   : > { %1676 = vxpose.xlu0.c.b16.cont [3/8] %v5182_v17, 128 }
  0xae   : > { %v5804_v36 = vpop.trf.xlu0 }
  0xaf   : > { %1741 = vxpose.xlu1.c.b16.cont [4/8] %v5183_v31, 128 }
  0xb0   : > { %1677 = vxpose.xlu0.c.b16.cont [4/8] %v5184_v20, 128 }
  0xb2   : > { %v5811_v39 = vpop.trf.xlu0 }
  0xb3   : > { %1742 = vxpose.xlu1.c.b16.cont [5/8] %v5185_v32, 128  ;;  %v5895_v32 = vpop.trf.xlu1 }
  0xb4   : > { %1678 = vxpose.xlu0.c.b16.cont [5/8] %v5186_v22, 128 }
  0xb6   : > { %v5829_v49 = vpop.trf.xlu0 }
  0xb7   : > { %1743 = vxpose.xlu1.c.b16.cont [6/8] %v5187_v33, 128 }
  0xb8   : > { %1679 = vxpose.xlu0.c.b16.cont [6/8] %v5188_v24, 128 }
  0xba   : > { %v5846_v61 = vpop.trf.xlu0 }
  0xbb   : > { %1744 = vxpose.xlu1.c.b16.cont [7/8] %v5189_v34, 128 }
  0xbc   : > { %1680 = vxpose.xlu0.c.b16.cont [7/8] %v5190_v25, 128 }
  0xbe   : > { %v5859_v10 = vpop.trf.xlu0 }
  0xbf   : > { %1745 = vxpose.xlu1.c.b16.end [8/8] %v5191_v35, 128 }
  0xc0   : > { %1681 = vxpose.xlu0.c.b16.end [8/8] %v5192_v27, 128 }
  0xc2   : > { %v5893_v30 = vpop.trf.xlu0 }
 0x118   : > { %v4795_v37 = vpop.f32.mrb[0].mxu0  ;;  %v4843_v56 = vpop.f32.mrb[0].mxu1 }
 0x119   : > { %v955_v40 = vpop.f32.mrb[1].mxu0  ;;  %v5814_v42 = vadd.f32 %v4795_v37, %v5809_v38  ;;  %v5844_v59 = vadd.f32 %v4843_v56, %v5809_v38  ;;  %v1147_v60 = vpop.f32.mrb[1].mxu1 }
 0x11a   : > { %v4796_v41 = vpop.f32.mrb[2].mxu0  ;;  %v5820_v45 = vadd.f32 %v5809_v38, %v955_v40  ;;  %v1148_v63 = vadd.f32 %v5809_v38, %v1147_v60  ;;  %v4844_v0 = vpop.f32.mrb[2].mxu1 }
 0x11b   : > { %v5817_v43 = vadd.f32 %v4796_v41, %v5809_v38  ;;  %v958_v44 = vpop.f32.mrb[3].mxu0  ;;  %v5854_v2 = vadd.f32 %v4844_v0, %v5809_v38  ;;  %v1150_v3 = vpop.f32.mrb[3].mxu1 }
 0x11c   : > { %v5823_v46 = vadd.f32 %v5809_v38, %v958_v44  ;;  %v1151_v4 = vadd.f32 %v5809_v38, %v1150_v3  ;;  %v5925_v3 = vpop.trf.xlu0 }
 0x11d   : > { %v1211_v47 = vpack.c.bf16 %v5817_v43, %v5814_v42  ;;  %v1235_v6 = vpack.c.bf16 %v5854_v2, %v5844_v59 }
 0x11e   : > { %v1210_v48 = vpack.c.bf16 %v5823_v46, %v5820_v45  ;;  %v1234_v8 = vpack.c.bf16 %v1151_v4, %v1148_v63 }
 0x120   : > { %v4799_v50 = vpop.f32.mrb[4].mxu0  ;;  %4623 = vmatprep.subr.bf16.mxu0 %v1234_v8  ;;  %v4847_v14 = vpop.f32.mrb[4].mxu1 }
 0x121   : > { %v971_v51 = vpop.f32.mrb[5].mxu0  ;;  %v5832_v53 = vadd.f32 %v4799_v50, %v5809_v38  ;;  %v5874_v17 = vadd.f32 %v4847_v14, %v5809_v38  ;;  %v1163_v18 = vpop.f32.mrb[5].mxu1 }
 0x122   : > { %v4800_v52 = vpop.f32.mrb[6].mxu0  ;;  %v5838_v57 = vadd.f32 %v5809_v38, %v971_v51  ;;  %v5879_v20 = vadd.f32 %v5809_v38, %v1163_v18  ;;  %v4848_v21 = vpop.f32.mrb[6].mxu1 }
 0x123   : > { %v5835_v54 = vadd.f32 %v4800_v52, %v5809_v38  ;;  %v974_v55 = vpop.f32.mrb[7].mxu0  ;;  %v5884_v23 = vadd.f32 %v4848_v21, %v5809_v38  ;;  %v1166_v24 = vpop.f32.mrb[7].mxu1 }
 0x124   : > { %v5841_v58 = vadd.f32 %v5809_v38, %v974_v55  ;;  %v5887_v25 = vadd.f32 %v5809_v38, %v1166_v24 }
 0x125   : > { %v1213_v62 = vpack.c.bf16 %v5835_v54, %v5832_v53 }
 0x126   : > { %v1212_v1 = vpack.c.bf16 %v5841_v58, %v5838_v57  ;;  %v1236_v29 = vpack.c.bf16 %v5887_v25, %v5879_v20 }
 0x128   : > { %v4803_v5 = vpop.f32.mrb[8].mxu0  ;;  %v4851_v37 = vpop.f32.mrb[8].mxu1 }
 0x129   : > { %v987_v7 = vpop.f32.mrb[9].mxu0  ;;  %v5862_v11 = vadd.f32 %v4803_v5, %v5809_v38  ;;  %v5910_v44 = vadd.f32 %v4851_v37, %v5809_v38  ;;  %v1179_v50 = vpop.f32.mrb[9].mxu1 }
 0x12a   : > { %v4804_v9 = vpop.f32.mrb[10].mxu0  ;;  %v5868_v15 = vadd.f32 %v5809_v38, %v987_v7  ;;  %v5915_v52 = vadd.f32 %v5809_v38, %v1179_v50  ;;  %v4852_v55 = vpop.f32.mrb[10].mxu1 }
 0x12b   : > { %v5865_v12 = vadd.f32 %v4804_v9, %v5809_v38  ;;  %v990_v13 = vpop.f32.mrb[11].mxu0  ;;  %v5920_v60 = vadd.f32 %v4852_v55, %v5809_v38  ;;  %v1182_v63 = vpop.f32.mrb[11].mxu1 }
 0x12c   : > { %v5871_v16 = vadd.f32 %v5809_v38, %v990_v13  ;;  %v5923_v0 = vadd.f32 %v5809_v38, %v1182_v63  ;;  %v5927_v5 = vpop.trf.xlu1  ;;  %v5943_v63 = vpop.trf.xlu0 }
 0x12d   : > { %v1215_v19 = vpack.c.bf16 %v5865_v12, %v5862_v11 }
 0x12e   : > { %v1214_v22 = vpack.c.bf16 %v5871_v16, %v5868_v15 }
 0x130   : > { %v4807_v26 = vpop.f32.mrb[12].mxu0  ;;  %v4855_v24 = vpop.f32.mrb[12].mxu1 }
 0x131   : > { %v1003_v28 = vpop.f32.mrb[13].mxu0  ;;  %v5898_v33 = vadd.f32 %v4807_v26, %v5809_v38  ;;  %v5945_v7 = vpop.trf.xlu1 }
 0x132   : > { %v4808_v31 = vpop.f32.mrb[14].mxu0  ;;  %v5904_v40 = vadd.f32 %v5809_v38, %v1003_v28  ;;  %v5962_v9 = vpop.trf.xlu0 }
 0x133   : > { %v5901_v34 = vadd.f32 %v4808_v31, %v5809_v38  ;;  %v1006_v35 = vpop.f32.mrb[15].mxu0  ;;  %v5938_v31 = vadd.f32 %v4855_v24, %v5809_v38 }
 0x134   : > { %v5907_v41 = vadd.f32 %v5809_v38, %v1006_v35  ;;  %v1195_v35 = vpop.f32.mrb[13].mxu1 }
 0x135   : > { %v1217_v51 = vpack.c.bf16 %v5901_v34, %v5898_v33  ;;  %v5941_v50 = vadd.f32 %v5809_v38, %v1195_v35  ;;  %v4856_v55 = vpop.f32.mrb[14].mxu1  ;;  %v5966_v27 = vpop.trf.xlu1 }
 0x136   : > { %v1216_v56 = vpack.c.bf16 %v5907_v41, %v5904_v40 }
 0x138   : > { %v4811_v4 = vpop.f32.mrb[16].mxu0 }
 0x139   : > { %v1019_v8 = vpop.f32.mrb[17].mxu0  ;;  %v1028_v14 = vadd.f32 %v4811_v4, %v5809_v38 }
 0x13a   : > { %v4812_v13 = vpop.f32.mrb[18].mxu0  ;;  %v1020_v26 = vadd.f32 %v5809_v38, %v1019_v8  ;;  %v1198_v8 = vpop.f32.mrb[15].mxu1 }
 0x13b   : > { %v1031_v18 = vadd.f32 %v4812_v13, %v5809_v38  ;;  %v1022_v21 = vpop.f32.mrb[19].mxu0  ;;  %v5948_v13 = vadd.f32 %v4856_v55, %v5809_v38 }
 0x13c   : > { %v1023_v28 = vadd.f32 %v5809_v38, %v1022_v21  ;;  %v5951_v21 = vadd.f32 %v5809_v38, %v1198_v8 }
 0x13d   : > { %v1219_v37 = vpack.c.bf16 %v1031_v18, %v1028_v14 }
 0x13e   : > { %v1218_v4 = vpack.c.bf16 %v1023_v28, %v1020_v26  ;;  %v1240_v26 = vpack.c.bf16 %v5951_v21, %v5941_v50 }
 0x140   : > { %v4815_v24 = vpop.f32.mrb[20].mxu0  ;;  %4511 = vmatprep.subr.bf16.mxu1 %v1218_v4 }
 0x141   : > { %v1035_v18 = vpop.f32.mrb[21].mxu0  ;;  %4512 = vmatpush3.bf16.msra.mxu1 %v1210_v48  ;;  %v1044_v35 = vadd.f32 %v4815_v24, %v5809_v38  ;;  %v5974_v24 = vpop.trf.xlu0 }
 0x142   : > { %v4816_v28 = vpop.f32.mrb[22].mxu0  ;;  %4513 = vmatprep.subr.bf16.mxu1 %v1219_v37  ;;  %v1036_v4 = vadd.f32 %v5809_v38, %v1035_v18 }
 0x143   : > { %v1047_v55 = vadd.f32 %v4816_v28, %v5809_v38  ;;  %v1038_v8 = vpop.f32.mrb[23].mxu0  ;;  %v5976_v28 = vpop.trf.xlu1 }
 0x144   : > { %v1039_v14 = vadd.f32 %v5809_v38, %v1038_v8 }
 0x145   : > { %v1221_v45 = vpack.c.bf16 %v1047_v55, %v1044_v35  ;;  %4514 = vmatpush3.bf16.msra.mxu1 %v1211_v47  ;;  %v5985_v58 = vpop.trf.xlu0 }
 0x146   : > { %v1220_v46 = vpack.c.bf16 %v1039_v14, %v1036_v4 }
 0x147   : > { %v5987_v8 = vpop.trf.xlu1 }
 0x148   : > { %v4819_v48 = vpop.f32.mrb[24].mxu0  ;;  %4515 = vmatprep.subr.bf16.mxu1 %v1220_v46 }
 0x149   : > { %v1051_v37 = vpop.f32.mrb[25].mxu0  ;;  %4516 = vmatpush3.bf16.msra.mxu1 %v1212_v1  ;;  %v1060_v35 = vadd.f32 %v4819_v48, %v5809_v38 }
 0x14a   : > { %v4820_v18 = vpop.f32.mrb[26].mxu0  ;;  %4517 = vmatprep.subr.bf16.mxu1 %v1221_v45  ;;  %v1052_v43 = vadd.f32 %v5809_v38, %v1051_v37 }
 0x14b   : > { %v1063_v55 = vadd.f32 %v4820_v18, %v5809_v38  ;;  %v1054_v42 = vpop.f32.mrb[27].mxu0  ;;  %v5999_v18 = vpop.trf.xlu0 }
 0x14c   : > { %v1055_v47 = vadd.f32 %v5809_v38, %v1054_v42  ;;  %v6001_v16 = vpop.trf.xlu1 }
 0x14d   : > { %v1223_v14 = vpack.c.bf16 %v1063_v55, %v1060_v35  ;;  %4518 = vmatpush3.bf16.msra.mxu1 %v1213_v62 }
 0x14e   : > { %v1222_v57 = vpack.c.bf16 %v1055_v47, %v1052_v43 }
 0x14f   : > { %v6008_v12 = vpop.trf.xlu0 }
 0x150   : > { %v4823_v1 = vpop.f32.mrb[28].mxu0  ;;  %4519 = vmatprep.subr.bf16.mxu1 %v1222_v57 }
 0x151   : > { %v1067_v4 = vpop.f32.mrb[29].mxu0  ;;  %4520 = vmatpush3.bf16.msra.mxu1 %v1214_v22  ;;  %v1076_v46 = vadd.f32 %v4823_v1, %v5809_v38 }
 0x152   : > { %v4824_v45 = vpop.f32.mrb[30].mxu0  ;;  %4521 = vmatprep.subr.bf16.mxu1 %v1223_v14  ;;  %v1068_v54 = vadd.f32 %v5809_v38, %v1067_v4  ;;  %v6012_v14 = vpop.trf.xlu1 }
 0x153   : > { %v1079_v48 = vadd.f32 %v4824_v45, %v5809_v38  ;;  %v1070_v53 = vpop.f32.mrb[31].mxu0  ;;  %v6022_v1 = vpop.trf.xlu0 }
 0x154   : > { %v1071_v62 = vadd.f32 %v5809_v38, %v1070_v53 }
 0x155   : > { %v1225_v37 = vpack.c.bf16 %v1079_v48, %v1076_v46  ;;  %4522 = vmatpush3.bf16.msra.mxu1 %v1215_v19 }
 0x156   : > { %v1224_v15 = vpack.c.bf16 %v1071_v62, %v1068_v54  ;;  %v1731_v45 = vpop.trf.xlu1  ;;  %v7208_v54 = vpack.c.bf16 %v5884_v23, %v5874_v17 }
 0x157   : > { %v6031_v59 = vpop.trf.xlu0 }
 0x158   : > { %v4827_v22 = vpop.f32.mrb[32].mxu0  ;;  %4523 = vmatprep.subr.bf16.mxu1 %v1224_v15 }
 0x159   : > { %v1083_v35 = vpop.f32.mrb[33].mxu0  ;;  %4524 = vmatpush3.bf16.msra.mxu1 %v1216_v56  ;;  %v1092_v42 = vadd.f32 %v4827_v22, %v5809_v38 }
 0x15a   : > { %v4828_v55 = vpop.f32.mrb[34].mxu0  ;;  %4525 = vmatprep.subr.bf16.mxu1 %v1225_v37  ;;  %v1084_v19 = vadd.f32 %v5809_v38, %v1083_v35 }
 0x15b   : > { %v1095_v43 = vadd.f32 %v4828_v55, %v5809_v38  ;;  %v1086_v11 = vpop.f32.mrb[35].mxu0  ;;  %v1714_v17 = vpop.trf.xlu0 }
 0x15c   : > { %v1087_v47 = vadd.f32 %v5809_v38, %v1086_v11 }
 0x15d   : > { %v1227_v57 = vpack.c.bf16 %v1095_v43, %v1092_v42  ;;  %4526 = vmatpush3.bf16.msra.mxu1 %v1217_v51  ;;  %v7210_v42 = vpack.c.bf16 %v5920_v60, %v5910_v44 }
 0x15e   : > { %v1226_v40 = vpack.c.bf16 %v1087_v47, %v1084_v19 }
 0x15f   : > { %v1715_v19 = vpop.trf.xlu0 }
 0x160   : > { %v4831_v41 = vpop.f32.mrb[36].mxu0  ;;  %4624 = vmatpush3.bf16.msra.mxu0 %v1226_v40  ;;  %1819 = vmatmul.mubr.bf16.vlgmr.msra.gmra.mrb[16].mxu1 %v5943_v63 }
 0x161   : > { %v1099_v56 = vpop.f32.mrb[37].mxu0  ;;  %4625 = vmatprep.subr.bf16.mxu0 %v1235_v6  ;;  %1826 = vmatprep.mubr.bf16.mxu1 %v5804_v36  ;;  %v1108_v46 = vadd.f32 %v4831_v41, %v5809_v38  ;;  %v1732_v6 = vpop.trf.xlu1 }
 0x162   : > { %v4832_v4 = vpop.f32.mrb[38].mxu0  ;;  %v1100_v51 = vadd.f32 %v5809_v38, %v1099_v56 }
 0x163   : > { %v1111_v33 = vadd.f32 %v4832_v4, %v5809_v38  ;;  %v1102_v34 = vpop.f32.mrb[39].mxu0  ;;  %v1716_v60 = vpop.trf.xlu0 }
 0x164   : > { %v1103_v63 = vadd.f32 %v5809_v38, %v1102_v34  ;;  %4626 = vmatpush3.bf16.msra.mxu0 %v1227_v57 }
 0x165   : > { %v1229_v48 = vpack.c.bf16 %v1111_v33, %v1108_v46  ;;  %4627 = vmatprep.subr.bf16.mxu0 %v1236_v29  ;;  %v1733_v35 = vpop.trf.xlu1  ;;  %v5429_v46 = vmov 0.0  }
 0x166   : > { %v1228_v36 = vpack.c.bf16 %v1103_v63, %v1100_v51  ;;  %545 = vst.msk [vmem:[#allocation2] sm:$0xff] %vm544_vm1, %v5429_v46  ;;  %546 = vst.msk [vmem:[#allocation2 + $0x8] sm:$0xff] %vm544_vm1, %v5429_v46  ;;  %v5430_v63 = vmov 32  }
 0x167   : > { %547 = vst.msk [vmem:[#allocation2 + $0x10] sm:$0xff] %vm544_vm1, %v5429_v46  ;;  %548 = vst.msk [vmem:[#allocation2 + $0x18] sm:$0xff] %vm544_vm1, %v5429_v46  ;;  %5061 = vset.pattern.permute.xlu0 %v5430_v63  ;;  %5062 = vset.pattern.permute.xlu1 %v5430_v63 }
 0x168   : > { %v4835_v2 = vpop.f32.mrb[40].mxu0  ;;  %4628 = vmatpush3.bf16.msra.mxu0 %v1228_v36  ;;  %1827 = vmatmul.mubr.bf16.gmra.mrb[20].mxu1 %v5962_v9  ;;  %v7209_v9 = vpack.c.bf16 %v5923_v0, %v5915_v52  ;;  %549 = vst.msk [vmem:[#allocation2 + $0x20] sm:$0xff] %vm544_vm1, %v5429_v46  ;;  %550 = vst.msk [vmem:[#allocation2 + $0x28] sm:$0xff] %vm544_vm1, %v5429_v46 }
 0x169   : > { %v1115_v53 = vpop.f32.mrb[41].mxu0  ;;  %4629 = vmatprep.subr.bf16.mxu0 %v7208_v54  ;;  %1834 = vmatprep.mubr.bf16.mxu1 %v5811_v39  ;;  %v1124_v37 = vadd.f32 %v4835_v2, %v5809_v38  ;;  %551 = vst.msk [vmem:[#allocation2 + $0x30] sm:$0xff] %vm544_vm1, %v5429_v46  ;;  %552 = vst.msk [vmem:[#allocation2 + $0x38] sm:$0xff] %vm544_vm1, %v5429_v46 }
 0x16a   : > { %v4836_v62 = vpop.f32.mrb[42].mxu0  ;;  %v1116_v29 = vadd.f32 %v5809_v38, %v1115_v53  ;;  %553 = vst.msk [vmem:[#allocation2 + $0x40] sm:$0xff] %vm544_vm1, %v5429_v46  ;;  %554 = vst.msk [vmem:[#allocation2 + $0x48] sm:$0xff] %vm544_vm1, %v5429_v46 }
 0x16b   : > { %v1127_v20 = vadd.f32 %v4836_v62, %v5809_v38  ;;  %v1118_v25 = vpop.f32.mrb[43].mxu0  ;;  %555 = vst.msk [vmem:[#allocation2 + $0x50] sm:$0xff] %vm544_vm1, %v5429_v46  ;;  %556 = vst.msk [vmem:[#allocation2 + $0x58] sm:$0xff] %vm544_vm1, %v5429_v46 }
 0x16c   : > { %v1119_v15 = vadd.f32 %v5809_v38, %v1118_v25  ;;  %4630 = vmatpush3.bf16.msra.mxu0 %v1229_v48  ;;  %557 = vst.msk [vmem:[#allocation2 + $0x60] sm:$0xff] %vm544_vm1, %v5429_v46  ;;  %558 = vst.msk [vmem:[#allocation2 + $0x68] sm:$0xff] %vm544_vm1, %v5429_v46 }
 0x16d   : > { %v1231_v22 = vpack.c.bf16 %v1127_v20, %v1124_v37  ;;  %4631 = vmatprep.subr.bf16.mxu0 %v7209_v9  ;;  %559 = vst.msk [vmem:[#allocation2 + $0x70] sm:$0xff] %vm544_vm1, %v5429_v46  ;;  %560 = vst.msk [vmem:[#allocation2 + $0x78] sm:$0xff] %vm544_vm1, %v5429_v46 }
 0x16e   : > { %v1230_v23 = vpack.c.bf16 %v1119_v15, %v1116_v29  ;;  %561 = vst.msk [vmem:[#allocation2 + $0x80] sm:$0xff] %vm544_vm1, %v5429_v46  ;;  %562 = vst.msk [vmem:[#allocation2 + $0x88] sm:$0xff] %vm544_vm1, %v5429_v46 }
 0x16f   : > { %563 = vst.msk [vmem:[#allocation2 + $0x90] sm:$0xff] %vm544_vm1, %v5429_v46  ;;  %564 = vst.msk [vmem:[#allocation2 + $0x98] sm:$0xff] %vm544_vm1, %v5429_v46 }
 0x170   : > { %v4839_v39 = vpop.f32.mrb[44].mxu0  ;;  %4632 = vmatpush3.bf16.msra.mxu0 %v1230_v23  ;;  %1835 = vmatmul.mubr.bf16.gmra.mrb[24].mxu1 %v5974_v24  ;;  %v1734_v24 = vpop.trf.xlu1  ;;  %565 = vst.msk [vmem:[#allocation2 + $0xa0] sm:$0xff] %vm544_vm1, %v5429_v46  ;;  %566 = vst.msk [vmem:[#allocation2 + $0xa8] sm:$0xff] %vm544_vm1, %v5429_v46 }
 0x171   : > { %v1131_v55 = vpop.f32.mrb[45].mxu0  ;;  %4633 = vmatprep.subr.bf16.mxu0 %v7210_v42  ;;  %1842 = vmatprep.mubr.bf16.mxu1 %v5829_v49  ;;  %v1140_v11 = vadd.f32 %v4839_v39, %v5809_v38  ;;  %v7211_v49 = vpack.c.bf16 %v5948_v13, %v5938_v31  ;;  %567 = vst.msk [vmem:[#allocation2 + $0xb0] sm:$0xff] %vm544_vm1, %v5429_v46  ;;  %568 = vst.msk [vmem:[#allocation2 + $0xb8] sm:$0xff] %vm544_vm1, %v5429_v46 }
 0x172   : > { %v4840_v43 = vpop.f32.mrb[46].mxu0  ;;  %v1132_v47 = vadd.f32 %v5809_v38, %v1131_v55  ;;  %569 = vst.msk [vmem:[#allocation2 + $0xc0] sm:$0xff] %vm544_vm1, %v5429_v46  ;;  %570 = vst.msk [vmem:[#allocation2 + $0xc8] sm:$0xff] %vm544_vm1, %v5429_v46 }
 0x173   : > { %v1143_v52 = vadd.f32 %v4840_v43, %v5809_v38  ;;  %v1134_v0 = vpop.f32.mrb[47].mxu0  ;;  %571 = vst.msk [vmem:[#allocation2 + $0xd0] sm:$0xff] %vm544_vm1, %v5429_v46  ;;  %572 = vst.msk [vmem:[#allocation2 + $0xd8] sm:$0xff] %vm544_vm1, %v5429_v46 }
 0x174   : > { %v1135_v57 = vadd.f32 %v5809_v38, %v1134_v0  ;;  %4634 = vmatpush3.bf16.msra.mxu0 %v1231_v22  ;;  %v1735_v41 = vpop.trf.xlu1  ;;  %v1717_v38 = vpop.trf.xlu0  ;;  %573 = vst.msk [vmem:[#allocation2 + $0xe0] sm:$0xff] %vm544_vm1, %v5429_v46  ;;  %574 = vst.msk [vmem:[#allocation2 + $0xe8] sm:$0xff] %vm544_vm1, %v5429_v46 }
 0x175   : > { %v1233_v40 = vpack.c.bf16 %v1143_v52, %v1140_v11  ;;  %4635 = vmatprep.subr.bf16.mxu0 %v1240_v26  ;;  %575 = vst.msk [vmem:[#allocation2 + $0xf0] sm:$0xff] %vm544_vm1, %v5429_v46  ;;  %576 = vst.msk [vmem:[#allocation2 + $0xf8] sm:$0xff] %vm544_vm1, %v5429_v46 }
 0x176   : > { %v1232_v44 = vpack.c.bf16 %v1135_v57, %v1132_v47 }
 0x178   : > { %4636 = vmatpush3.bf16.msra.mxu0 %v1232_v44  ;;  %1843 = vmatmul.mubr.bf16.gmra.mrb[28].mxu1 %v5985_v58  ;;  %v1736_v50 = vpop.trf.xlu1  ;;  %v1718_v21 = vpop.trf.xlu0 }
 0x179   : > { %4637 = vmatprep.subr.bf16.mxu0 %v7211_v49  ;;  %1850 = vmatprep.mubr.bf16.mxu1 %v5846_v61 }
 0x17c   : > { %4638 = vmatpush3.bf16.msra.mxu0 %v1233_v40  ;;  %v1737_v26 = vpop.trf.xlu1  ;;  %v1719_v61 = vpop.trf.xlu0 }
 0x17f   : > { %1980 = vmatmul.mubr.bf16.vlgmr.msra.gmra.mrb[48].mxu0 %v6012_v14 }
 0x180   : > { %1987 = vmatprep.mubr.bf16.mxu0 %v5895_v32  ;;  %1851 = vmatmul.mubr.bf16.gmra.mrb[32].mxu1 %v5999_v18  ;;  %v1778_v31 = vpop.trf.xlu1  ;;  %v1720_v32 = vpop.trf.xlu0 }
 0x181   : > { %1858 = vmatprep.mubr.bf16.mxu1 %v5859_v10 }
 0x184   : > { %v1779_v10 = vpop.trf.xlu1  ;;  %v6072_v13 = vpop.trf.xlu0 }
 0x187   : > { %1988 = vmatmul.mubr.bf16.gmra.mrb[52].mxu0 %v1731_v45 }
 0x188   : > { %1995 = vmatprep.mubr.bf16.mxu0 %v5927_v5  ;;  %1859 = vmatmul.mubr.bf16.gmra.mrb[36].mxu1 %v6008_v12  ;;  %v1780_v5 = vpop.trf.xlu1 }
 0x189   : > { %1866 = vmatprep.mubr.bf16.mxu1 %v5893_v30  ;;  %v1682_v30 = vpop.trf.xlu0 }
 0x18c   : > { %v1781_v58 = vpop.trf.xlu1 }
 0x18f   : > { %1996 = vmatmul.mubr.bf16.gmra.mrb[56].mxu0 %v1732_v6 }
 0x190   : > { %2003 = vmatprep.mubr.bf16.mxu0 %v5945_v7  ;;  %1867 = vmatmul.mubr.bf16.gmra.mrb[40].mxu1 %v6022_v1  ;;  %v6077_v7 = vpop.trf.xlu1 }
 0x191   : > { %1874 = vmatprep.mubr.bf16.mxu1 %v5925_v3  ;;  %v1683_v3 = vpop.trf.xlu0 }
 0x195   : > { %v1684_v18 = vpop.trf.xlu0 }
 0x197   : > { %2004 = vmatmul.mubr.bf16.gmra.mrb[60].mxu0 %v1733_v35 }
 0x198   : > { %2011 = vmatprep.mubr.bf16.mxu0 %v5966_v27  ;;  %1875 = vmatmul.mubr.bf16.gmra.mrb[44].mxu1 %v6031_v59  ;;  %v6080_v27 = vpop.trf.xlu1 }
 0x199   : > { %1882 = vmatprep.mubr.bf16.mxu1 %v1714_v17 }
 0x19c   : > { %v6082_v12 = vpop.trf.xlu1 }
 0x19f   : > { %2012 = vmatmul.mubr.bf16.gmra.mrb[64].mxu0 %v1734_v24 }
 0x1a0   : > { %2019 = vmatprep.mubr.bf16.mxu0 %v5976_v28  ;;  %1883 = vmatmul.mubr.bf16.gmra.mrb[48].mxu1 %v1682_v30  ;;  %v1685_v28 = vpop.trf.xlu0  ;;  %v6085_v14 = vpop.trf.xlu1 }
 0x1a1   : > { %1890 = vmatprep.mubr.bf16.mxu1 %v1715_v19 }
 0x1a4   : > { %v1686_v56 = vpop.trf.xlu0 }
 0x1a7   : > { %2020 = vmatmul.mubr.bf16.gmra.mrb[68].mxu0 %v1735_v41  ;;  %v1242_v41 = vld [vmem:[#allocation2] sm:$0xff] }
 0x1a8   : > { %2027 = vmatprep.mubr.bf16.mxu0 %v5987_v8  ;;  %1891 = vmatmul.mubr.bf16.gmra.mrb[52].mxu1 %v1683_v3  ;;  %v1746_v8 = vpop.trf.xlu1  ;;  %v1687_v4 = vpop.trf.xlu0 }
 0x1a9   : > { %1898 = vmatprep.mubr.bf16.mxu1 %v1716_v60 }
 0x1ac   : > { %v1747_v1 = vpop.trf.xlu1  ;;  %v1688_v45 = vpop.trf.xlu0 }
 0x1af   : > { %2028 = vmatmul.mubr.bf16.gmra.mrb[72].mxu0 %v1736_v50 }
 0x1b0   : > { %2035 = vmatprep.mubr.bf16.mxu0 %v6001_v16  ;;  %1899 = vmatmul.mubr.bf16.gmra.mrb[56].mxu1 %v1684_v18  ;;  %v1748_v16 = vpop.trf.xlu1  ;;  %v1689_v34 = vpop.trf.xlu0 }
 0x1b1   : > { %1906 = vmatprep.mubr.bf16.mxu1 %v1717_v38 }
 0x1b4   : > { %v1749_v33 = vpop.trf.xlu1 }
 0x1b7   : > { %2036 = vmatmul.mubr.bf16.gmra.mrb[76].mxu0 %v1737_v26 }
 0x1b8   : > { %2043 = vmatprep.mubr.bf16.mxu0 %v1778_v31  ;;  %1907 = vmatmul.mubr.bf16.gmra.mrb[60].mxu1 %v1685_v28  ;;  %v1750_v51 = vpop.trf.xlu1  ;;  %v1244_v28 = vld [vmem:[#allocation2 + $0x10] sm:$0xff] }
 0x1b9   : > { %1914 = vmatprep.mubr.bf16.mxu1 %v1718_v21 }
 0x1bc   : > { %v1751_v48 = vpop.trf.xlu1 }
 0x1bf   : > { %2044 = vmatmul.mubr.bf16.gmra.mrb[80].mxu0 %v1746_v8 }
 0x1c0   : > { %2051 = vmatprep.mubr.bf16.mxu0 %v1779_v10  ;;  %1915 = vmatmul.mubr.bf16.gmra.mrb[64].mxu1 %v1686_v56  ;;  %v1752_v36 = vpop.trf.xlu1 }
 0x1c1   : > { %1922 = vmatprep.mubr.bf16.mxu1 %v1719_v61 }
 0x1c4   : > { %v1753_v59 = vpop.trf.xlu1 }
 0x1c7   : > { %2052 = vmatmul.mubr.bf16.gmra.mrb[84].mxu0 %v1747_v1 }
 0x1c8   : > { %2059 = vmatprep.mubr.bf16.mxu0 %v1780_v5  ;;  %1923 = vmatmul.mubr.bf16.gmra.mrb[68].mxu1 %v1687_v4 }
 0x1c9   : > { %1930 = vmatprep.mubr.bf16.mxu1 %v1720_v32  ;;  %v1243_v32 = vld [vmem:[#allocation2 + $0x8] sm:$0xff] }
 0x1cf   : > { %2060 = vmatmul.mubr.bf16.gmra.mrb[88].mxu0 %v1748_v16 }
 0x1d0   : > { %2067 = vmatprep.mubr.bf16.mxu0 %v1781_v58  ;;  %1931 = vmatmul.mubr.bf16.gmra.mrb[72].mxu1 %v1688_v45  ;;  %v1245_v45 = vld [vmem:[#allocation2 + $0x18] sm:$0xff] }
 0x1d1   : > { %1938 = vmatprep.mubr.bf16.mxu1 %v6072_v13 }
 0x1d7   : > { %2068 = vmatmul.mubr.bf16.gmra.mrb[92].mxu0 %v1749_v33 }
 0x1d8   : > { %2075 = vmatprep.mubr.bf16.mxu0 %v6077_v7  ;;  %1939 = vmatmul.mubr.bf16.gmra.mrb[76].mxu1 %v1689_v34 }
 0x1df   : > { %2076 = vmatmul.mubr.bf16.gmra.mrb[96].mxu0 %v1750_v51 }
 0x1e0   : > { %2083 = vmatprep.mubr.bf16.mxu0 %v6080_v27 }
 0x1e7   : > { %2084 = vmatmul.mubr.bf16.gmra.mrb[100].mxu0 %v1751_v48 }
 0x1e8   : > { %2091 = vmatprep.mubr.bf16.mxu0 %v6082_v12 }
 0x1ef   : > { %2092 = vmatmul.mubr.bf16.gmra.mrb[104].mxu0 %v1752_v36 }
 0x1f0   : > { %2099 = vmatprep.mubr.bf16.mxu0 %v6085_v14 }
 0x1f7   : > { %2100 = vmatmul.mubr.bf16.gmra.mrb[108].mxu0 %v1753_v59 }
 0x233   : > { %v4527_v2 = vpop.f32.mrb[16].mxu1 }
 0x234   : > { %v4528_v6 = vpop.f32.mrb[17].mxu1 }
 0x235   : > { %v4529_v53 = vadd.f32 %v4528_v6, %v4527_v2  ;;  %v4530_v54 = vpop.f32.mrb[18].mxu1 }
 0x236   : > { %v4531_v62 = vpop.f32.mrb[19].mxu1 }
 0x237   : > { %v4532_v37 = vadd.f32 %v4531_v62, %v4530_v54 }
 0x23b   : > { %v4533_v20 = vpop.f32.mrb[20].mxu1 }
 0x23c   : > { %v4534_v25 = vpop.f32.mrb[21].mxu1 }
 0x23d   : > { %v4535_v29 = vadd.f32 %v4534_v25, %v4533_v20  ;;  %v4536_v15 = vpop.f32.mrb[22].mxu1  ;;  %v1246_v20 = vld [vmem:[#allocation2 + $0x20] sm:$0xff] }
 0x23e   : > { %v4537_v22 = vpop.f32.mrb[23].mxu1 }
 0x23f   : > { %v4538_v9 = vadd.f32 %v4537_v22, %v4536_v15 }
 0x243   : > { %v4539_v17 = vpop.f32.mrb[24].mxu1 }
 0x244   : > { %v4540_v23 = vpop.f32.mrb[25].mxu1 }
 0x245   : > { %v6124_v35 = vadd.f32 %v4540_v23, %v4539_v17  ;;  %v4542_v39 = vpop.f32.mrb[26].mxu1  ;;  %v1247_v23 = vld [vmem:[#allocation2 + $0x28] sm:$0xff] }
 0x246   : > { %v4543_v55 = vpop.f32.mrb[27].mxu1 }
 0x247   : > { %v6126_v42 = vadd.f32 %v4543_v55, %v4542_v39 }
 0x24b   : > { %v4545_v43 = vpop.f32.mrb[28].mxu1 }
 0x24c   : > { %v4546_v11 = vpop.f32.mrb[29].mxu1 }
 0x24d   : > { %v6128_v52 = vadd.f32 %v4546_v11, %v4545_v43  ;;  %v4548_v0 = vpop.f32.mrb[30].mxu1 }
 0x24e   : > { %v4549_v19 = vpop.f32.mrb[31].mxu1 }
 0x24f   : > { %v6130_v47 = vadd.f32 %v4549_v19, %v4548_v0 }
 0x252   : > { %v4639_v57 = vpop.f32.mrb[48].mxu0 }
 0x253   : > { %v4640_v24 = vpop.f32.mrb[49].mxu0  ;;  %v4551_v40 = vpop.f32.mrb[32].mxu1 }
 0x254   : > { %v4641_v44 = vadd.f32 %v4640_v24, %v4639_v57  ;;  %v4642_v49 = vpop.f32.mrb[50].mxu0  ;;  %v4552_v60 = vpop.f32.mrb[33].mxu1 }
 0x255   : > { %v4643_v38 = vpop.f32.mrb[51].mxu0  ;;  %v6132_v50 = vadd.f32 %v4552_v60, %v4551_v40  ;;  %v4554_v21 = vpop.f32.mrb[34].mxu1 }
 0x256   : > { %v1982_v26 = vadd.f32 %v4641_v44, %v4529_v53  ;;  %v4644_v61 = vadd.f32 %v4643_v38, %v4642_v49  ;;  %v4555_v31 = vpop.f32.mrb[35].mxu1 }
 0x257   : > { %v6134_v10 = vadd.f32 %v4555_v31, %v4554_v21 }
 0x258   : > { %v2108_v13 = vadd.f32 %v1982_v26, %v1242_v41  ;;  %v1985_v5 = vadd.f32 %v4644_v61, %v4532_v37  ;;  %v1248_v41 = vld [vmem:[#allocation2 + $0x30] sm:$0xff] }
 0x25a   : > { %2141 = vst.msk [vmem:[#allocation2] sm:$0xff] %vm544_vm1, %v2108_v13  ;;  %v2109_v30 = vadd.f32 %v1985_v5, %v1243_v32  ;;  %v4645_v58 = vpop.f32.mrb[52].mxu0  ;;  %v1249_v13 = vld [vmem:[#allocation2 + $0x38] sm:$0xff] }
 0x25b   : > { %v4646_v7 = vpop.f32.mrb[53].mxu0  ;;  %v4557_v3 = vpop.f32.mrb[36].mxu1 }
 0x25c   : > { %2142 = vst.msk [vmem:[#allocation2 + $0x8] sm:$0xff] %vm544_vm1, %v2109_v30  ;;  %v4647_v27 = vadd.f32 %v4646_v7, %v4645_v58  ;;  %v4648_v18 = vpop.f32.mrb[54].mxu0  ;;  %v4558_v12 = vpop.f32.mrb[37].mxu1 }
 0x25d   : > { %v4649_v14 = vpop.f32.mrb[55].mxu0  ;;  %v6138_v8 = vadd.f32 %v4558_v12, %v4557_v3  ;;  %v4560_v56 = vpop.f32.mrb[38].mxu1 }
 0x25e   : > { %v1990_v1 = vadd.f32 %v4647_v27, %v4535_v29  ;;  %v4650_v4 = vadd.f32 %v4649_v14, %v4648_v18  ;;  %v4561_v16 = vpop.f32.mrb[39].mxu1 }
 0x25f   : > { %v6140_v46 = vadd.f32 %v4561_v16, %v4560_v56 }
 0x260   : > { %v2110_v33 = vadd.f32 %v1990_v1, %v1244_v28  ;;  %v1993_v34 = vadd.f32 %v4650_v4, %v4538_v9  ;;  %v1250_v4 = vld [vmem:[#allocation2 + $0x40] sm:$0xff] }
 0x261   : > { %v6142_v51 = vld [vmem:[#allocation2] sm:$0xff] }
 0x262   : > { %2143 = vst.msk [vmem:[#allocation2 + $0x10] sm:$0xff] %vm544_vm1, %v2110_v33  ;;  %v2111_v63 = vadd.f32 %v1993_v34, %v1245_v45  ;;  %v4651_v48 = vpop.f32.mrb[56].mxu0  ;;  %v2208_v36 = vmax.f32 %v6142_v51, 1.0  ;;  %v5193_v34 = vld [vmem:[%s7190_s6] sm:$0xff]  }
 0x263   : > { %v4652_v59 = vpop.f32.mrb[57].mxu0  ;;  %v6146_v2 = vld [vmem:[#allocation2 + $0x8] sm:$0xff]  ;;  %v4563_v6 = vpop.f32.mrb[40].mxu1  ;;  %4857 = vmatprep.subr.bf16.mxu1 %v5193_v34 }
 0x264   : > { %2144 = vst.msk [vmem:[#allocation2 + $0x18] sm:$0xff] %vm544_vm1, %v2111_v63  ;;  %v4653_v53 = vadd.f32 %v4652_v59, %v4651_v48  ;;  %v4654_v54 = vpop.f32.mrb[58].mxu0  ;;  %2242 = vperm.xlu0 %5061, %v2208_v36   ;;  %v2209_v62 = vmax.f32 %v6146_v2, 1.0  ;;  %v4564_v37 = vpop.f32.mrb[41].mxu1  ;;  %v1251_v59 = vld [vmem:[#allocation2 + $0x48] sm:$0xff]  ;;  %4858 = vmatpush3.bf16.msra.mxu1 %v5193_v34 }
 0x265   : > { %v4655_v25 = vpop.f32.mrb[59].mxu0  ;;  %v6150_v29 = vadd.f32 %v4564_v37, %v4563_v6  ;;  %v4566_v15 = vpop.f32.mrb[42].mxu1  ;;  %v5194_v37 = vld [vmem:[%s7190_s6 + $0x8] sm:$0xff]  }
 0x266   : > { %v1998_v22 = vadd.f32 %v4653_v53, %v6124_v35  ;;  %v4656_v9 = vadd.f32 %v4655_v25, %v4654_v54  ;;  %2247 = vperm.xlu1 %5062, %v2209_v62   ;;  %v4567_v17 = vpop.f32.mrb[43].mxu1  ;;  %4859 = vmatprep.subr.bf16.mxu1 %v5194_v37 }
 0x267   : > { %v6153_v39 = vadd.f32 %v4567_v17, %v4566_v15 }
 0x268   : > { %v2112_v55 = vadd.f32 %v1998_v22, %v1246_v20  ;;  %v2001_v43 = vadd.f32 %v4656_v9, %v6126_v42  ;;  %4860 = vmatpush3.bf16.msra.mxu1 %v5194_v37 }
 0x269   : > { %v6156_v11 = vld [vmem:[#allocation2 + $0x10] sm:$0xff] }
 0x26a   : > { %2145 = vst.msk [vmem:[#allocation2 + $0x20] sm:$0xff] %vm544_vm1, %v2112_v55  ;;  %v2113_v0 = vadd.f32 %v2001_v43, %v1247_v23  ;;  %v4657_v19 = vpop.f32.mrb[60].mxu0  ;;  %v2210_v57 = vmax.f32 %v6156_v11, 1.0  ;;  %v1252_v43 = vld [vmem:[#allocation2 + $0x50] sm:$0xff] }
 0x26b   : > { %v4658_v24 = vpop.f32.mrb[61].mxu0  ;;  %v6160_v40 = vld [vmem:[#allocation2 + $0x18] sm:$0xff]  ;;  %v4569_v35 = vpop.f32.mrb[44].mxu1 }
 0x26c   : > { %2146 = vst.msk [vmem:[#allocation2 + $0x28] sm:$0xff] %vm544_vm1, %v2113_v0  ;;  %v4659_v44 = vadd.f32 %v4658_v24, %v4657_v19  ;;  %v4660_v49 = vpop.f32.mrb[62].mxu0  ;;  %2252 = vperm.xlu1 %5062, %v2210_v57   ;;  %v4570_v60 = vpop.f32.mrb[45].mxu1  ;;  %v2211_v31 = vmax.f32 %v6160_v40, 1.0 }
 0x26d   : > { %v4661_v42 = vpop.f32.mrb[63].mxu0  ;;  %v6163_v38 = vadd.f32 %v4570_v60, %v4569_v35  ;;  %v4572_v21 = vpop.f32.mrb[46].mxu1 }
 0x26e   : > { %v2006_v26 = vadd.f32 %v4659_v44, %v6128_v52  ;;  %v4662_v61 = vadd.f32 %v4661_v42, %v4660_v49  ;;  %v4573_v32 = vpop.f32.mrb[47].mxu1  ;;  %v1253_v49 = vld [vmem:[#allocation2 + $0x58] sm:$0xff] }
 0x26f   : > { %v6167_v5 = vadd.f32 %v4573_v32, %v4572_v21 }
 0x270   : > { %v2114_v30 = vadd.f32 %v2006_v26, %v1248_v41  ;;  %v2009_v58 = vadd.f32 %v4662_v61, %v6130_v47  ;;  %2257 = vperm.xlu1 %5062, %v2211_v31  }
 0x271   : > { %v6170_v7 = vld [vmem:[#allocation2 + $0x20] sm:$0xff] }
 0x272   : > { %2147 = vst.msk [vmem:[#allocation2 + $0x30] sm:$0xff] %vm544_vm1, %v2114_v30  ;;  %v2115_v3 = vadd.f32 %v2009_v58, %v1249_v13  ;;  %v4663_v27 = vpop.f32.mrb[64].mxu0  ;;  %v2212_v18 = vmax.f32 %v6170_v7, 1.0 }
 0x273   : > { %v4664_v52 = vpop.f32.mrb[65].mxu0  ;;  %v6174_v12 = vld [vmem:[#allocation2 + $0x28] sm:$0xff]  ;;  %v4575_v28 = vpop.f32.mrb[48].mxu1 }
 0x274   : > { %2148 = vst.msk [vmem:[#allocation2 + $0x38] sm:$0xff] %vm544_vm1, %v2115_v3  ;;  %v4665_v14 = vadd.f32 %v4664_v52, %v4663_v27  ;;  %v4666_v56 = vpop.f32.mrb[66].mxu0  ;;  %2262 = vperm.xlu0 %5061, %v2212_v18   ;;  %v2213_v47 = vmax.f32 %v6174_v12, 1.0  ;;  %v4576_v1 = vpop.f32.mrb[49].mxu1  ;;  %v1254_v27 = vld [vmem:[#allocation2 + $0x60] sm:$0xff] }
 0x275   : > { %v4667_v16 = vpop.f32.mrb[67].mxu0  ;;  %v6178_v45 = vadd.f32 %v4576_v1, %v4575_v28  ;;  %v4578_v33 = vpop.f32.mrb[50].mxu1  ;;  %v1255_v1 = vld [vmem:[#allocation2 + $0x68] sm:$0xff] }
 0x276   : > { %v2014_v63 = vadd.f32 %v4665_v14, %v6132_v50  ;;  %v4668_v48 = vadd.f32 %v4667_v16, %v4666_v56  ;;  %2267 = vperm.xlu1 %5062, %v2213_v47   ;;  %v4579_v36 = vpop.f32.mrb[51].mxu1 }
 0x277   : > { %v6184_v6 = vadd.f32 %v4579_v36, %v4578_v33 }
 0x278   : > { %v2116_v53 = vadd.f32 %v2014_v63, %v1250_v4  ;;  %v2017_v54 = vadd.f32 %v4668_v48, %v6134_v10 }
 0x279   : > { %v6187_v62 = vld [vmem:[#allocation2 + $0x30] sm:$0xff] }
 0x27a   : > { %2149 = vst.msk [vmem:[#allocation2 + $0x40] sm:$0xff] %vm544_vm1, %v2116_v53  ;;  %v2117_v50 = vadd.f32 %v2017_v54, %v1251_v59  ;;  %v4669_v20 = vpop.f32.mrb[68].mxu0  ;;  %v2214_v25 = vmax.f32 %v6187_v62, 1.0 }
 0x27b   : > { %v4670_v15 = vpop.f32.mrb[69].mxu0  ;;  %v6194_v22 = vld [vmem:[#allocation2 + $0x38] sm:$0xff]  ;;  %v4581_v9 = vpop.f32.mrb[52].mxu1 }
 0x27c   : > { %2150 = vst.msk [vmem:[#allocation2 + $0x48] sm:$0xff] %vm544_vm1, %v2117_v50  ;;  %v4671_v10 = vadd.f32 %v4670_v15, %v4669_v20  ;;  %v4672_v17 = vpop.f32.mrb[70].mxu0  ;;  %2272 = vperm.xlu0 %5061, %v2214_v25   ;;  %v2215_v23 = vmax.f32 %v6194_v22, 1.0  ;;  %v4582_v55 = vpop.f32.mrb[53].mxu1  ;;  %v1256_v20 = vld [vmem:[#allocation2 + $0x70] sm:$0xff] }
 0x27d   : > { %v4673_v0 = vpop.f32.mrb[71].mxu0  ;;  %v6198_v19 = vadd.f32 %v4582_v55, %v4581_v9  ;;  %v4584_v57 = vpop.f32.mrb[54].mxu1  ;;  %v1257_v55 = vld [vmem:[#allocation2 + $0x78] sm:$0xff] }
 0x27e   : > { %v2022_v24 = vadd.f32 %v4671_v10, %v6138_v8  ;;  %v4674_v35 = vadd.f32 %v4673_v0, %v4672_v17  ;;  %2277 = vperm.xlu1 %5062, %v2215_v23   ;;  %v4585_v44 = vpop.f32.mrb[55].mxu1 }
 0x27f   : > { %v6201_v60 = vadd.f32 %v4585_v44, %v4584_v57 }
 0x280   : > { %v2118_v41 = vadd.f32 %v2022_v24, %v1252_v43  ;;  %v2025_v42 = vadd.f32 %v4674_v35, %v6140_v46 }
 0x281   : > { %v6204_v21 = vld [vmem:[#allocation2 + $0x40] sm:$0xff] }
 0x282   : > { %2151 = vst.msk [vmem:[#allocation2 + $0x50] sm:$0xff] %vm544_vm1, %v2118_v41  ;;  %v2119_v26 = vadd.f32 %v2025_v42, %v1253_v49  ;;  %v4675_v61 = vpop.f32.mrb[72].mxu0  ;;  %v2216_v31 = vmax.f32 %v6204_v21, 1.0 }
 0x283   : > { %v4676_v32 = vpop.f32.mrb[73].mxu0  ;;  %v6208_v13 = vld [vmem:[#allocation2 + $0x48] sm:$0xff]  ;;  %v4587_v8 = vpop.f32.mrb[56].mxu1 }
 0x284   : > { %2152 = vst.msk [vmem:[#allocation2 + $0x58] sm:$0xff] %vm544_vm1, %v2119_v26  ;;  %v4677_v30 = vadd.f32 %v4676_v32, %v4675_v61  ;;  %v4678_v58 = vpop.f32.mrb[74].mxu0  ;;  %2282 = vperm.xlu0 %5061, %v2216_v31   ;;  %v2217_v3 = vmax.f32 %v6208_v13, 1.0  ;;  %v4588_v46 = vpop.f32.mrb[57].mxu1  ;;  %v1258_v32 = vld [vmem:[#allocation2 + $0x80] sm:$0xff] }
 0x285   : > { %v4679_v18 = vpop.f32.mrb[75].mxu0  ;;  %v6212_v52 = vadd.f32 %v4588_v46, %v4587_v8  ;;  %v4590_v28 = vpop.f32.mrb[58].mxu1 }
 0x286   : > { %v2030_v14 = vadd.f32 %v4677_v30, %v6150_v29  ;;  %v4680_v56 = vadd.f32 %v4679_v18, %v4678_v58  ;;  %2287 = vperm.xlu1 %5062, %v2217_v3   ;;  %v4591_v47 = vpop.f32.mrb[59].mxu1  ;;  %v1259_v18 = vld [vmem:[#allocation2 + $0x88] sm:$0xff] }
 0x287   : > { %v6215_v4 = vadd.f32 %v4591_v47, %v4590_v28 }
 0x288   : > { %v2120_v16 = vadd.f32 %v2030_v14, %v1254_v27  ;;  %v2033_v33 = vadd.f32 %v4680_v56, %v6153_v39 }
 0x289   : > { %v6218_v34 = vld [vmem:[#allocation2 + $0x50] sm:$0xff] }
 0x28a   : > { %2153 = vst.msk [vmem:[#allocation2 + $0x60] sm:$0xff] %vm544_vm1, %v2120_v16  ;;  %v2121_v63 = vadd.f32 %v2033_v33, %v1255_v1  ;;  %v4681_v48 = vpop.f32.mrb[76].mxu0  ;;  %v2218_v36 = vmax.f32 %v6218_v34, 1.0 }
 0x28b   : > { %v4682_v59 = vpop.f32.mrb[77].mxu0  ;;  %v6222_v53 = vld [vmem:[#allocation2 + $0x58] sm:$0xff]  ;;  %v4593_v29 = vpop.f32.mrb[60].mxu1 }
 0x28c   : > { %2154 = vst.msk [vmem:[#allocation2 + $0x68] sm:$0xff] %vm544_vm1, %v2121_v63  ;;  %v4683_v54 = vadd.f32 %v4682_v59, %v4681_v48  ;;  %v4684_v37 = vpop.f32.mrb[78].mxu0  ;;  %2292 = vperm.xlu0 %5061, %v2218_v36   ;;  %v2219_v50 = vmax.f32 %v6222_v53, 1.0  ;;  %v4594_v39 = vpop.f32.mrb[61].mxu1 }
 0x28d   : > { %v4685_v25 = vpop.f32.mrb[79].mxu0  ;;  %v6226_v15 = vadd.f32 %v4594_v39, %v4593_v29  ;;  %v4596_v9 = vpop.f32.mrb[62].mxu1 }
 0x28e   : > { %v2038_v10 = vadd.f32 %v4683_v54, %v6163_v38  ;;  %v4686_v17 = vadd.f32 %v4685_v25, %v4684_v37  ;;  %2297 = vperm.xlu1 %5062, %v2219_v50   ;;  %v4597_v23 = vpop.f32.mrb[63].mxu1  ;;  %v1260_v54 = vld [vmem:[#allocation2 + $0x90] sm:$0xff] }
 0x28f   : > { %v6229_v43 = vadd.f32 %v4597_v23, %v4596_v9 }
 0x290   : > { %v2122_v0 = vadd.f32 %v2038_v10, %v1256_v20  ;;  %v2041_v57 = vadd.f32 %v4686_v17, %v6167_v5  ;;  %v1261_v10 = vld [vmem:[#allocation2 + $0x98] sm:$0xff] }
 0x291   : > { %v6232_v24 = vld [vmem:[#allocation2 + $0x60] sm:$0xff] }
 0x292   : > { %2155 = vst.msk [vmem:[#allocation2 + $0x70] sm:$0xff] %vm544_vm1, %v2122_v0  ;;  %v2123_v35 = vadd.f32 %v2041_v57, %v1257_v55  ;;  %v4687_v44 = vpop.f32.mrb[80].mxu0  ;;  %v2220_v49 = vmax.f32 %v6232_v24, 1.0 }
 0x293   : > { %v4688_v41 = vpop.f32.mrb[81].mxu0  ;;  %v6236_v42 = vld [vmem:[#allocation2 + $0x68] sm:$0xff]  ;;  %v4599_v38 = vpop.f32.mrb[64].mxu1 }
 0x294   : > { %2156 = vst.msk [vmem:[#allocation2 + $0x78] sm:$0xff] %vm544_vm1, %v2123_v35  ;;  %v4689_v26 = vadd.f32 %v4688_v41, %v4687_v44  ;;  %v4690_v61 = vpop.f32.mrb[82].mxu0  ;;  %2302 = vperm.xlu0 %5061, %v2220_v49   ;;  %v2221_v31 = vmax.f32 %v6236_v42, 1.0  ;;  %v4600_v5 = vpop.f32.mrb[65].mxu1 }
 0x295   : > { %v4691_v8 = vpop.f32.mrb[83].mxu0  ;;  %v6240_v30 = vadd.f32 %v4600_v5, %v4599_v38  ;;  %v4602_v58 = vpop.f32.mrb[66].mxu1 }
 0x296   : > { %v2046_v3 = vadd.f32 %v4689_v26, %v6178_v45  ;;  %v4692_v46 = vadd.f32 %v4691_v8, %v4690_v61  ;;  %2307 = vperm.xlu1 %5062, %v2221_v31   ;;  %v4603_v27 = vpop.f32.mrb[67].mxu1  ;;  %v1262_v31 = vld [vmem:[#allocation2 + $0xa0] sm:$0xff] }
 0x297   : > { %v6243_v28 = vadd.f32 %v4603_v27, %v4602_v58  ;;  %v1263_v27 = vld [vmem:[#allocation2 + $0xa8] sm:$0xff] }
 0x298   : > { %v2124_v14 = vadd.f32 %v2046_v3, %v1258_v32  ;;  %v2049_v56 = vadd.f32 %v4692_v46, %v6184_v6 }
 0x299   : > { %v6246_v47 = vld [vmem:[#allocation2 + $0x70] sm:$0xff] }
 0x29a   : > { %2157 = vst.msk [vmem:[#allocation2 + $0x80] sm:$0xff] %vm544_vm1, %v2124_v14  ;;  %v2125_v1 = vadd.f32 %v2049_v56, %v1259_v18  ;;  %v4693_v16 = vpop.f32.mrb[84].mxu0  ;;  %v2222_v33 = vmax.f32 %v6246_v47, 1.0 }
 0x29b   : > { %v4694_v63 = vpop.f32.mrb[85].mxu0  ;;  %v6250_v48 = vld [vmem:[#allocation2 + $0x78] sm:$0xff]  ;;  %v4605_v45 = vpop.f32.mrb[68].mxu1 }
 0x29c   : > { %2158 = vst.msk [vmem:[#allocation2 + $0x88] sm:$0xff] %vm544_vm1, %v2125_v1  ;;  %v4695_v36 = vadd.f32 %v4694_v63, %v4693_v16  ;;  %v4696_v59 = vpop.f32.mrb[86].mxu0  ;;  %2312 = vperm.xlu0 %5061, %v2222_v33   ;;  %v2223_v29 = vmax.f32 %v6250_v48, 1.0  ;;  %v4606_v6 = vpop.f32.mrb[69].mxu1 }
 0x29d   : > { %v4697_v37 = vpop.f32.mrb[87].mxu0  ;;  %v6254_v50 = vadd.f32 %v4606_v6, %v4605_v45  ;;  %v4608_v39 = vpop.f32.mrb[70].mxu1 }
 0x29e   : > { %v2054_v20 = vadd.f32 %v4695_v36, %v6198_v19  ;;  %v4698_v25 = vadd.f32 %v4697_v37, %v4696_v59  ;;  %2317 = vperm.xlu1 %5062, %v2223_v29   ;;  %v4609_v9 = vpop.f32.mrb[71].mxu1 }
 0x29f   : > { %v6257_v17 = vadd.f32 %v4609_v9, %v4608_v39 }
 0x2a0   : > { %v2126_v23 = vadd.f32 %v2054_v20, %v1260_v54  ;;  %v2057_v55 = vadd.f32 %v4698_v25, %v6201_v60  ;;  %v1264_v54 = vld [vmem:[#allocation2 + $0xb0] sm:$0xff] }
 0x2a1   : > { %v6260_v0 = vld [vmem:[#allocation2 + $0x80] sm:$0xff] }
 0x2a2   : > { %2159 = vst.msk [vmem:[#allocation2 + $0x90] sm:$0xff] %vm544_vm1, %v2126_v23  ;;  %v2127_v57 = vadd.f32 %v2057_v55, %v1261_v10  ;;  %v4699_v35 = vpop.f32.mrb[88].mxu0  ;;  %v2224_v44 = vmax.f32 %v6260_v0, 1.0  ;;  %v1265_v23 = vld [vmem:[#allocation2 + $0xb8] sm:$0xff] }
 0x2a3   : > { %v4700_v49 = vpop.f32.mrb[89].mxu0  ;;  %v6264_v41 = vld [vmem:[#allocation2 + $0x88] sm:$0xff]  ;;  %v4611_v19 = vpop.f32.mrb[72].mxu1 }
 0x2a4   : > { %2160 = vst.msk [vmem:[#allocation2 + $0x98] sm:$0xff] %vm544_vm1, %v2127_v57  ;;  %v4701_v38 = vadd.f32 %v4700_v49, %v4699_v35  ;;  %v4702_v26 = vpop.f32.mrb[90].mxu0  ;;  %2322 = vperm.xlu0 %5061, %v2224_v44   ;;  %v2225_v61 = vmax.f32 %v6264_v41, 1.0  ;;  %v4612_v60 = vpop.f32.mrb[73].mxu1 }
 0x2a5   : > { %v4703_v5 = vpop.f32.mrb[91].mxu0  ;;  %v6268_v32 = vadd.f32 %v4612_v60, %v4611_v19  ;;  %v4614_v8 = vpop.f32.mrb[74].mxu1 }
 0x2a6   : > { %v2062_v58 = vadd.f32 %v4701_v38, %v6212_v52  ;;  %v4704_v3 = vadd.f32 %v4703_v5, %v4702_v26  ;;  %2327 = vperm.xlu1 %5062, %v2225_v61   ;;  %v4615_v46 = vpop.f32.mrb[75].mxu1  ;;  %v1266_v5 = vld [vmem:[#allocation2 + $0xc0] sm:$0xff] }
 0x2a7   : > { %v6271_v18 = vadd.f32 %v4615_v46, %v4614_v8 }
 0x2a8   : > { %v2128_v14 = vadd.f32 %v2062_v58, %v1262_v31  ;;  %v2065_v56 = vadd.f32 %v4704_v3, %v6215_v4  ;;  %v1267_v3 = vld [vmem:[#allocation2 + $0xc8] sm:$0xff] }
 0x2a9   : > { %v6274_v1 = vld [vmem:[#allocation2 + $0x90] sm:$0xff] }
 0x2aa   : > { %2161 = vst.msk [vmem:[#allocation2 + $0xa0] sm:$0xff] %vm544_vm1, %v2128_v14  ;;  %v2129_v16 = vadd.f32 %v2065_v56, %v1263_v27  ;;  %v4705_v33 = vpop.f32.mrb[92].mxu0  ;;  %v2226_v63 = vmax.f32 %v6274_v1, 1.0 }
 0x2ab   : > { %v4706_v45 = vpop.f32.mrb[93].mxu0  ;;  %v6278_v36 = vld [vmem:[#allocation2 + $0x98] sm:$0xff]  ;;  %v4617_v52 = vpop.f32.mrb[76].mxu1 }
 0x2ac   : > { %2162 = vst.msk [vmem:[#allocation2 + $0xa8] sm:$0xff] %vm544_vm1, %v2129_v16  ;;  %v4707_v59 = vadd.f32 %v4706_v45, %v4705_v33  ;;  %v4708_v29 = vpop.f32.mrb[94].mxu0  ;;  %2332 = vperm.xlu0 %5061, %v2226_v63   ;;  %v2227_v6 = vmax.f32 %v6278_v36, 1.0  ;;  %v4618_v4 = vpop.f32.mrb[77].mxu1 }
 0x2ad   : > { %v4709_v37 = vpop.f32.mrb[95].mxu0  ;;  %v6282_v39 = vadd.f32 %v4618_v4, %v4617_v52  ;;  %v4620_v20 = vpop.f32.mrb[78].mxu1 }
 0x2ae   : > { %v2070_v25 = vadd.f32 %v4707_v59, %v6226_v15  ;;  %v4710_v9 = vadd.f32 %v4709_v37, %v4708_v29  ;;  %2337 = vperm.xlu1 %5062, %v2227_v6   ;;  %v4621_v10 = vpop.f32.mrb[79].mxu1  ;;  %v1268_v29 = vld [vmem:[#allocation2 + $0xd0] sm:$0xff] }
 0x2af   : > { %v6285_v55 = vadd.f32 %v4621_v10, %v4620_v20 }
 0x2b0   : > { %v2130_v57 = vadd.f32 %v2070_v25, %v1264_v54  ;;  %v2073_v35 = vadd.f32 %v4710_v9, %v6229_v43  ;;  %v1269_v54 = vld [vmem:[#allocation2 + $0xd8] sm:$0xff] }
 0x2b1   : > { %v6288_v44 = vld [vmem:[#allocation2 + $0xa0] sm:$0xff] }
 0x2b2   : > { %2163 = vst.msk [vmem:[#allocation2 + $0xb0] sm:$0xff] %vm544_vm1, %v2130_v57  ;;  %v2131_v49 = vadd.f32 %v2073_v35, %v1265_v23  ;;  %v4711_v19 = vpop.f32.mrb[96].mxu0  ;;  %v2228_v38 = vmax.f32 %v6288_v44, 1.0 }
 0x2b3   : > { %v4712_v26 = vpop.f32.mrb[97].mxu0  ;;  %v6292_v61 = vld [vmem:[#allocation2 + $0xa8] sm:$0xff] }
 0x2b4   : > { %2164 = vst.msk [vmem:[#allocation2 + $0xb8] sm:$0xff] %vm544_vm1, %v2131_v49  ;;  %v4713_v15 = vadd.f32 %v4712_v26, %v4711_v19  ;;  %v4714_v60 = vpop.f32.mrb[98].mxu0  ;;  %2342 = vperm.xlu0 %5061, %v2228_v38   ;;  %v2229_v31 = vmax.f32 %v6292_v61, 1.0  ;;  %v1270_v38 = vld [vmem:[#allocation2 + $0xe0] sm:$0xff] }
 0x2b5   : > { %v4715_v43 = vpop.f32.mrb[99].mxu0 }
 0x2b6   : > { %v2078_v8 = vadd.f32 %v4713_v15, %v6240_v30  ;;  %v4716_v58 = vadd.f32 %v4715_v43, %v4714_v60  ;;  %2347 = vperm.xlu1 %5062, %v2229_v31   ;;  %v1271_v60 = vld [vmem:[#allocation2 + $0xe8] sm:$0xff] }
 0x2b8   : > { %v2132_v46 = vadd.f32 %v2078_v8, %v1266_v5  ;;  %v2081_v27 = vadd.f32 %v4716_v58, %v6243_v28 }
 0x2b9   : > { %v6298_v14 = vld [vmem:[#allocation2 + $0xb0] sm:$0xff] }
 0x2ba   : > { %2165 = vst.msk [vmem:[#allocation2 + $0xc0] sm:$0xff] %vm544_vm1, %v2132_v46  ;;  %v2133_v56 = vadd.f32 %v2081_v27, %v1267_v3  ;;  %v4717_v16 = vpop.f32.mrb[100].mxu0  ;;  %v2230_v33 = vmax.f32 %v6298_v14, 1.0 }
 0x2bb   : > { %v4718_v63 = vpop.f32.mrb[101].mxu0  ;;  %v6302_v45 = vld [vmem:[#allocation2 + $0xb8] sm:$0xff] }
 0x2bc   : > { %2166 = vst.msk [vmem:[#allocation2 + $0xc8] sm:$0xff] %vm544_vm1, %v2133_v56  ;;  %v4719_v30 = vadd.f32 %v4718_v63, %v4717_v16  ;;  %v4720_v52 = vpop.f32.mrb[102].mxu0  ;;  %2352 = vperm.xlu0 %5061, %v2230_v33   ;;  %v2231_v59 = vmax.f32 %v6302_v45, 1.0  ;;  %v1272_v33 = vld [vmem:[#allocation2 + $0xf0] sm:$0xff] }
 0x2bd   : > { %v4721_v28 = vpop.f32.mrb[103].mxu0 }
 0x2be   : > { %v2086_v6 = vadd.f32 %v4719_v30, %v6254_v50  ;;  %v4722_v4 = vadd.f32 %v4721_v28, %v4720_v52  ;;  %2357 = vperm.xlu1 %5062, %v2231_v59   ;;  %v1273_v52 = vld [vmem:[#allocation2 + $0xf8] sm:$0xff] }
 0x2c0   : > { %v2134_v37 = vadd.f32 %v2086_v6, %v1268_v29  ;;  %v2089_v20 = vadd.f32 %v4722_v4, %v6257_v17 }
 0x2c1   : > { %v6308_v25 = vld [vmem:[#allocation2 + $0xc0] sm:$0xff] }
 0x2c2   : > { %2167 = vst.msk [vmem:[#allocation2 + $0xd0] sm:$0xff] %vm544_vm1, %v2134_v37  ;;  %v2135_v9 = vadd.f32 %v2089_v20, %v1269_v54  ;;  %v4723_v10 = vpop.f32.mrb[104].mxu0  ;;  %v2232_v23 = vmax.f32 %v6308_v25, 1.0 }
 0x2c3   : > { %v4724_v57 = vpop.f32.mrb[105].mxu0  ;;  %v6312_v35 = vld [vmem:[#allocation2 + $0xc8] sm:$0xff] }
 0x2c4   : > { %2168 = vst.msk [vmem:[#allocation2 + $0xd8] sm:$0xff] %vm544_vm1, %v2135_v9  ;;  %v4725_v50 = vadd.f32 %v4724_v57, %v4723_v10  ;;  %v4726_v49 = vpop.f32.mrb[106].mxu0  ;;  %2362 = vperm.xlu0 %5061, %v2232_v23   ;;  %v2233_v19 = vmax.f32 %v6312_v35, 1.0 }
 0x2c5   : > { %v4727_v17 = vpop.f32.mrb[107].mxu0 }
 0x2c6   : > { %v2094_v26 = vadd.f32 %v4725_v50, %v6268_v32  ;;  %v4728_v15 = vadd.f32 %v4727_v17, %v4726_v49  ;;  %2367 = vperm.xlu1 %5062, %v2233_v19   ;;  %v5195_v50 = vld [vmem:[%s7189_s5] sm:$0xff]  }
 0x2c7   : > { %4893 = vmatprep.subr.bf16.mxu1 %v5195_v50 }
 0x2c8   : > { %v2136_v31 = vadd.f32 %v2094_v26, %v1270_v38  ;;  %v2097_v5 = vadd.f32 %v4728_v15, %v6271_v18 }
 0x2c9   : > { %v6318_v43 = vld [vmem:[#allocation2 + $0xd0] sm:$0xff] }
 0x2ca   : > { %2169 = vst.msk [vmem:[#allocation2 + $0xe0] sm:$0xff] %vm544_vm1, %v2136_v31  ;;  %v2137_v8 = vadd.f32 %v2097_v5, %v1271_v60  ;;  %v4729_v58 = vpop.f32.mrb[108].mxu0  ;;  %v2234_v3 = vmax.f32 %v6318_v43, 1.0 }
 0x2cb   : > { %v4730_v46 = vpop.f32.mrb[109].mxu0  ;;  %v6322_v27 = vld [vmem:[#allocation2 + $0xd8] sm:$0xff] }
 0x2cc   : > { %2170 = vst.msk [vmem:[#allocation2 + $0xe8] sm:$0xff] %vm544_vm1, %v2137_v8  ;;  %v4731_v32 = vadd.f32 %v4730_v46, %v4729_v58  ;;  %v4732_v56 = vpop.f32.mrb[110].mxu0  ;;  %2372 = vperm.xlu0 %5061, %v2234_v3   ;;  %v2235_v16 = vmax.f32 %v6322_v27, 1.0 }
 0x2cd   : > { %v4733_v18 = vpop.f32.mrb[111].mxu0 }
 0x2ce   : > { %v2102_v63 = vadd.f32 %v4731_v32, %v6282_v39  ;;  %v4734_v30 = vadd.f32 %v4733_v18, %v4732_v56  ;;  %2377 = vperm.xlu1 %5062, %v2235_v16   ;;  %v5196_v32 = vld [vmem:[%s7189_s5 + $0x8] sm:$0xff]  }
 0x2d0   : > { %v2138_v59 = vadd.f32 %v2102_v63, %v1272_v33  ;;  %v2105_v29 = vadd.f32 %v4734_v30, %v6285_v55 }
 0x2d1   : > { %v6328_v28 = vld [vmem:[#allocation2 + $0xe0] sm:$0xff] }
 0x2d2   : > { %2171 = vst.msk [vmem:[#allocation2 + $0xf0] sm:$0xff] %vm544_vm1, %v2138_v59  ;;  %v2139_v6 = vadd.f32 %v2105_v29, %v1273_v52  ;;  %v2236_v4 = vmax.f32 %v6328_v28, 1.0 }
 0x2d3   : > { %v6332_v54 = vld [vmem:[#allocation2 + $0xe8] sm:$0xff] }
 0x2d4   : > { %2172 = vst.msk [vmem:[#allocation2 + $0xf8] sm:$0xff] %vm544_vm1, %v2139_v6  ;;  %2382 = vperm.xlu0 %5061, %v2236_v4   ;;  %v2237_v39 = vmax.f32 %v6332_v54, 1.0 }
 0x2d6   : > { %2387 = vperm.xlu1 %5062, %v2237_v39  }
 0x2d9   : > { %v6336_v37 = vld [vmem:[#allocation2 + $0xf0] sm:$0xff] }
 0x2da   : > { %v2238_v55 = vmax.f32 %v6336_v37, 1.0 }
 0x2db   : > { %v6339_v20 = vld [vmem:[#allocation2 + $0xf8] sm:$0xff] }
 0x2dc   : > { %2392 = vperm.xlu0 %5061, %v2238_v55   ;;  %v2239_v9 = vmax.f32 %v6339_v20, 1.0 }
 0x2de   : > { %2397 = vperm.xlu1 %5062, %v2239_v9  }
 0x2e3   : > { %v2243_v10 = vpop.permute.xlu0 %2242 }
 0x2e4   : > { %5215 = vrcp.f32 %v2243_v10 }
 0x2e5   : > { %v2248_v23 = vpop.permute.xlu1 %2247 }
 0x2e6   : > { %5217 = vrcp.f32 %v2248_v23 }
 0x2eb   : > { %v2253_v57 = vpop.permute.xlu1 %2252 }
 0x2ec   : > { %5219 = vrcp.f32 %v2253_v57 }
 0x2ee   : > { %v5216_v49 = vpop.eup %5215 }
 0x2ef   : > { %v2258_v19 = vpop.permute.xlu1 %2257  ;;  %v2401_v17 = vmul.f32 %v5216_v49, %v6142_v51 }
 0x2f0   : > { %v5218_v38 = vpop.eup %5217  ;;  %5221 = vrcp.f32 %v2258_v19 }
 0x2f1   : > { %v2403_v26 = vmul.f32 %v5218_v38, %v6146_v2 }
 0x2f3   : > { %v2263_v15 = vpop.permute.xlu0 %2262  ;;  %v2464_v60 = vpack.c.bf16 %v2403_v26, %v2401_v17 }
 0x2f4   : > { %5223 = vrcp.f32 %v2263_v15 }
 0x2f5   : > { %v2268_v31 = vpop.permute.xlu1 %2267  ;;  %4861 = vmatprep.mubr.msk.bf16.mxu1 %vm824_vm0, %v2464_v60 }
 0x2f6   : > { %5225 = vrcp.f32 %v2268_v31  ;;  %v5220_v5 = vpop.eup %5219 }
 0x2f7   : > { %v2405_v58 = vmul.f32 %v5220_v5, %v6156_v11 }
 0x2fa   : > { %v5222_v8 = vpop.eup %5221 }
 0x2fb   : > { %v2407_v51 = vmul.f32 %v5222_v8, %v6160_v40  ;;  %v2273_v2 = vpop.permute.xlu0 %2272 }
 0x2fc   : > { %5227 = vrcp.f32 %v2273_v2 }
 0x2fd   : > { %v2465_v3 = vpack.c.bf16 %v2407_v51, %v2405_v58  ;;  %v2278_v46 = vpop.permute.xlu1 %2277 }
 0x2fe   : > { %v5224_v56 = vpop.eup %5223  ;;  %5229 = vrcp.f32 %v2278_v46 }
 0x2ff   : > { %4862 = vmatmul.mubr.msk.bf16.vlgmr.msra.gmra.mrb[80].mxu1 %vm824_vm0, %v2465_v3  ;;  %v2409_v33 = vmul.f32 %v5224_v56, %v6170_v7 }
 0x300   : > { %v5226_v16 = vpop.eup %5225  ;;  %4894 = vmatpush3.bf16.msra.mxu1 %v5195_v50 }
 0x301   : > { %v2411_v11 = vmul.f32 %v5226_v16, %v6174_v12  ;;  %4895 = vmatprep.subr.bf16.mxu1 %v5196_v32 }
 0x303   : > { %v2283_v40 = vpop.permute.xlu0 %2282  ;;  %v2466_v18 = vpack.c.bf16 %v2411_v11, %v2409_v33 }
 0x304   : > { %5231 = vrcp.f32 %v2283_v40  ;;  %4896 = vmatpush3.bf16.msra.mxu1 %v5196_v32 }
 0x305   : > { %v2288_v63 = vpop.permute.xlu1 %2287  ;;  %4865 = vmatprep.mubr.msk.bf16.mxu1 %vm824_vm0, %v2466_v18 }
 0x306   : > { %v5228_v30 = vpop.eup %5227  ;;  %5233 = vrcp.f32 %v2288_v63 }
 0x307   : > { %v2413_v59 = vmul.f32 %v5228_v30, %v6187_v62 }
 0x308   : > { %v5230_v52 = vpop.eup %5229 }
 0x309   : > { %v2415_v29 = vmul.f32 %v5230_v52, %v6194_v22 }
 0x30b   : > { %v2293_v6 = vpop.permute.xlu0 %2292  ;;  %v2467_v4 = vpack.c.bf16 %v2415_v29, %v2413_v59 }
 0x30c   : > { %5235 = vrcp.f32 %v2293_v6 }
 0x30d   : > { %v2298_v7 = vpop.permute.xlu1 %2297  ;;  %4866 = vmatmul.mubr.msk.bf16.gmra.mrb[84].mxu1 %vm824_vm0, %v2467_v4 }
 0x30e   : > { %v5232_v12 = vpop.eup %5231  ;;  %5237 = vrcp.f32 %v2298_v7 }
 0x30f   : > { %v2417_v55 = vmul.f32 %v5232_v12, %v6204_v21 }
 0x310   : > { %v5234_v39 = vpop.eup %5233 }
 0x311   : > { %v2419_v9 = vmul.f32 %v5234_v39, %v6208_v13 }
 0x313   : > { %v2303_v10 = vpop.permute.xlu0 %2302  ;;  %v2468_v23 = vpack.c.bf16 %v2419_v9, %v2417_v55 }
 0x314   : > { %5239 = vrcp.f32 %v2303_v10 }
 0x315   : > { %v2308_v57 = vpop.permute.xlu1 %2307  ;;  %4869 = vmatprep.mubr.msk.bf16.mxu1 %vm824_vm0, %v2468_v23 }
 0x316   : > { %v5236_v62 = vpop.eup %5235  ;;  %5241 = vrcp.f32 %v2308_v57 }
 0x317   : > { %v2421_v50 = vmul.f32 %v5236_v62, %v6218_v34 }
 0x318   : > { %v5238_v22 = vpop.eup %5237 }
 0x319   : > { %v2423_v49 = vmul.f32 %v5238_v22, %v6222_v53 }
 0x31b   : > { %v2313_v19 = vpop.permute.xlu0 %2312  ;;  %v2469_v38 = vpack.c.bf16 %v2423_v49, %v2421_v50 }
 0x31c   : > { %5243 = vrcp.f32 %v2313_v19 }
 0x31d   : > { %v2318_v17 = vpop.permute.xlu1 %2317  ;;  %4870 = vmatmul.mubr.msk.bf16.gmra.mrb[88].mxu1 %vm824_vm0, %v2469_v38 }
 0x31e   : > { %v5240_v21 = vpop.eup %5239  ;;  %5245 = vrcp.f32 %v2318_v17 }
 0x31f   : > { %v2425_v26 = vmul.f32 %v5240_v21, %v6232_v24  ;;  %v5213_v24 = vld [vmem:[%s7192_s8] sm:$0xff]  }
 0x320   : > { %v5242_v13 = vpop.eup %5241  ;;  %4929 = vmatprep.subr.bf16.mxu0 %v5213_v24 }
 0x321   : > { %v2427_v15 = vmul.f32 %v5242_v13, %v6236_v42  ;;  %4930 = vmatpush3.bf16.msra.mxu0 %v5213_v24  ;;  %v5208_v24 = vld [vmem:[%s6356_s28 + $0x58] sm:$0xff]  }
 0x323   : > { %v2323_v60 = vpop.permute.xlu0 %2322  ;;  %v2470_v31 = vpack.c.bf16 %v2427_v15, %v2425_v26 }
 0x324   : > { %5247 = vrcp.f32 %v2323_v60 }
 0x325   : > { %v2328_v5 = vpop.permute.xlu1 %2327  ;;  %4873 = vmatprep.mubr.msk.bf16.mxu1 %vm824_vm0, %v2470_v31 }
 0x326   : > { %v5244_v34 = vpop.eup %5243  ;;  %5249 = vrcp.f32 %v2328_v5  ;;  %v5197_v5 = vld [vmem:[%s6356_s28] sm:$0xff]  }
 0x327   : > { %v2429_v8 = vmul.f32 %v5244_v34, %v6246_v47 }
 0x328   : > { %v5246_v53 = vpop.eup %5245 }
 0x329   : > { %v2431_v58 = vmul.f32 %v5246_v53, %v6250_v48  ;;  %v5200_v53 = vld [vmem:[%s6356_s28 + $0x18] sm:$0xff]  }
 0x32b   : > { %v2333_v51 = vpop.permute.xlu0 %2332  ;;  %v2471_v2 = vpack.c.bf16 %v2431_v58, %v2429_v8  ;;  %v5203_v8 = vld [vmem:[%s6356_s28 + $0x30] sm:$0xff]   ;;  %v5204_v58 = vld [vmem:[%s6356_s28 + $0x38] sm:$0xff]  }
 0x32c   : > { %5251 = vrcp.f32 %v2333_v51  ;;  %v5205_v51 = vld [vmem:[%s6356_s28 + $0x40] sm:$0xff]  }
 0x32d   : > { %v2338_v3 = vpop.permute.xlu1 %2337  ;;  %4874 = vmatmul.mubr.msk.bf16.gmra.mrb[92].mxu1 %vm824_vm0, %v2471_v2  ;;  %v5206_v2 = vld [vmem:[%s6356_s28 + $0x48] sm:$0xff]  }
 0x32e   : > { %v5248_v42 = vpop.eup %5247  ;;  %5253 = vrcp.f32 %v2338_v3  ;;  %v5207_v3 = vld [vmem:[%s6356_s28 + $0x50] sm:$0xff]  }
 0x32f   : > { %v2433_v32 = vmul.f32 %v5248_v42, %v6260_v0  ;;  %v5209_v42 = vld [vmem:[%s6356_s28 + $0x60] sm:$0xff]  }
 0x330   : > { %v5250_v46 = vpop.eup %5249 }
 0x331   : > { %v2435_v47 = vmul.f32 %v5250_v46, %v6264_v41  ;;  %v5210_v46 = vld [vmem:[%s6356_s28 + $0x68] sm:$0xff]  }
 0x333   : > { %v2343_v48 = vpop.permute.xlu0 %2342  ;;  %v2472_v56 = vpack.c.bf16 %v2435_v47, %v2433_v32  ;;  %v5211_v32 = vld [vmem:[%s6356_s28 + $0x70] sm:$0xff]   ;;  %v5212_v47 = vld [vmem:[%s6356_s28 + $0x78] sm:$0xff]  }
 0x334   : > { %5255 = vrcp.f32 %v2343_v48  ;;  %v5214_v48 = vld [vmem:[%s7192_s8 + $0x8] sm:$0xff]  }
 0x335   : > { %v2348_v16 = vpop.permute.xlu1 %2347  ;;  %4877 = vmatprep.mubr.msk.bf16.mxu1 %vm824_vm0, %v2472_v56  ;;  %4931 = vmatprep.subr.bf16.mxu0 %v5214_v48 }
 0x336   : > { %v5252_v33 = vpop.eup %5251  ;;  %5257 = vrcp.f32 %v2348_v16  ;;  %4932 = vmatpush3.bf16.msra.mxu0 %v5214_v48  ;;  %v6448_v16 = vld [vmem:[%s7191_s7] ss:$0 sm:$0xff] }
 0x337   : > { %v2437_v40 = vmul.f32 %v5252_v33, %v6274_v1 }
 0x338   : > { %v5254_v11 = vpop.eup %5253 }
 0x339   : > { %v2439_v18 = vmul.f32 %v5254_v11, %v6278_v36 }
 0x33b   : > { %v2353_v63 = vpop.permute.xlu0 %2352  ;;  %v2473_v30 = vpack.c.bf16 %v2439_v18, %v2437_v40 }
 0x33c   : > { %5259 = vrcp.f32 %v2353_v63 }
 0x33d   : > { %v2358_v52 = vpop.permute.xlu1 %2357  ;;  %4878 = vmatmul.mubr.msk.bf16.gmra.mrb[96].mxu1 %vm824_vm0, %v2473_v30 }
 0x33e   : > { %v5256_v0 = vpop.eup %5255  ;;  %5261 = vrcp.f32 %v2358_v52 }
 0x33f   : > { %v2441_v59 = vmul.f32 %v5256_v0, %v6288_v44 }
 0x340   : > { %v5258_v41 = vpop.eup %5257 }
 0x341   : > { %v2443_v29 = vmul.f32 %v5258_v41, %v6292_v61 }
 0x343   : > { %v2363_v6 = vpop.permute.xlu0 %2362  ;;  %v2474_v4 = vpack.c.bf16 %v2443_v29, %v2441_v59 }
 0x344   : > { %5263 = vrcp.f32 %v2363_v6 }
 0x345   : > { %v2368_v7 = vpop.permute.xlu1 %2367  ;;  %4881 = vmatprep.mubr.msk.bf16.mxu1 %vm824_vm0, %v2474_v4 }
 0x346   : > { %v5260_v1 = vpop.eup %5259  ;;  %5265 = vrcp.f32 %v2368_v7 }
 0x347   : > { %v2445_v12 = vmul.f32 %v5260_v1, %v6298_v14 }
 0x348   : > { %v5262_v36 = vpop.eup %5261 }
 0x349   : > { %v2447_v39 = vmul.f32 %v5262_v36, %v6302_v45 }
 0x34b   : > { %v2373_v55 = vpop.permute.xlu0 %2372  ;;  %v2475_v9 = vpack.c.bf16 %v2447_v39, %v2445_v12 }
 0x34c   : > { %5267 = vrcp.f32 %v2373_v55 }
 0x34d   : > { %v2378_v10 = vpop.permute.xlu1 %2377  ;;  %4882 = vmatmul.mubr.msk.bf16.gmra.mrb[100].mxu1 %vm824_vm0, %v2475_v9 }
 0x34e   : > { %v5264_v44 = vpop.eup %5263  ;;  %5269 = vrcp.f32 %v2378_v10 }
 0x34f   : > { %v2449_v23 = vmul.f32 %v5264_v44, %v6308_v25 }
 0x350   : > { %v5266_v61 = vpop.eup %5265 }
 0x351   : > { %v2451_v57 = vmul.f32 %v5266_v61, %v6312_v35 }
 0x353   : > { %v2383_v62 = vpop.permute.xlu0 %2382  ;;  %v2476_v22 = vpack.c.bf16 %v2451_v57, %v2449_v23 }
 0x354   : > { %5271 = vrcp.f32 %v2383_v62 }
 0x355   : > { %v2388_v50 = vpop.permute.xlu1 %2387  ;;  %4885 = vmatprep.mubr.msk.bf16.mxu1 %vm824_vm0, %v2476_v22 }
 0x356   : > { %v5268_v14 = vpop.eup %5267  ;;  %5273 = vrcp.f32 %v2388_v50 }
 0x357   : > { %v2453_v49 = vmul.f32 %v5268_v14, %v6318_v43 }
 0x358   : > { %v5270_v45 = vpop.eup %5269 }
 0x359   : > { %v2455_v19 = vmul.f32 %v5270_v45, %v6322_v27 }
 0x35b   : > { %v2393_v38 = vpop.permute.xlu0 %2392  ;;  %v2477_v17 = vpack.c.bf16 %v2455_v19, %v2453_v49 }
 0x35c   : > { %5275 = vrcp.f32 %v2393_v38 }
 0x35d   : > { %v2398_v25 = vpop.permute.xlu1 %2397  ;;  %4886 = vmatmul.mubr.msk.bf16.gmra.mrb[104].mxu1 %vm824_vm0, %v2477_v17 }
 0x35e   : > { %v5272_v35 = vpop.eup %5271  ;;  %5277 = vrcp.f32 %v2398_v25 }
 0x35f   : > { %v2457_v13 = vmul.f32 %v5272_v35, %v6328_v28  ;;  %v5198_v28 = vld [vmem:[%s6356_s28 + $0x8] sm:$0xff]  }
 0x360   : > { %v5274_v21 = vpop.eup %5273 }
 0x361   : > { %v2459_v26 = vmul.f32 %v5274_v21, %v6332_v54  ;;  %v5199_v54 = vld [vmem:[%s6356_s28 + $0x10] sm:$0xff]  }
 0x363   : > { %v2478_v43 = vpack.c.bf16 %v2459_v26, %v2457_v13 }
 0x365   : > { %4889 = vmatprep.mubr.msk.bf16.mxu1 %vm824_vm0, %v2478_v43 }
 0x366   : > { %v5276_v27 = vpop.eup %5275 }
 0x367   : > { %v2461_v60 = vmul.f32 %v5276_v27, %v6336_v37  ;;  %v5201_v37 = vld [vmem:[%s6356_s28 + $0x20] sm:$0xff]  }
 0x368   : > { %v5278_v15 = vpop.eup %5277 }
 0x369   : > { %v2463_v31 = vmul.f32 %v5278_v15, %v6339_v20  ;;  %v5202_v20 = vld [vmem:[%s6356_s28 + $0x28] sm:$0xff]   ;;  %s6511_s28 = scalar_lea.vmem %s7196_s12, %s4200_s25 }
 0x36b   : > { %v2479_v34 = vpack.c.bf16 %v2463_v31, %v2461_v60 }
 0x36d   : > { %4890 = vmatmul.mubr.msk.bf16.gmra.mrb[108].mxu1 %vm824_vm0, %v2479_v34 }
 0x36e   : > { %4897 = vmatprep.mubr.msk.bf16.mxu1 %vm824_vm0, %v5197_v5 }
 0x375   : > { %4898 = vmatmul.mubr.msk.bf16.vlgmr.msra.gmra.mrb[80].mxu1 %vm824_vm0, %v5198_v28 }
 0x376   : > { %4901 = vmatprep.mubr.msk.bf16.mxu1 %vm824_vm0, %v5199_v54 }
 0x37d   : > { %4902 = vmatmul.mubr.msk.bf16.gmra.mrb[84].mxu1 %vm824_vm0, %v5200_v53 }
 0x37e   : > { %4905 = vmatprep.mubr.msk.bf16.mxu1 %vm824_vm0, %v5201_v37 }
 0x385   : > { %4906 = vmatmul.mubr.msk.bf16.gmra.mrb[88].mxu1 %vm824_vm0, %v5202_v20 }
 0x386   : > { %4909 = vmatprep.mubr.msk.bf16.mxu1 %vm824_vm0, %v5203_v8 }
 0x38d   : > { %4910 = vmatmul.mubr.msk.bf16.gmra.mrb[92].mxu1 %vm824_vm0, %v5204_v58 }
 0x38e   : > { %4913 = vmatprep.mubr.msk.bf16.mxu1 %vm824_vm0, %v5205_v51 }
 0x395   : > { %4914 = vmatmul.mubr.msk.bf16.gmra.mrb[96].mxu1 %vm824_vm0, %v5206_v2 }
 0x396   : > { %4917 = vmatprep.mubr.msk.bf16.mxu1 %vm824_vm0, %v5207_v3 }
 0x39d   : > { %4918 = vmatmul.mubr.msk.bf16.gmra.mrb[100].mxu1 %vm824_vm0, %v5208_v24 }
 0x39e   : > { %4921 = vmatprep.mubr.msk.bf16.mxu1 %vm824_vm0, %v5209_v42 }
 0x3a5   : > { %4922 = vmatmul.mubr.msk.bf16.gmra.mrb[104].mxu1 %vm824_vm0, %v5210_v46 }
 0x3a6   : > { %4925 = vmatprep.mubr.msk.bf16.mxu1 %vm824_vm0, %v5211_v32 }
 0x3ad   : > { %4926 = vmatmul.mubr.msk.bf16.gmra.mrb[108].mxu1 %vm824_vm0, %v5212_v47 }
 0x448   : > { %v4899_v56 = vpop.f32.mrb[80].mxu1 }
 0x449   : > { %v2915_v33 = vpop.f32.mrb[81].mxu1  ;;  %v3051_v40 = vadd.f32 %v4899_v56, %v6448_v16 }
 0x44a   : > { %v4900_v11 = vpop.f32.mrb[82].mxu1  ;;  %v3049_v30 = vadd.f32 %v6448_v16, %v2915_v33 }
 0x44b   : > { %v3052_v18 = vadd.f32 %v4900_v11, %v6448_v16  ;;  %v2918_v63 = vpop.f32.mrb[83].mxu1 }
 0x44c   : > { %v3050_v52 = vadd.f32 %v6448_v16, %v2918_v63 }
 0x44d   : > { %v3082_v0 = vpack.c.bf16 %v3052_v18, %v3051_v40 }
 0x44e   : > { %v3081_v41 = vpack.c.bf16 %v3050_v52, %v3049_v30 }
 0x450   : > { %v4903_v59 = vpop.f32.mrb[84].mxu1  ;;  %4933 = vmatprep.mubr.msk.bf16.mxu0 %vm824_vm0, %v3081_v41 }
 0x451   : > { %v2931_v29 = vpop.f32.mrb[85].mxu1  ;;  %4934 = vmatmul.mubr.msk.bf16.vlgmr.msra.gmra.mrb[112].mxu0 %vm824_vm0, %v3082_v0  ;;  %v3055_v4 = vadd.f32 %v4903_v59, %v6448_v16 }
 0x452   : > { %v4904_v6 = vpop.f32.mrb[86].mxu1  ;;  %v3053_v36 = vadd.f32 %v6448_v16, %v2931_v29 }
 0x453   : > { %v3056_v7 = vadd.f32 %v4904_v6, %v6448_v16  ;;  %v2934_v1 = vpop.f32.mrb[87].mxu1 }
 0x454   : > { %v3054_v12 = vadd.f32 %v6448_v16, %v2934_v1 }
 0x455   : > { %v3084_v39 = vpack.c.bf16 %v3056_v7, %v3055_v4 }
 0x456   : > { %v3083_v55 = vpack.c.bf16 %v3054_v12, %v3053_v36  ;;  %v6501_v12 = vld [vmem:[%s7193_s9] ss:$0 sm:$0xff] }
 0x458   : > { %v4907_v9 = vpop.f32.mrb[88].mxu1  ;;  %4937 = vmatprep.mubr.msk.bf16.mxu0 %vm824_vm0, %v3083_v55 }
 0x459   : > { %v2947_v10 = vpop.f32.mrb[89].mxu1  ;;  %4938 = vmatmul.mubr.msk.bf16.gmra.mrb[116].mxu0 %vm824_vm0, %v3084_v39  ;;  %v3059_v61 = vadd.f32 %v4907_v9, %v6448_v16 }
 0x45a   : > { %v4908_v44 = vpop.f32.mrb[90].mxu1  ;;  %v3057_v62 = vadd.f32 %v6448_v16, %v2947_v10 }
 0x45b   : > { %v3060_v23 = vadd.f32 %v4908_v44, %v6448_v16  ;;  %v2950_v57 = vpop.f32.mrb[91].mxu1 }
 0x45c   : > { %v3058_v22 = vadd.f32 %v6448_v16, %v2950_v57 }
 0x45d   : > { %v3086_v50 = vpack.c.bf16 %v3060_v23, %v3059_v61 }
 0x45e   : > { %v3085_v14 = vpack.c.bf16 %v3058_v22, %v3057_v62 }
 0x460   : > { %v4911_v45 = vpop.f32.mrb[92].mxu1  ;;  %4941 = vmatprep.mubr.msk.bf16.mxu0 %vm824_vm0, %v3085_v14 }
 0x461   : > { %v2963_v49 = vpop.f32.mrb[93].mxu1  ;;  %4942 = vmatmul.mubr.msk.bf16.gmra.mrb[120].mxu0 %vm824_vm0, %v3086_v50  ;;  %v3063_v38 = vadd.f32 %v4911_v45, %v6448_v16 }
 0x462   : > { %v4912_v19 = vpop.f32.mrb[94].mxu1  ;;  %v3061_v35 = vadd.f32 %v6448_v16, %v2963_v49 }
 0x463   : > { %v3064_v17 = vadd.f32 %v4912_v19, %v6448_v16  ;;  %v2966_v25 = vpop.f32.mrb[95].mxu1 }
 0x464   : > { %v3062_v21 = vadd.f32 %v6448_v16, %v2966_v25 }
 0x465   : > { %v3088_v13 = vpack.c.bf16 %v3064_v17, %v3063_v38 }
 0x466   : > { %v3087_v26 = vpack.c.bf16 %v3062_v21, %v3061_v35 }
 0x468   : > { %v4915_v43 = vpop.f32.mrb[96].mxu1  ;;  %4945 = vmatprep.mubr.msk.bf16.mxu0 %vm824_vm0, %v3087_v26 }
 0x469   : > { %v2979_v27 = vpop.f32.mrb[97].mxu1  ;;  %4946 = vmatmul.mubr.msk.bf16.gmra.mrb[124].mxu0 %vm824_vm0, %v3088_v13  ;;  %v3067_v60 = vadd.f32 %v4915_v43, %v6448_v16 }
 0x46a   : > { %v4916_v15 = vpop.f32.mrb[98].mxu1  ;;  %v3065_v34 = vadd.f32 %v6448_v16, %v2979_v27 }
 0x46b   : > { %v3068_v31 = vadd.f32 %v4916_v15, %v6448_v16  ;;  %v2982_v5 = vpop.f32.mrb[99].mxu1 }
 0x46c   : > { %v3066_v28 = vadd.f32 %v6448_v16, %v2982_v5 }
 0x46d   : > { %v3090_v54 = vpack.c.bf16 %v3068_v31, %v3067_v60 }
 0x46e   : > { %v3089_v53 = vpack.c.bf16 %v3066_v28, %v3065_v34 }
 0x470   : > { %v4919_v37 = vpop.f32.mrb[100].mxu1  ;;  %4949 = vmatprep.mubr.msk.bf16.mxu0 %vm824_vm0, %v3089_v53 }
 0x471   : > { %v2995_v20 = vpop.f32.mrb[101].mxu1  ;;  %4950 = vmatmul.mubr.msk.bf16.gmra.mrb[128].mxu0 %vm824_vm0, %v3090_v54  ;;  %v3071_v58 = vadd.f32 %v4919_v37, %v6448_v16 }
 0x472   : > { %v4920_v8 = vpop.f32.mrb[102].mxu1  ;;  %v3069_v3 = vadd.f32 %v6448_v16, %v2995_v20 }
 0x473   : > { %v3072_v51 = vadd.f32 %v4920_v8, %v6448_v16  ;;  %v2998_v2 = vpop.f32.mrb[103].mxu1 }
 0x474   : > { %v3070_v24 = vadd.f32 %v6448_v16, %v2998_v2 }
 0x475   : > { %v3092_v42 = vpack.c.bf16 %v3072_v51, %v3071_v58 }
 0x476   : > { %v3091_v46 = vpack.c.bf16 %v3070_v24, %v3069_v3 }
 0x478   : > { %v4923_v32 = vpop.f32.mrb[104].mxu1  ;;  %4953 = vmatprep.mubr.msk.bf16.mxu0 %vm824_vm0, %v3091_v46 }
 0x479   : > { %v3011_v47 = vpop.f32.mrb[105].mxu1  ;;  %4954 = vmatmul.mubr.msk.bf16.gmra.mrb[132].mxu0 %vm824_vm0, %v3092_v42  ;;  %v3075_v56 = vadd.f32 %v4923_v32, %v6448_v16 }
 0x47a   : > { %v4924_v48 = vpop.f32.mrb[106].mxu1  ;;  %v3073_v40 = vadd.f32 %v6448_v16, %v3011_v47 }
 0x47b   : > { %v3076_v33 = vadd.f32 %v4924_v48, %v6448_v16  ;;  %v3014_v11 = vpop.f32.mrb[107].mxu1 }
 0x47c   : > { %v3074_v18 = vadd.f32 %v6448_v16, %v3014_v11 }
 0x47d   : > { %v3094_v63 = vpack.c.bf16 %v3076_v33, %v3075_v56 }
 0x47e   : > { %v3093_v30 = vpack.c.bf16 %v3074_v18, %v3073_v40 }
 0x480   : > { %v4927_v52 = vpop.f32.mrb[108].mxu1  ;;  %4957 = vmatprep.mubr.msk.bf16.mxu0 %vm824_vm0, %v3093_v30 }
 0x481   : > { %v3027_v0 = vpop.f32.mrb[109].mxu1  ;;  %4958 = vmatmul.mubr.msk.bf16.gmra.mrb[136].mxu0 %vm824_vm0, %v3094_v63  ;;  %v3079_v59 = vadd.f32 %v4927_v52, %v6448_v16 }
 0x482   : > { %v4928_v41 = vpop.f32.mrb[110].mxu1  ;;  %v3077_v4 = vadd.f32 %v6448_v16, %v3027_v0 }
 0x483   : > { %v3080_v29 = vadd.f32 %v4928_v41, %v6448_v16  ;;  %v3030_v6 = vpop.f32.mrb[111].mxu1 }
 0x484   : > { %v3078_v7 = vadd.f32 %v6448_v16, %v3030_v6 }
 0x485   : > { %v3096_v1 = vpack.c.bf16 %v3080_v29, %v3079_v59 }
 0x486   : > { %v3095_v36 = vpack.c.bf16 %v3078_v7, %v3077_v4 }
 0x488   : > { %4961 = vmatprep.mubr.msk.bf16.mxu0 %vm824_vm0, %v3095_v36 }
 0x489   : > { %4962 = vmatmul.mubr.msk.bf16.gmra.mrb[140].mxu0 %vm824_vm0, %v3096_v1 }
 0x524   : > { %v4935_v39 = vpop.f32.mrb[112].mxu0 }
 0x525   : > { %v6504_v55 = vadd.f32 %v4935_v39, %v6501_v12  ;;  %v3202_v9 = vpop.f32.mrb[113].mxu0 }
 0x526   : > { %v6514_v16 = vadd.f32 %v6501_v12, %v3202_v9  ;;  %v4936_v10 = vpop.f32.mrb[114].mxu0 }
 0x527   : > { %v4447_v44 = vpack.c.bf16 %v6504_v55, %v6504_v55  ;;  %v6519_v61 = vadd.f32 %v4936_v10, %v6501_v12  ;;  %v3205_v23 = vpop.f32.mrb[115].mxu0  ;;  %v3498_v57 = vsel %vm824_vm0, %v6504_v55, 0.0 }
 0x528   : > { %v4445_v62 = vpack.c.bf16 %v6514_v16, %v6514_v16  ;;  %v6526_v22 = vadd.f32 %v6501_v12, %v3205_v23  ;;  %3499 = vadd.xlane.f32.xlu0 %v3498_v57  ;;  %v3492_v49 = vsel %vm824_vm0, %v6514_v16, 0.0 }
 0x529   : > { %3460 = vst.msk [vmem:[%s6511_s28 + $0x8] sm:$0xf] %vm3457_vm2, %v4447_v44  ;;  %v4448_v50 = vpack.c.bf16 %v6519_v61, %v6519_v61  ;;  %v3501_v43 = vsel %vm824_vm0, %v6519_v61, 0.0 }
 0x52a   : > { %3458 = vst.msk [vmem:[%s6511_s28] sm:$0xf] %vm3457_vm2, %v4445_v62  ;;  %v4446_v14 = vpack.c.bf16 %v6526_v22, %v6526_v22  ;;  %v3495_v45 = vsel %vm824_vm0, %v6526_v22, 0.0 }
 0x52b   : > { %3461 = vst.msk [vmem:[%s6511_s28 + $0xc] sm:$0xf] %vm3457_vm2, %v4448_v50  ;;  %3496 = vadd.xlane.f32.xlu1 %v3495_v45 }
 0x52c   : > { %3459 = vst.msk [vmem:[%s6511_s28 + $0x4] sm:$0xf] %vm3457_vm2, %v4446_v14  ;;  %3493 = vadd.xlane.f32.xlu0 %v3492_v49  ;;  %v4939_v19 = vpop.f32.mrb[116].mxu0 }
 0x52d   : > { %v6545_v38 = vadd.f32 %v4939_v19, %v6501_v12  ;;  %v3218_v17 = vpop.f32.mrb[117].mxu0 }
 0x52e   : > { %v6548_v25 = vadd.f32 %v6501_v12, %v3218_v17  ;;  %v4940_v35 = vpop.f32.mrb[118].mxu0 }
 0x52f   : > { %v4451_v21 = vpack.c.bf16 %v6545_v38, %v6545_v38  ;;  %v6553_v13 = vadd.f32 %v4940_v35, %v6501_v12  ;;  %v3221_v26 = vpop.f32.mrb[119].mxu0  ;;  %v3510_v34 = vsel %vm824_vm0, %v6545_v38, 0.0 }
 0x530   : > { %v4449_v27 = vpack.c.bf16 %v6548_v25, %v6548_v25  ;;  %v6560_v15 = vadd.f32 %v6501_v12, %v3221_v26  ;;  %3502 = vadd.xlane.f32.xlu0 %v3501_v43  ;;  %v3504_v3 = vsel %vm824_vm0, %v6548_v25, 0.0 }
 0x531   : > { %3464 = vst.msk [vmem:[%s6511_s28 + $0x18] sm:$0xf] %vm3457_vm2, %v4451_v21  ;;  %v4452_v60 = vpack.c.bf16 %v6553_v13, %v6553_v13  ;;  %v3513_v31 = vsel %vm824_vm0, %v6553_v13, 0.0 }
 0x532   : > { %3462 = vst.msk [vmem:[%s6511_s28 + $0x10] sm:$0xf] %vm3457_vm2, %v4449_v27  ;;  %v4450_v5 = vpack.c.bf16 %v6560_v15, %v6560_v15  ;;  %3514 = vadd.xlane.f32.xlu1 %v3513_v31  ;;  %v3507_v37 = vsel %vm824_vm0, %v6560_v15, 0.0 }
 0x533   : > { %3465 = vst.msk [vmem:[%s6511_s28 + $0x1c] sm:$0xf] %vm3457_vm2, %v4452_v60 }
 0x534   : > { %3463 = vst.msk [vmem:[%s6511_s28 + $0x14] sm:$0xf] %vm3457_vm2, %v4450_v5  ;;  %3511 = vadd.xlane.f32.xlu0 %v3510_v34  ;;  %v4943_v28 = vpop.f32.mrb[120].mxu0 }
 0x535   : > { %v6579_v54 = vadd.f32 %v4943_v28, %v6501_v12  ;;  %v3234_v53 = vpop.f32.mrb[121].mxu0 }
 0x536   : > { %v6584_v20 = vadd.f32 %v6501_v12, %v3234_v53  ;;  %3508 = vadd.xlane.f32.xlu1 %v3507_v37  ;;  %v4944_v8 = vpop.f32.mrb[122].mxu0 }
 0x537   : > { %v4455_v58 = vpack.c.bf16 %v6579_v54, %v6579_v54  ;;  %v6589_v51 = vadd.f32 %v4944_v8, %v6501_v12  ;;  %v3237_v2 = vpop.f32.mrb[123].mxu0  ;;  %v3522_v48 = vsel %vm824_vm0, %v6579_v54, 0.0 }
 0x538   : > { %v4453_v24 = vpack.c.bf16 %v6584_v20, %v6584_v20  ;;  %v6596_v42 = vadd.f32 %v6501_v12, %v3237_v2  ;;  %3505 = vadd.xlane.f32.xlu0 %v3504_v3  ;;  %v3516_v41 = vsel %vm824_vm0, %v6584_v20, 0.0 }
 0x539   : > { %3468 = vst.msk [vmem:[%s6511_s28 + $0x28] sm:$0xf] %vm3457_vm2, %v4455_v58  ;;  %v4456_v46 = vpack.c.bf16 %v6589_v51, %v6589_v51  ;;  %v3525_v32 = vsel %vm824_vm0, %v6589_v51, 0.0 }
 0x53a   : > { %3466 = vst.msk [vmem:[%s6511_s28 + $0x20] sm:$0xf] %vm3457_vm2, %v4453_v24  ;;  %v4454_v47 = vpack.c.bf16 %v6596_v42, %v6596_v42  ;;  %3526 = vadd.xlane.f32.xlu1 %v3525_v32  ;;  %v3519_v40 = vsel %vm824_vm0, %v6596_v42, 0.0 }
 0x53b   : > { %3469 = vst.msk [vmem:[%s6511_s28 + $0x2c] sm:$0xf] %vm3457_vm2, %v4456_v46 }
 0x53c   : > { %3467 = vst.msk [vmem:[%s6511_s28 + $0x24] sm:$0xf] %vm3457_vm2, %v4454_v47  ;;  %3523 = vadd.xlane.f32.xlu0 %v3522_v48  ;;  %v4947_v56 = vpop.f32.mrb[124].mxu0 }
 0x53d   : > { %v6615_v33 = vadd.f32 %v4947_v56, %v6501_v12  ;;  %v3250_v11 = vpop.f32.mrb[125].mxu0 }
 0x53e   : > { %v6620_v18 = vadd.f32 %v6501_v12, %v3250_v11  ;;  %3520 = vadd.xlane.f32.xlu1 %v3519_v40  ;;  %v4948_v63 = vpop.f32.mrb[126].mxu0 }
 0x53f   : > { %v4459_v30 = vpack.c.bf16 %v6615_v33, %v6615_v33  ;;  %v6625_v52 = vadd.f32 %v4948_v63, %v6501_v12  ;;  %v3253_v0 = vpop.f32.mrb[127].mxu0  ;;  %v3534_v1 = vsel %vm824_vm0, %v6615_v33, 0.0 }
 0x540   : > { %v4457_v59 = vpack.c.bf16 %v6620_v18, %v6620_v18  ;;  %v6632_v29 = vadd.f32 %v6501_v12, %v3253_v0  ;;  %3517 = vadd.xlane.f32.xlu0 %v3516_v41  ;;  %v3528_v14 = vsel %vm824_vm0, %v6620_v18, 0.0 }
 0x541   : > { %3472 = vst.msk [vmem:[%s6511_s28 + $0x38] sm:$0xf] %vm3457_vm2, %v4459_v30  ;;  %v4460_v6 = vpack.c.bf16 %v6625_v52, %v6625_v52  ;;  %v3537_v4 = vsel %vm824_vm0, %v6625_v52, 0.0 }
 0x542   : > { %3470 = vst.msk [vmem:[%s6511_s28 + $0x30] sm:$0xf] %vm3457_vm2, %v4457_v59  ;;  %v4458_v7 = vpack.c.bf16 %v6632_v29, %v6632_v29  ;;  %3538 = vadd.xlane.f32.xlu1 %v3537_v4  ;;  %v3531_v10 = vsel %vm824_vm0, %v6632_v29, 0.0 }
 0x543   : > { %3473 = vst.msk [vmem:[%s6511_s28 + $0x3c] sm:$0xf] %vm3457_vm2, %v4460_v6 }
 0x544   : > { %3471 = vst.msk [vmem:[%s6511_s28 + $0x34] sm:$0xf] %vm3457_vm2, %v4458_v7  ;;  %3535 = vadd.xlane.f32.xlu0 %v3534_v1  ;;  %v4951_v36 = vpop.f32.mrb[128].mxu0 }
 0x545   : > { %v6651_v39 = vadd.f32 %v4951_v36, %v6501_v12  ;;  %v3266_v9 = vpop.f32.mrb[129].mxu0 }
 0x546   : > { %v6656_v44 = vadd.f32 %v6501_v12, %v3266_v9  ;;  %3532 = vadd.xlane.f32.xlu1 %v3531_v10  ;;  %v4952_v23 = vpop.f32.mrb[130].mxu0 }
 0x547   : > { %v4463_v57 = vpack.c.bf16 %v6651_v39, %v6651_v39  ;;  %v6661_v62 = vadd.f32 %v4952_v23, %v6501_v12  ;;  %v3269_v50 = vpop.f32.mrb[131].mxu0  ;;  %v3546_v21 = vsel %vm824_vm0, %v6651_v39, 0.0 }
 0x548   : > { %v4461_v45 = vpack.c.bf16 %v6656_v44, %v6656_v44  ;;  %v6668_v49 = vadd.f32 %v6501_v12, %v3269_v50  ;;  %3529 = vadd.xlane.f32.xlu0 %v3528_v14  ;;  %v3540_v37 = vsel %vm824_vm0, %v6656_v44, 0.0 }
 0x549   : > { %3476 = vst.msk [vmem:[%s6511_s28 + $0x48] sm:$0xf] %vm3457_vm2, %v4463_v57  ;;  %v4464_v19 = vpack.c.bf16 %v6661_v62, %v6661_v62  ;;  %v3549_v17 = vsel %vm824_vm0, %v6661_v62, 0.0 }
 0x54a   : > { %3474 = vst.msk [vmem:[%s6511_s28 + $0x40] sm:$0xf] %vm3457_vm2, %v4461_v45  ;;  %v4462_v35 = vpack.c.bf16 %v6668_v49, %v6668_v49  ;;  %3550 = vadd.xlane.f32.xlu1 %v3549_v17  ;;  %v3543_v60 = vsel %vm824_vm0, %v6668_v49, 0.0 }
 0x54b   : > { %3477 = vst.msk [vmem:[%s6511_s28 + $0x4c] sm:$0xf] %vm3457_vm2, %v4464_v19 }
 0x54c   : > { %3475 = vst.msk [vmem:[%s6511_s28 + $0x44] sm:$0xf] %vm3457_vm2, %v4462_v35  ;;  %3547 = vadd.xlane.f32.xlu0 %v3546_v21  ;;  %v4955_v26 = vpop.f32.mrb[132].mxu0 }
 0x54d   : > { %v6687_v43 = vadd.f32 %v4955_v26, %v6501_v12  ;;  %v3282_v27 = vpop.f32.mrb[133].mxu0 }
 0x54e   : > { %v6692_v31 = vadd.f32 %v6501_v12, %v3282_v27  ;;  %3544 = vadd.xlane.f32.xlu1 %v3543_v60  ;;  %v4956_v5 = vpop.f32.mrb[134].mxu0 }
 0x54f   : > { %v4467_v34 = vpack.c.bf16 %v6687_v43, %v6687_v43  ;;  %v6697_v28 = vadd.f32 %v4956_v5, %v6501_v12  ;;  %v3285_v53 = vpop.f32.mrb[135].mxu0  ;;  %v3558_v46 = vsel %vm824_vm0, %v6687_v43, 0.0 }
 0x550   : > { %v4465_v8 = vpack.c.bf16 %v6692_v31, %v6692_v31  ;;  %v6704_v58 = vadd.f32 %v6501_v12, %v3285_v53  ;;  %3541 = vadd.xlane.f32.xlu0 %v3540_v37  ;;  %v3552_v41 = vsel %vm824_vm0, %v6692_v31, 0.0 }
 0x551   : > { %3480 = vst.msk [vmem:[%s6511_s28 + $0x58] sm:$0xf] %vm3457_vm2, %v4467_v34  ;;  %v4468_v2 = vpack.c.bf16 %v6697_v28, %v6697_v28  ;;  %v3561_v3 = vsel %vm824_vm0, %v6697_v28, 0.0 }
 0x552   : > { %3478 = vst.msk [vmem:[%s6511_s28 + $0x50] sm:$0xf] %vm3457_vm2, %v4465_v8  ;;  %v4466_v24 = vpack.c.bf16 %v6704_v58, %v6704_v58  ;;  %3562 = vadd.xlane.f32.xlu1 %v3561_v3  ;;  %v3555_v56 = vsel %vm824_vm0, %v6704_v58, 0.0 }
 0x553   : > { %3481 = vst.msk [vmem:[%s6511_s28 + $0x5c] sm:$0xf] %vm3457_vm2, %v4468_v2 }
 0x554   : > { %3479 = vst.msk [vmem:[%s6511_s28 + $0x54] sm:$0xf] %vm3457_vm2, %v4466_v24  ;;  %3559 = vadd.xlane.f32.xlu0 %v3558_v46  ;;  %v4959_v32 = vpop.f32.mrb[136].mxu0 }
 0x555   : > { %v6723_v47 = vadd.f32 %v4959_v32, %v6501_v12  ;;  %v3298_v48 = vpop.f32.mrb[137].mxu0 }
 0x556   : > { %v6728_v11 = vadd.f32 %v6501_v12, %v3298_v48  ;;  %3556 = vadd.xlane.f32.xlu1 %v3555_v56  ;;  %v4960_v40 = vpop.f32.mrb[138].mxu0 }
 0x557   : > { %v4471_v63 = vpack.c.bf16 %v6723_v47, %v6723_v47  ;;  %v6733_v30 = vadd.f32 %v4960_v40, %v6501_v12  ;;  %v3301_v0 = vpop.f32.mrb[139].mxu0  ;;  %v3570_v36 = vsel %vm824_vm0, %v6723_v47, 0.0 }
 0x558   : > { %v4469_v59 = vpack.c.bf16 %v6728_v11, %v6728_v11  ;;  %v6740_v6 = vadd.f32 %v6501_v12, %v3301_v0  ;;  %3553 = vadd.xlane.f32.xlu0 %v3552_v41  ;;  %v3564_v35 = vsel %vm824_vm0, %v6728_v11, 0.0 }
 0x559   : > { %3484 = vst.msk [vmem:[%s6511_s28 + $0x68] sm:$0xf] %vm3457_vm2, %v4471_v63  ;;  %v4472_v4 = vpack.c.bf16 %v6733_v30, %v6733_v30  ;;  %v3573_v7 = vsel %vm824_vm0, %v6733_v30, 0.0 }
 0x55a   : > { %3482 = vst.msk [vmem:[%s6511_s28 + $0x60] sm:$0xf] %vm3457_vm2, %v4469_v59  ;;  %v4470_v1 = vpack.c.bf16 %v6740_v6, %v6740_v6  ;;  %3574 = vadd.xlane.f32.xlu1 %v3573_v7  ;;  %v3567_v57 = vsel %vm824_vm0, %v6740_v6, 0.0 }
 0x55b   : > { %3485 = vst.msk [vmem:[%s6511_s28 + $0x6c] sm:$0xf] %vm3457_vm2, %v4472_v4 }
 0x55c   : > { %3483 = vst.msk [vmem:[%s6511_s28 + $0x64] sm:$0xf] %vm3457_vm2, %v4470_v1  ;;  %3571 = vadd.xlane.f32.xlu0 %v3570_v36  ;;  %v4963_v9 = vpop.f32.mrb[140].mxu0 }
 0x55d   : > { %v6759_v10 = vadd.f32 %v4963_v9, %v6501_v12  ;;  %v3314_v23 = vpop.f32.mrb[141].mxu0 }
 0x55e   : > { %v6764_v50 = vadd.f32 %v6501_v12, %v3314_v23  ;;  %3568 = vadd.xlane.f32.xlu1 %v3567_v57  ;;  %v4964_v14 = vpop.f32.mrb[142].mxu0 }
 0x55f   : > { %v4475_v45 = vpack.c.bf16 %v6759_v10, %v6759_v10  ;;  %v6769_v19 = vadd.f32 %v4964_v14, %v6501_v12  ;;  %v3317_v17 = vpop.f32.mrb[143].mxu0  ;;  %v3582_v53 = vsel %vm824_vm0, %v6759_v10, 0.0 }
 0x560   : > { %v4473_v21 = vpack.c.bf16 %v6764_v50, %v6764_v50  ;;  %v6776_v26 = vadd.f32 %v6501_v12, %v3317_v17  ;;  %3565 = vadd.xlane.f32.xlu0 %v3564_v35  ;;  %v3576_v12 = vsel %vm824_vm0, %v6764_v50, 0.0 }
 0x561   : > { %3488 = vst.msk [vmem:[%s6511_s28 + $0x78] sm:$0xf] %vm3457_vm2, %v4475_v45  ;;  %v4476_v27 = vpack.c.bf16 %v6769_v19, %v6769_v19  ;;  %v3585_v34 = vsel %vm824_vm0, %v6769_v19, 0.0 }
 0x562   : > { %3486 = vst.msk [vmem:[%s6511_s28 + $0x70] sm:$0xf] %vm3457_vm2, %v4473_v21  ;;  %v4474_v60 = vpack.c.bf16 %v6776_v26, %v6776_v26  ;;  %v3579_v5 = vsel %vm824_vm0, %v6776_v26, 0.0 }
 0x563   : > { %3489 = vst.msk [vmem:[%s6511_s28 + $0x7c] sm:$0xf] %vm3457_vm2, %v4476_v27  ;;  %3580 = vadd.xlane.f32.xlu1 %v3579_v5 }
 0x564   : > { %3487 = vst.msk [vmem:[%s6511_s28 + $0x74] sm:$0xf] %vm3457_vm2, %v4474_v60  ;;  %3577 = vadd.xlane.f32.xlu0 %v3576_v12 }
 0x567   : > { %3586 = vadd.xlane.f32.xlu1 %v3585_v34 }
 0x568   : > { %3583 = vadd.xlane.f32.xlu0 %v3582_v53 }
 0x5b5   : > { %v3500_v37 = vpop.xlane.xlu0 %3499 }
 0x5b6   : > { %v3591_v8 = vmul.f32 0.03125, %v3500_v37 }
 0x5b8   : > { %v6799_v2 = vsub.f32 %v6504_v55, %v3591_v8  ;;  %v3497_v3 = vpop.xlane.xlu1 %3496 }
 0x5b9   : > { %v3494_v24 = vpop.xlane.xlu0 %3493  ;;  %v3590_v48 = vmul.f32 0.03125, %v3497_v3 }
 0x5ba   : > { %v3589_v46 = vmul.f32 0.03125, %v3494_v24  ;;  %v3655_v32 = vmul.f32 %v6799_v2, %v6799_v2 }
 0x5bb   : > { %v6810_v55 = vsub.f32 %v6526_v22, %v3590_v48 }
 0x5bc   : > { %v6804_v56 = vsub.f32 %v6514_v16, %v3589_v46  ;;  %v3691_v40 = vsel %vm824_vm0, %v3655_v32, 0.0 }
 0x5bd   : > { %v3503_v63 = vpop.xlane.xlu0 %3502  ;;  %3692 = vadd.xlane.f32.xlu0 %v3691_v40  ;;  %v3654_v22 = vmul.f32 %v6810_v55, %v6810_v55 }
 0x5be   : > { %v3592_v0 = vmul.f32 0.03125, %v3503_v63  ;;  %v3653_v41 = vmul.f32 %v6804_v56, %v6804_v56 }
 0x5bf   : > { %v3515_v59 = vpop.xlane.xlu1 %3514 }
 0x5c0   : > { %v6813_v4 = vsub.f32 %v6519_v61, %v3592_v0  ;;  %v3596_v7 = vmul.f32 0.03125, %v3515_v59  ;;  %v3685_v1 = vsel %vm824_vm0, %v3653_v41, 0.0 }
 0x5c1   : > { %v3512_v16 = vpop.xlane.xlu0 %3511  ;;  %3686 = vadd.xlane.f32.xlu0 %v3685_v1 }
 0x5c2   : > { %v3595_v36 = vmul.f32 0.03125, %v3512_v16  ;;  %v3656_v9 = vmul.f32 %v6813_v4, %v6813_v4  ;;  %v6819_v23 = vsub.f32 %v6553_v13, %v3596_v7  ;;  %v3688_v13 = vsel %vm824_vm0, %v3654_v22, 0.0 }
 0x5c3   : > { %v3509_v57 = vpop.xlane.xlu1 %3508 }
 0x5c4   : > { %v6824_v14 = vsub.f32 %v6545_v38, %v3595_v36  ;;  %v3594_v61 = vmul.f32 0.03125, %v3509_v57  ;;  %v3694_v45 = vsel %vm824_vm0, %v3656_v9, 0.0  ;;  %v3660_v60 = vmul.f32 %v6819_v23, %v6819_v23 }
 0x5c5   : > { %v3506_v17 = vpop.xlane.xlu0 %3505  ;;  %3695 = vadd.xlane.f32.xlu1 %v3694_v45 }
 0x5c6   : > { %v3593_v35 = vmul.f32 0.03125, %v3506_v17  ;;  %v3659_v21 = vmul.f32 %v6824_v14, %v6824_v14  ;;  %v6833_v5 = vsub.f32 %v6560_v15, %v3594_v61  ;;  %v3706_v15 = vsel %vm824_vm0, %v3660_v60, 0.0 }
 0x5c7   : > { %v3527_v27 = vpop.xlane.xlu1 %3526 }
 0x5c8   : > { %v6836_v38 = vsub.f32 %v6548_v25, %v3593_v35  ;;  %v3600_v12 = vmul.f32 0.03125, %v3527_v27  ;;  %v3703_v34 = vsel %vm824_vm0, %v3659_v21, 0.0  ;;  %v3658_v48 = vmul.f32 %v6833_v5, %v6833_v5 }
 0x5c9   : > { %v3524_v53 = vpop.xlane.xlu0 %3523  ;;  %3689 = vadd.xlane.f32.xlu1 %v3688_v13  ;;  %3704 = vadd.xlane.f32.xlu0 %v3703_v34 }
 0x5ca   : > { %v3599_v37 = vmul.f32 0.03125, %v3524_v53  ;;  %v3657_v8 = vmul.f32 %v6836_v38, %v6836_v38  ;;  %v6842_v3 = vsub.f32 %v6589_v51, %v3600_v12  ;;  %v3700_v1 = vsel %vm824_vm0, %v3658_v48, 0.0 }
 0x5cb   : > { %v3521_v24 = vpop.xlane.xlu1 %3520 }
 0x5cc   : > { %v6846_v46 = vsub.f32 %v6579_v54, %v3599_v37  ;;  %v3598_v25 = vmul.f32 0.03125, %v3521_v24  ;;  %v3697_v32 = vsel %vm824_vm0, %v3657_v8, 0.0  ;;  %v3664_v54 = vmul.f32 %v6842_v3, %v6842_v3 }
 0x5cd   : > { %v3518_v40 = vpop.xlane.xlu0 %3517  ;;  %3707 = vadd.xlane.f32.xlu1 %v3706_v15  ;;  %3698 = vadd.xlane.f32.xlu0 %v3697_v32 }
 0x5ce   : > { %v3597_v63 = vmul.f32 0.03125, %v3518_v40  ;;  %v3663_v51 = vmul.f32 %v6846_v46, %v6846_v46  ;;  %v6854_v0 = vsub.f32 %v6596_v42, %v3598_v25  ;;  %v3718_v22 = vsel %vm824_vm0, %v3664_v54, 0.0 }
 0x5cf   : > { %v3539_v41 = vpop.xlane.xlu1 %3538 }
 0x5d0   : > { %v6859_v59 = vsub.f32 %v6584_v20, %v3597_v63  ;;  %v3604_v7 = vmul.f32 0.03125, %v3539_v41  ;;  %v3715_v16 = vsel %vm824_vm0, %v3663_v51, 0.0  ;;  %v3662_v61 = vmul.f32 %v6854_v0, %v6854_v0 }
 0x5d1   : > { %v3536_v36 = vpop.xlane.xlu0 %3535  ;;  %3701 = vadd.xlane.f32.xlu1 %v3700_v1  ;;  %3716 = vadd.xlane.f32.xlu0 %v3715_v16 }
 0x5d2   : > { %v3603_v9 = vmul.f32 0.03125, %v3536_v36  ;;  %v3661_v42 = vmul.f32 %v6859_v59, %v6859_v59  ;;  %v6869_v20 = vsub.f32 %v6625_v52, %v3604_v7  ;;  %v3712_v52 = vsel %vm824_vm0, %v3662_v61, 0.0 }
 0x5d3   : > { %v3533_v57 = vpop.xlane.xlu1 %3532 }
 0x5d4   : > { %v6872_v45 = vsub.f32 %v6615_v33, %v3603_v9  ;;  %v3602_v17 = vmul.f32 0.03125, %v3533_v57  ;;  %v3709_v35 = vsel %vm824_vm0, %v3661_v42, 0.0  ;;  %v3668_v37 = vmul.f32 %v6869_v20, %v6869_v20 }
 0x5d5   : > { %v3530_v21 = vpop.xlane.xlu0 %3529  ;;  %3719 = vadd.xlane.f32.xlu1 %v3718_v22  ;;  %3710 = vadd.xlane.f32.xlu0 %v3709_v35 }
 0x5d6   : > { %v3601_v27 = vmul.f32 0.03125, %v3530_v21  ;;  %v3667_v13 = vmul.f32 %v6872_v45, %v6872_v45  ;;  %v6878_v60 = vsub.f32 %v6632_v29, %v3602_v17  ;;  %v3730_v40 = vsel %vm824_vm0, %v3668_v37, 0.0 }
 0x5d7   : > { %v3551_v12 = vpop.xlane.xlu1 %3550 }
 0x5d8   : > { %v6882_v34 = vsub.f32 %v6620_v18, %v3601_v27  ;;  %v3608_v33 = vmul.f32 0.03125, %v3551_v12  ;;  %v3727_v53 = vsel %vm824_vm0, %v3667_v13, 0.0  ;;  %v3666_v18 = vmul.f32 %v6878_v60, %v6878_v60 }
 0x5d9   : > { %v3548_v8 = vpop.xlane.xlu0 %3547  ;;  %3713 = vadd.xlane.f32.xlu1 %v3712_v52  ;;  %3728 = vadd.xlane.f32.xlu0 %v3727_v53 }
 0x5da   : > { %v3607_v24 = vmul.f32 0.03125, %v3548_v8  ;;  %v3665_v29 = vmul.f32 %v6882_v34, %v6882_v34  ;;  %v6890_v15 = vsub.f32 %v6661_v62, %v3608_v33  ;;  %v3724_v7 = vsel %vm824_vm0, %v3666_v18, 0.0 }
 0x5db   : > { %v3545_v25 = vpop.xlane.xlu1 %3544 }
 0x5dc   : > { %v6895_v32 = vsub.f32 %v6651_v39, %v3607_v24  ;;  %v3606_v48 = vmul.f32 0.03125, %v3545_v25  ;;  %v3721_v63 = vsel %vm824_vm0, %v3665_v29, 0.0  ;;  %v3672_v1 = vmul.f32 %v6890_v15, %v6890_v15 }
 0x5dd   : > { %v3542_v51 = vpop.xlane.xlu0 %3541  ;;  %3731 = vadd.xlane.f32.xlu1 %v3730_v40  ;;  %3722 = vadd.xlane.f32.xlu0 %v3721_v63 }
 0x5de   : > { %v3605_v41 = vmul.f32 0.03125, %v3542_v51  ;;  %v3671_v62 = vmul.f32 %v6895_v32, %v6895_v32  ;;  %v6905_v39 = vsub.f32 %v6668_v49, %v3606_v48  ;;  %v3742_v49 = vsel %vm824_vm0, %v3672_v1, 0.0 }
 0x5df   : > { %v3563_v54 = vpop.xlane.xlu1 %3562 }
 0x5e0   : > { %v6908_v16 = vsub.f32 %v6656_v44, %v3605_v41  ;;  %v3612_v36 = vmul.f32 0.03125, %v3563_v54  ;;  %v3739_v9 = vsel %vm824_vm0, %v3671_v62, 0.0  ;;  %v3670_v27 = vmul.f32 %v6905_v39, %v6905_v39 }
 0x5e1   : > { %v3560_v42 = vpop.xlane.xlu0 %3559  ;;  %3725 = vadd.xlane.f32.xlu1 %v3724_v7  ;;  %3740 = vadd.xlane.f32.xlu0 %v3739_v9 }
 0x5e2   : > { %v3611_v57 = vmul.f32 0.03125, %v3560_v42  ;;  %v3669_v22 = vmul.f32 %v6908_v16, %v6908_v16  ;;  %v6914_v61 = vsub.f32 %v6697_v28, %v3612_v36  ;;  %v3736_v8 = vsel %vm824_vm0, %v3670_v27, 0.0 }
 0x5e3   : > { %v3557_v17 = vpop.xlane.xlu1 %3556 }
 0x5e4   : > { %v6918_v35 = vsub.f32 %v6687_v43, %v3611_v57  ;;  %v3610_v44 = vmul.f32 0.03125, %v3557_v17  ;;  %v3733_v21 = vsel %vm824_vm0, %v3669_v22, 0.0  ;;  %v3676_v43 = vmul.f32 %v6914_v61, %v6914_v61 }
 0x5e5   : > { %v3554_v13 = vpop.xlane.xlu0 %3553  ;;  %3743 = vadd.xlane.f32.xlu1 %v3742_v49  ;;  %3734 = vadd.xlane.f32.xlu0 %v3733_v21 }
 0x5e6   : > { %v3609_v12 = vmul.f32 0.03125, %v3554_v13  ;;  %v3675_v28 = vmul.f32 %v6918_v35, %v6918_v35  ;;  %v6926_v52 = vsub.f32 %v6704_v58, %v3610_v44  ;;  %v3754_v48 = vsel %vm824_vm0, %v3676_v43, 0.0 }
 0x5e7   : > { %v3575_v33 = vpop.xlane.xlu1 %3574 }
 0x5e8   : > { %v6931_v53 = vsub.f32 %v6692_v31, %v3609_v12  ;;  %v3616_v37 = vmul.f32 0.03125, %v3575_v33  ;;  %v3751_v24 = vsel %vm824_vm0, %v3675_v28, 0.0  ;;  %v3674_v40 = vmul.f32 %v6926_v52, %v6926_v52 }
 0x5e9   : > { %v3572_v29 = vpop.xlane.xlu0 %3571  ;;  %3737 = vadd.xlane.f32.xlu1 %v3736_v8  ;;  %3752 = vadd.xlane.f32.xlu0 %v3751_v24 }
 0x5ea   : > { %v3615_v25 = vmul.f32 0.03125, %v3572_v29  ;;  %v3673_v58 = vmul.f32 %v6931_v53, %v6931_v53  ;;  %v6941_v31 = vsub.f32 %v6733_v30, %v3616_v37 }
 0x5eb   : > { %v3569_v18 = vpop.xlane.xlu1 %3568 }
 0x5ec   : > { %v6944_v63 = vsub.f32 %v6723_v47, %v3615_v25  ;;  %v3614_v51 = vmul.f32 0.03125, %v3569_v18  ;;  %v3745_v41 = vsel %vm824_vm0, %v3673_v58, 0.0  ;;  %v3748_v47 = vsel %vm824_vm0, %v3674_v40, 0.0 }
 0x5ed   : > { %v3566_v62 = vpop.xlane.xlu0 %3565  ;;  %3755 = vadd.xlane.f32.xlu1 %v3754_v48  ;;  %3746 = vadd.xlane.f32.xlu0 %v3745_v41  ;;  %v3680_v42 = vmul.f32 %v6941_v31, %v6941_v31 }
 0x5ee   : > { %v3613_v54 = vmul.f32 0.03125, %v3566_v62  ;;  %v3679_v7 = vmul.f32 %v6944_v63, %v6944_v63  ;;  %v6950_v1 = vsub.f32 %v6740_v6, %v3614_v51 }
 0x5ef   : > { %v3766_v27 = vsel %vm824_vm0, %v3680_v42, 0.0 }
 0x5f0   : > { %v6953_v36 = vsub.f32 %v6728_v11, %v3613_v54  ;;  %v3581_v30 = vpop.xlane.xlu1 %3580  ;;  %v3763_v9 = vsel %vm824_vm0, %v3679_v7, 0.0  ;;  %v3678_v11 = vmul.f32 %v6950_v1, %v6950_v1 }
 0x5f1   : > { %v3618_v57 = vmul.f32 0.03125, %v3581_v30  ;;  %3749 = vadd.xlane.f32.xlu1 %v3748_v47  ;;  %3764 = vadd.xlane.f32.xlu0 %v3763_v9  ;;  %v3578_v22 = vpop.xlane.xlu0 %3577 }
 0x5f2   : > { %v3617_v17 = vmul.f32 0.03125, %v3578_v22  ;;  %v3677_v6 = vmul.f32 %v6953_v36, %v6953_v36  ;;  %v3760_v37 = vsel %vm824_vm0, %v3678_v11, 0.0 }
 0x5f3   : > { %v6964_v49 = vsub.f32 %v6776_v26, %v3618_v57 }
 0x5f4   : > { %v6967_v44 = vsub.f32 %v6764_v50, %v3617_v17  ;;  %v3587_v21 = vpop.xlane.xlu1 %3586  ;;  %v3757_v13 = vsel %vm824_vm0, %v3677_v6, 0.0  ;;  %v6993_v17 = vld [vmem:[%s7194_s10] ss:$0 sm:$0xff] }
 0x5f5   : > { %v3620_v12 = vmul.f32 0.03125, %v3587_v21  ;;  %3767 = vadd.xlane.f32.xlu1 %v3766_v27  ;;  %3758 = vadd.xlane.f32.xlu0 %v3757_v13  ;;  %v3584_v28 = vpop.xlane.xlu0 %3583  ;;  %v3682_v24 = vmul.f32 %v6964_v49, %v6964_v49 }
 0x5f6   : > { %v3619_v33 = vmul.f32 0.03125, %v3584_v28  ;;  %v3681_v43 = vmul.f32 %v6967_v44, %v6967_v44 }
 0x5f7   : > { %v6975_v26 = vsub.f32 %v6769_v19, %v3620_v12  ;;  %v3772_v25 = vsel %vm824_vm0, %v3682_v24, 0.0  ;;  %v6999_v12 = vld [vmem:[%s7212_s18] ss:$0 sm:$0xff] }
 0x5f8   : > { %v6978_v50 = vsub.f32 %v6759_v10, %v3619_v33  ;;  %v3769_v8 = vsel %vm824_vm0, %v3681_v43, 0.0 }
 0x5f9   : > { %3761 = vadd.xlane.f32.xlu1 %v3760_v37  ;;  %3770 = vadd.xlane.f32.xlu0 %v3769_v8  ;;  %v3684_v19 = vmul.f32 %v6975_v26, %v6975_v26 }
 0x5fa   : > { %v3683_v29 = vmul.f32 %v6978_v50, %v6978_v50 }
 0x5fb   : > { %v3778_v10 = vsel %vm824_vm0, %v3684_v19, 0.0 }
 0x5fc   : > { %v3775_v58 = vsel %vm824_vm0, %v3683_v29, 0.0 }
 0x5fd   : > { %3773 = vadd.xlane.f32.xlu1 %v3772_v25  ;;  %3776 = vadd.xlane.f32.xlu0 %v3775_v58 }
 0x601   : > { %3779 = vadd.xlane.f32.xlu1 %v3778_v10 }
 0x64a   : > { %v3693_v18 = vpop.xlane.xlu0 %3692 }
 0x64b   : > { %v3783_v48 = vmul.f32 0.03125, %v3693_v18 }
 0x64d   : > { %v3815_v40 = vadd.f32 1e-05, %v3783_v48 }
 0x64e   : > { %v3687_v51 = vpop.xlane.xlu0 %3686 }
 0x64f   : > { %5279 = vrsqrt.f32 %v3815_v40  ;;  %v3781_v41 = vmul.f32 0.03125, %v3687_v51 }
 0x651   : > { %v3813_v62 = vadd.f32 1e-05, %v3781_v41 }
 0x652   : > { %v3696_v54 = vpop.xlane.xlu1 %3695 }
 0x653   : > { %5281 = vrsqrt.f32 %v3813_v62  ;;  %v3784_v7 = vmul.f32 0.03125, %v3696_v54 }
 0x655   : > { %v3816_v30 = vadd.f32 1e-05, %v3784_v7 }
 0x656   : > { %v3690_v47 = vpop.xlane.xlu1 %3689  ;;  %v3705_v9 = vpop.xlane.xlu0 %3704 }
 0x657   : > { %5283 = vrsqrt.f32 %v3816_v30  ;;  %v3782_v42 = vmul.f32 0.03125, %v3690_v47  ;;  %v3787_v57 = vmul.f32 0.03125, %v3705_v9 }
 0x659   : > { %v5280_v22 = vpop.eup %5279  ;;  %v3814_v6 = vadd.f32 1e-05, %v3782_v42  ;;  %v3819_v11 = vadd.f32 1e-05, %v3787_v57 }
 0x65a   : > { %v3879_v21 = vmul.f32 %v5280_v22, %v6799_v2  ;;  %v3708_v27 = vpop.xlane.xlu1 %3707  ;;  %v3699_v13 = vpop.xlane.xlu0 %3698 }
 0x65b   : > { %5285 = vrsqrt.f32 %v3814_v6  ;;  %v3788_v28 = vmul.f32 0.03125, %v3708_v27  ;;  %v3785_v33 = vmul.f32 0.03125, %v3699_v13 }
 0x65c   : > { %v3917_v43 = vmul.f32 %v6993_v17, %v3879_v21  ;;  %5287 = vrsqrt.f32 %v3819_v11 }
 0x65d   : > { %v5282_v37 = vpop.eup %5281  ;;  %v3820_v8 = vadd.f32 1e-05, %v3788_v28  ;;  %v3817_v24 = vadd.f32 1e-05, %v3785_v33 }
 0x65e   : > { %v3955_v29 = vadd.f32 %v6999_v12, %v3917_v43  ;;  %v3877_v2 = vmul.f32 %v5282_v37, %v6804_v56  ;;  %v3702_v25 = vpop.xlane.xlu1 %3701  ;;  %v3717_v58 = vpop.xlane.xlu0 %3716 }
 0x65f   : > { %5289 = vrsqrt.f32 %v3820_v8  ;;  %v3786_v19 = vmul.f32 0.03125, %v3702_v25  ;;  %v3791_v10 = vmul.f32 0.03125, %v3717_v58 }
 0x660   : > { %v3987_v18 = vmax.f32 %v3955_v29, 0.0  ;;  %v3915_v48 = vmul.f32 %v6993_v17, %v3877_v2  ;;  %5291 = vrsqrt.f32 %v3817_v24 }
 0x661   : > { %v5284_v40 = vpop.eup %5283  ;;  %v3818_v51 = vadd.f32 1e-05, %v3786_v19  ;;  %v3823_v41 = vadd.f32 1e-05, %v3791_v10 }
 0x662   : > { %4019 = vst.msk [vmem:[%s7008_s15 + $0x10] sm:$0xff] %vm824_vm0, %v3987_v18  ;;  %v3953_v56 = vadd.f32 %v6999_v12, %v3915_v48  ;;  %v3880_v62 = vmul.f32 %v5284_v40, %v6813_v4  ;;  %v3720_v54 = vpop.xlane.xlu1 %3719  ;;  %v3711_v7 = vpop.xlane.xlu0 %3710 }
 0x663   : > { %5293 = vrsqrt.f32 %v3818_v51  ;;  %v3792_v30 = vmul.f32 0.03125, %v3720_v54  ;;  %v3789_v47 = vmul.f32 0.03125, %v3711_v7 }
 0x664   : > { %v3985_v9 = vmax.f32 %v3953_v56, 0.0  ;;  %v3918_v42 = vmul.f32 %v6993_v17, %v3880_v62  ;;  %5295 = vrsqrt.f32 %v3823_v41 }
 0x665   : > { %v5286_v57 = vpop.eup %5285  ;;  %v3824_v22 = vadd.f32 1e-05, %v3792_v30  ;;  %v3821_v6 = vadd.f32 1e-05, %v3789_v47 }
 0x666   : > { %v5288_v11 = vpop.eup %5287  ;;  %4017 = vst.msk [vmem:[%s7008_s15] sm:$0xff] %vm824_vm0, %v3985_v9  ;;  %v3956_v21 = vadd.f32 %v6999_v12, %v3918_v42  ;;  %v3878_v4 = vmul.f32 %v5286_v57, %v6810_v55  ;;  %v3714_v27 = vpop.xlane.xlu1 %3713 }
 0x667   : > { %v3729_v13 = vpop.xlane.xlu0 %3728  ;;  %v3883_v28 = vmul.f32 %v5288_v11, %v6824_v14  ;;  %5297 = vrsqrt.f32 %v3824_v22  ;;  %v3790_v33 = vmul.f32 0.03125, %v3714_v27 }
 0x668   : > { %v3795_v43 = vmul.f32 0.03125, %v3729_v13  ;;  %v3988_v37 = vmax.f32 %v3956_v21, 0.0  ;;  %v3916_v8 = vmul.f32 %v6993_v17, %v3878_v4  ;;  %5299 = vrsqrt.f32 %v3821_v6 }
 0x669   : > { %v5290_v24 = vpop.eup %5289  ;;  %v3921_v29 = vmul.f32 %v6993_v17, %v3883_v28  ;;  %v3822_v2 = vadd.f32 1e-05, %v3790_v33 }
 0x66a   : > { %v3827_v25 = vadd.f32 1e-05, %v3795_v43  ;;  %v5292_v58 = vpop.eup %5291  ;;  %4020 = vst.msk [vmem:[%s7008_s15 + $0x18] sm:$0xff] %vm824_vm0, %v3988_v37  ;;  %v3954_v55 = vadd.f32 %v6999_v12, %v3916_v8  ;;  %v3884_v19 = vmul.f32 %v5290_v24, %v6819_v23  ;;  %v3732_v14 = vpop.xlane.xlu1 %3731 }
 0x66b   : > { %v3723_v10 = vpop.xlane.xlu0 %3722  ;;  %v3959_v18 = vadd.f32 %v6999_v12, %v3921_v29  ;;  %v3881_v48 = vmul.f32 %v5292_v58, %v6836_v38  ;;  %5301 = vrsqrt.f32 %v3822_v2  ;;  %v3796_v40 = vmul.f32 0.03125, %v3732_v14 }
 0x66c   : > { %v3986_v51 = vmax.f32 %v3954_v55, 0.0  ;;  %v3922_v41 = vmul.f32 %v6993_v17, %v3884_v19  ;;  %5303 = vrsqrt.f32 %v3827_v25  ;;  %v3793_v56 = vmul.f32 0.03125, %v3723_v10 }
 0x66d   : > { %v5294_v62 = vpop.eup %5293  ;;  %v3991_v54 = vmax.f32 %v3959_v18, 0.0  ;;  %v3919_v7 = vmul.f32 %v6993_v17, %v3881_v48  ;;  %v3828_v23 = vadd.f32 1e-05, %v3796_v40 }
 0x66e   : > { %v5296_v30 = vpop.eup %5295  ;;  %4018 = vst.msk [vmem:[%s7008_s15 + $0x8] sm:$0xff] %vm824_vm0, %v3986_v51  ;;  %v3960_v47 = vadd.f32 %v6999_v12, %v3922_v41  ;;  %v3882_v38 = vmul.f32 %v5294_v62, %v6833_v5  ;;  %v3825_v9 = vadd.f32 1e-05, %v3793_v56  ;;  %v3726_v42 = vpop.xlane.xlu1 %3725 }
 0x66f   : > { %v3741_v57 = vpop.xlane.xlu0 %3740  ;;  %4023 = vst.msk [vmem:[%s7008_s15 + $0x30] sm:$0xff] %vm824_vm0, %v3991_v54  ;;  %v3957_v22 = vadd.f32 %v6999_v12, %v3919_v7  ;;  %v3887_v6 = vmul.f32 %v5296_v30, %v6846_v46  ;;  %5305 = vrsqrt.f32 %v3828_v23  ;;  %v3794_v11 = vmul.f32 0.03125, %v3726_v42 }
 0x670   : > { %v3992_v21 = vmax.f32 %v3960_v47, 0.0  ;;  %v3920_v4 = vmul.f32 %v6993_v17, %v3882_v38  ;;  %5307 = vrsqrt.f32 %v3825_v9  ;;  %v3799_v27 = vmul.f32 0.03125, %v3741_v57 }
 0x671   : > { %v5298_v13 = vpop.eup %5297  ;;  %v3989_v5 = vmax.f32 %v3957_v22, 0.0  ;;  %v3925_v28 = vmul.f32 %v6993_v17, %v3887_v6  ;;  %v3826_v33 = vadd.f32 1e-05, %v3794_v11 }
 0x672   : > { %v5300_v43 = vpop.eup %5299  ;;  %4024 = vst.msk [vmem:[%s7008_s15 + $0x38] sm:$0xff] %vm824_vm0, %v3992_v21  ;;  %v3958_v37 = vadd.f32 %v6999_v12, %v3920_v4  ;;  %v3888_v46 = vmul.f32 %v5298_v13, %v6842_v3  ;;  %v3831_v8 = vadd.f32 1e-05, %v3799_v27  ;;  %v3744_v24 = vpop.xlane.xlu1 %3743 }
 0x673   : > { %v3735_v29 = vpop.xlane.xlu0 %3734  ;;  %4021 = vst.msk [vmem:[%s7008_s15 + $0x20] sm:$0xff] %vm824_vm0, %v3989_v5  ;;  %v3963_v2 = vadd.f32 %v6999_v12, %v3925_v28  ;;  %v3885_v25 = vmul.f32 %v5300_v43, %v6859_v59  ;;  %5309 = vrsqrt.f32 %v3826_v33  ;;  %v3800_v58 = vmul.f32 0.03125, %v3744_v24 }
 0x674   : > { %v3990_v55 = vmax.f32 %v3958_v37, 0.0  ;;  %v3926_v19 = vmul.f32 %v6993_v17, %v3888_v46  ;;  %5311 = vrsqrt.f32 %v3831_v8  ;;  %v3797_v14 = vmul.f32 0.03125, %v3735_v29 }
 0x675   : > { %v5302_v10 = vpop.eup %5301  ;;  %v3995_v3 = vmax.f32 %v3963_v2, 0.0  ;;  %v3923_v18 = vmul.f32 %v6993_v17, %v3885_v25  ;;  %v3832_v48 = vadd.f32 1e-05, %v3800_v58 }
 0x676   : > { %v5304_v40 = vpop.eup %5303  ;;  %4022 = vst.msk [vmem:[%s7008_s15 + $0x28] sm:$0xff] %vm824_vm0, %v3990_v55  ;;  %v3964_v51 = vadd.f32 %v6999_v12, %v3926_v19  ;;  %v3886_v59 = vmul.f32 %v5302_v10, %v6854_v0  ;;  %v3829_v41 = vadd.f32 1e-05, %v3797_v14  ;;  %v3738_v56 = vpop.xlane.xlu1 %3737 }
 0x677   : > { %v3753_v62 = vpop.xlane.xlu0 %3752  ;;  %4027 = vst.msk [vmem:[%s7008_s15 + $0x50] sm:$0xff] %vm824_vm0, %v3995_v3  ;;  %v3961_v54 = vadd.f32 %v6999_v12, %v3923_v18  ;;  %v3891_v7 = vmul.f32 %v5304_v40, %v6872_v45  ;;  %5313 = vrsqrt.f32 %v3832_v48  ;;  %v3798_v23 = vmul.f32 0.03125, %v3738_v56 }
 0x678   : > { %v3996_v30 = vmax.f32 %v3964_v51, 0.0  ;;  %v3924_v47 = vmul.f32 %v6993_v17, %v3886_v59  ;;  %5315 = vrsqrt.f32 %v3829_v41  ;;  %v3803_v38 = vmul.f32 0.03125, %v3753_v62 }
 0x679   : > { %v5306_v9 = vpop.eup %5305  ;;  %v3993_v0 = vmax.f32 %v3961_v54, 0.0  ;;  %v3929_v42 = vmul.f32 %v6993_v17, %v3891_v7  ;;  %v3830_v57 = vadd.f32 1e-05, %v3798_v23 }
 0x67a   : > { %v5308_v22 = vpop.eup %5307  ;;  %4028 = vst.msk [vmem:[%s7008_s15 + $0x58] sm:$0xff] %vm824_vm0, %v3996_v30  ;;  %v3962_v6 = vadd.f32 %v6999_v12, %v3924_v47  ;;  %v3892_v45 = vmul.f32 %v5306_v9, %v6869_v20  ;;  %v3835_v11 = vadd.f32 1e-05, %v3803_v38  ;;  %v3756_v21 = vpop.xlane.xlu1 %3755 }
 0x67b   : > { %v3747_v4 = vpop.xlane.xlu0 %3746  ;;  %4025 = vst.msk [vmem:[%s7008_s15 + $0x40] sm:$0xff] %vm824_vm0, %v3993_v0  ;;  %v3967_v27 = vadd.f32 %v6999_v12, %v3929_v42  ;;  %v3889_v13 = vmul.f32 %v5308_v22, %v6882_v34  ;;  %5317 = vrsqrt.f32 %v3830_v57  ;;  %v3804_v5 = vmul.f32 0.03125, %v3756_v21 }
 0x67c   : > { %v3994_v28 = vmax.f32 %v3962_v6, 0.0  ;;  %v3930_v33 = vmul.f32 %v6993_v17, %v3892_v45  ;;  %5319 = vrsqrt.f32 %v3835_v11  ;;  %v3801_v43 = vmul.f32 0.03125, %v3747_v4 }
 0x67d   : > { %v5310_v37 = vpop.eup %5309  ;;  %v3999_v20 = vmax.f32 %v3967_v27, 0.0  ;;  %v3927_v46 = vmul.f32 %v6993_v17, %v3889_v13  ;;  %v3836_v8 = vadd.f32 1e-05, %v3804_v5 }
 0x67e   : > { %v5312_v24 = vpop.eup %5311  ;;  %4026 = vst.msk [vmem:[%s7008_s15 + $0x48] sm:$0xff] %vm824_vm0, %v3994_v28  ;;  %v3968_v29 = vadd.f32 %v6999_v12, %v3930_v33  ;;  %v3890_v34 = vmul.f32 %v5310_v37, %v6878_v60  ;;  %v3833_v2 = vadd.f32 1e-05, %v3801_v43  ;;  %v3750_v25 = vpop.xlane.xlu1 %3749 }
 0x67f   : > { %v3765_v58 = vpop.xlane.xlu0 %3764  ;;  %4031 = vst.msk [vmem:[%s7008_s15 + $0x70] sm:$0xff] %vm824_vm0, %v3999_v20  ;;  %v3965_v55 = vadd.f32 %v6999_v12, %v3927_v46  ;;  %v3895_v19 = vmul.f32 %v5312_v24, %v6895_v32  ;;  %5321 = vrsqrt.f32 %v3836_v8  ;;  %v3802_v14 = vmul.f32 0.03125, %v3750_v25 }
 0x680   : > { %v4000_v10 = vmax.f32 %v3968_v29, 0.0  ;;  %v3928_v3 = vmul.f32 %v6993_v17, %v3890_v34  ;;  %5323 = vrsqrt.f32 %v3833_v2  ;;  %v3807_v18 = vmul.f32 0.03125, %v3765_v58 }
 0x681   : > { %v5314_v48 = vpop.eup %5313  ;;  %v3997_v60 = vmax.f32 %v3965_v55, 0.0  ;;  %v3933_v40 = vmul.f32 %v6993_v17, %v3895_v19  ;;  %v3834_v51 = vadd.f32 1e-05, %v3802_v14 }
 0x682   : > { %v5316_v59 = vpop.eup %5315  ;;  %4032 = vst.msk [vmem:[%s7008_s15 + $0x78] sm:$0xff] %vm824_vm0, %v4000_v10  ;;  %v3966_v41 = vadd.f32 %v6999_v12, %v3928_v3  ;;  %v3896_v32 = vmul.f32 %v5314_v48, %v6890_v15  ;;  %v3839_v56 = vadd.f32 1e-05, %v3807_v18  ;;  %v3768_v62 = vpop.xlane.xlu1 %3767 }
 0x683   : > { %v3759_v54 = vpop.xlane.xlu0 %3758  ;;  %4029 = vst.msk [vmem:[%s7008_s15 + $0x60] sm:$0xff] %vm824_vm0, %v3997_v60  ;;  %v3971_v7 = vadd.f32 %v6999_v12, %v3933_v40  ;;  %v3893_v23 = vmul.f32 %v5316_v59, %v6908_v16  ;;  %5325 = vrsqrt.f32 %v3834_v51  ;;  %v3808_v30 = vmul.f32 0.03125, %v3768_v62 }
 0x684   : > { %v3998_v47 = vmax.f32 %v3966_v41, 0.0  ;;  %v3934_v38 = vmul.f32 %v6993_v17, %v3896_v32  ;;  %5327 = vrsqrt.f32 %v3839_v56  ;;  %v3805_v9 = vmul.f32 0.03125, %v3759_v54 }
 0x685   : > { %v5318_v0 = vpop.eup %5317  ;;  %v4003_v15 = vmax.f32 %v3971_v7, 0.0  ;;  %v3931_v42 = vmul.f32 %v6993_v17, %v3893_v23  ;;  %v3840_v57 = vadd.f32 1e-05, %v3808_v30 }
 0x686   : > { %v5320_v22 = vpop.eup %5319  ;;  %4030 = vst.msk [vmem:[%s7008_s15 + $0x68] sm:$0xff] %vm824_vm0, %v3998_v47  ;;  %v3972_v6 = vadd.f32 %v6999_v12, %v3934_v38  ;;  %v3894_v16 = vmul.f32 %v5318_v0, %v6905_v39  ;;  %v3837_v45 = vadd.f32 1e-05, %v3805_v9  ;;  %v3762_v11 = vpop.xlane.xlu1 %3761 }
 0x687   : > { %v3771_v21 = vpop.xlane.xlu0 %3770  ;;  %4035 = vst.msk [vmem:[%s7008_s15 + $0x90] sm:$0xff] %vm824_vm0, %v4003_v15  ;;  %v3969_v4 = vadd.f32 %v6999_v12, %v3931_v42  ;;  %v3899_v27 = vmul.f32 %v5320_v22, %v6918_v35  ;;  %5329 = vrsqrt.f32 %v3840_v57  ;;  %v3806_v13 = vmul.f32 0.03125, %v3762_v11 }
 0x688   : > { %v4004_v5 = vmax.f32 %v3972_v6, 0.0  ;;  %v3932_v28 = vmul.f32 %v6993_v17, %v3894_v16  ;;  %5331 = vrsqrt.f32 %v3837_v45  ;;  %v3809_v33 = vmul.f32 0.03125, %v3771_v21 }
 0x689   : > { %v5322_v43 = vpop.eup %5321  ;;  %v4001_v39 = vmax.f32 %v3969_v4, 0.0  ;;  %v3937_v37 = vmul.f32 %v6993_v17, %v3899_v27  ;;  %v3838_v20 = vadd.f32 1e-05, %v3806_v13 }
 0x68a   : > { %v5324_v46 = vpop.eup %5323  ;;  %4036 = vst.msk [vmem:[%s7008_s15 + $0x98] sm:$0xff] %vm824_vm0, %v4004_v5  ;;  %v3970_v8 = vadd.f32 %v6999_v12, %v3932_v28  ;;  %v3900_v35 = vmul.f32 %v5322_v43, %v6914_v61  ;;  %v3841_v24 = vadd.f32 1e-05, %v3809_v33  ;;  %v3774_v29 = vpop.xlane.xlu1 %3773 }
 0x68b   : > { %v3777_v34 = vpop.xlane.xlu0 %3776  ;;  %4033 = vst.msk [vmem:[%s7008_s15 + $0x80] sm:$0xff] %vm824_vm0, %v4001_v39  ;;  %v3975_v2 = vadd.f32 %v6999_v12, %v3937_v37  ;;  %v3897_v25 = vmul.f32 %v5324_v46, %v6931_v53  ;;  %5333 = vrsqrt.f32 %v3838_v20  ;;  %v3810_v58 = vmul.f32 0.03125, %v3774_v29 }
 0x68c   : > { %v4002_v55 = vmax.f32 %v3970_v8, 0.0  ;;  %v3938_v19 = vmul.f32 %v6993_v17, %v3900_v35  ;;  %5335 = vrsqrt.f32 %v3841_v24  ;;  %v3811_v14 = vmul.f32 0.03125, %v3777_v34 }
 0x68d   : > { %v5326_v10 = vpop.eup %5325  ;;  %v4007_v61 = vmax.f32 %v3975_v2, 0.0  ;;  %v3935_v3 = vmul.f32 %v6993_v17, %v3897_v25  ;;  %v3842_v18 = vadd.f32 1e-05, %v3810_v58 }
 0x68e   : > { %v5328_v48 = vpop.eup %5327  ;;  %4034 = vst.msk [vmem:[%s7008_s15 + $0x88] sm:$0xff] %vm824_vm0, %v4002_v55  ;;  %v3976_v60 = vadd.f32 %v6999_v12, %v3938_v19  ;;  %v3898_v53 = vmul.f32 %v5326_v10, %v6926_v52  ;;  %v3843_v40 = vadd.f32 1e-05, %v3811_v14  ;;  %v3780_v51 = vpop.xlane.xlu1 %3779 }
 0x68f   : > { %4039 = vst.msk [vmem:[%s7008_s15 + $0xb0] sm:$0xff] %vm824_vm0, %v4007_v61  ;;  %v3973_v59 = vadd.f32 %v6999_v12, %v3935_v3  ;;  %v3903_v41 = vmul.f32 %v5328_v48, %v6944_v63  ;;  %5337 = vrsqrt.f32 %v3842_v18  ;;  %v3812_v32 = vmul.f32 0.03125, %v3780_v51 }
 0x690   : > { %v4008_v56 = vmax.f32 %v3976_v60, 0.0  ;;  %v3936_v62 = vmul.f32 %v6993_v17, %v3898_v53  ;;  %5339 = vrsqrt.f32 %v3843_v40 }
 0x691   : > { %v5330_v54 = vpop.eup %5329  ;;  %v4005_v7 = vmax.f32 %v3973_v59, 0.0  ;;  %v3941_v52 = vmul.f32 %v6993_v17, %v3903_v41  ;;  %v3844_v23 = vadd.f32 1e-05, %v3812_v32 }
 0x692   : > { %v5332_v30 = vpop.eup %5331  ;;  %4040 = vst.msk [vmem:[%s7008_s15 + $0xb8] sm:$0xff] %vm824_vm0, %v4008_v56  ;;  %v3974_v47 = vadd.f32 %v6999_v12, %v3936_v62  ;;  %v3904_v63 = vmul.f32 %v5330_v54, %v6941_v31 }
 0x693   : > { %4037 = vst.msk [vmem:[%s7008_s15 + $0xa0] sm:$0xff] %vm824_vm0, %v4005_v7  ;;  %v3979_v38 = vadd.f32 %v6999_v12, %v3941_v52  ;;  %v3901_v9 = vmul.f32 %v5332_v30, %v6953_v36  ;;  %5341 = vrsqrt.f32 %v3844_v23 }
 0x694   : > { %v4006_v0 = vmax.f32 %v3974_v47, 0.0  ;;  %v3942_v15 = vmul.f32 %v6993_v17, %v3904_v63 }
 0x695   : > { %v5334_v42 = vpop.eup %5333  ;;  %v4011_v57 = vmax.f32 %v3979_v38, 0.0  ;;  %v3939_v22 = vmul.f32 %v6993_v17, %v3901_v9 }
 0x696   : > { %v5336_v6 = vpop.eup %5335  ;;  %4038 = vst.msk [vmem:[%s7008_s15 + $0xa8] sm:$0xff] %vm824_vm0, %v4006_v0  ;;  %v3980_v31 = vadd.f32 %v6999_v12, %v3942_v15  ;;  %v3902_v16 = vmul.f32 %v5334_v42, %v6950_v1 }
 0x697   : > { %4043 = vst.msk [vmem:[%s7008_s15 + $0xd0] sm:$0xff] %vm824_vm0, %v4011_v57  ;;  %v3977_v36 = vadd.f32 %v6999_v12, %v3939_v22  ;;  %v3905_v45 = vmul.f32 %v5336_v6, %v6967_v44 }
 0x698   : > { %v4012_v11 = vmax.f32 %v3980_v31, 0.0  ;;  %v3940_v21 = vmul.f32 %v6993_v17, %v3902_v16 }
 0x699   : > { %v5338_v4 = vpop.eup %5337  ;;  %v4009_v27 = vmax.f32 %v3977_v36, 0.0  ;;  %v3943_v13 = vmul.f32 %v6993_v17, %v3905_v45 }
 0x69a   : > { %v5340_v5 = vpop.eup %5339  ;;  %4044 = vst.msk [vmem:[%s7008_s15 + $0xd8] sm:$0xff] %vm824_vm0, %v4012_v11  ;;  %v3978_v1 = vadd.f32 %v6999_v12, %v3940_v21  ;;  %v3906_v28 = vmul.f32 %v5338_v4, %v6964_v49 }
 0x69b   : > { %4041 = vst.msk [vmem:[%s7008_s15 + $0xc0] sm:$0xff] %vm824_vm0, %v4009_v27  ;;  %v3981_v44 = vadd.f32 %v6999_v12, %v3943_v13  ;;  %v3907_v33 = vmul.f32 %v5340_v5, %v6978_v50 }
 0x69c   : > { %v4010_v43 = vmax.f32 %v3978_v1, 0.0  ;;  %v3944_v39 = vmul.f32 %v6993_v17, %v3906_v28 }
 0x69d   : > { %v5342_v37 = vpop.eup %5341  ;;  %v4013_v20 = vmax.f32 %v3981_v44, 0.0  ;;  %v3945_v46 = vmul.f32 %v6993_v17, %v3907_v33 }
 0x69e   : > { %4042 = vst.msk [vmem:[%s7008_s15 + $0xc8] sm:$0xff] %vm824_vm0, %v4010_v43  ;;  %v3982_v49 = vadd.f32 %v6999_v12, %v3944_v39  ;;  %v3908_v8 = vmul.f32 %v5342_v37, %v6975_v26 }
 0x69f   : > { %4045 = vst.msk [vmem:[%s7008_s15 + $0xe0] sm:$0xff] %vm824_vm0, %v4013_v20  ;;  %v3983_v35 = vadd.f32 %v6999_v12, %v3945_v46 }
 0x6a0   : > { %v4014_v50 = vmax.f32 %v3982_v49, 0.0  ;;  %v3946_v24 = vmul.f32 %v6993_v17, %v3908_v8 }
 0x6a1   : > { %v4015_v29 = vmax.f32 %v3983_v35, 0.0 }
 0x6a2   : > { %4046 = vst.msk [vmem:[%s7008_s15 + $0xe8] sm:$0xff] %vm824_vm0, %v4014_v50  ;;  %v3984_v34 = vadd.f32 %v6999_v12, %v3946_v24 }
 0x6a3   : > { %4047 = vst.msk [vmem:[%s7008_s15 + $0xf0] sm:$0xff] %vm824_vm0, %v4015_v29 }
 0x6a4   : > { %v4016_v2 = vmax.f32 %v3984_v34, 0.0 }
 0x6a6   : > { %4048 = vst.msk [vmem:[%s7008_s15 + $0xf8] sm:$0xff] %vm824_vm0, %v4016_v2 }
 0x6a7 PF: > { %s27_s30 = sadd.s32 1, %s5423_s30   ;;  %s7214_s23 = sld [smem:[#allocation6_spill]] }
 0x6a8   : > { %p24_p9 = scmp.ge.s32.totalorder %s27_s30, 4   ;;  %s7215_s25 = smov %s5407_s26 }
 0x6a9   : > { %s7216_s26 = smov %s5411_s27  ;;  %s7217_s27 = smov %s5550_s20 }
 0x6aa   : > { %s7218_s28 = smov %s5419_s29  ;;  %26 = sbr.rel (!%p24_p9) target bundleno = 8 (0x8), region = 134 }
 0x6ad   : > { %s7219_s29 = smov %s7214_s23 }
 0x6b1   :  { %4088 = vsyncpa [#allocation4], 1 }
 0x6b2   :  { %4090 = vsyncpa [#allocation4 + $0x1], 1 }

</bundles_post_ra>
